<compile_context>
chip_gen: v7x
topology: tpu7x:2x2x1
jax: 0.10.0
libtpu: 0.0.40
codegen_flags: <defaults>
</compile_context>

<pallas_src>
import functools

import jax
import jax.numpy as jnp
from jax.experimental import pallas as pl
from jax.experimental.pallas import tpu as pltpu

_EPS = 1e-5     # BatchNorm2d default eps
_SLOPE = 0.2    # leaky_relu negative slope


# ----------------------------- Pallas kernel --------------------------------

def _make_kernel(n_branches, inv_m):
    """Fused kernel: sum_b LeakyReLU(BN_b(patches_b @ w_b)).

    Ref layout: for each branch b -> (p_b, w_b, gamma_b, beta_b) inputs, then
    the single output ref, then for each branch -> (sum_b, sumsq_b) scratch.
    Grid = (phase, m_tile); phase 0 accumulates BN stats, phase 1 normalizes.
    """

    def kernel(*refs):
        ins = refs[: 4 * n_branches]
        o_ref = refs[4 * n_branches]
        scr = refs[4 * n_branches + 1:]

        phase = pl.program_id(0)
        m = pl.program_id(1)

        # MXU matmul in bf16 with f32 accumulation; needed in both phases.
        zs = []
        for b in range(n_branches):
            p_ref, w_ref = ins[4 * b], ins[4 * b + 1]
            zs.append(jnp.dot(p_ref[...], w_ref[...],
                              preferred_element_type=jnp.float32))

        @pl.when((phase == 0) & (m == 0))
        def _():
            for r in scr:
                r[...] = jnp.zeros_like(r)

        @pl.when(phase == 0)
        def _():
            for b in range(n_branches):
                s_ref, q_ref = scr[2 * b], scr[2 * b + 1]
                z = zs[b]
                s_ref[...] += jnp.sum(z, axis=0, keepdims=True)
                q_ref[...] += jnp.sum(z * z, axis=0, keepdims=True)

        @pl.when(phase == 1)
        def _():
            acc = None
            for b in range(n_branches):
                g_ref, t_ref = ins[4 * b + 2], ins[4 * b + 3]
                s_ref, q_ref = scr[2 * b], scr[2 * b + 1]
                mu = s_ref[...] * inv_m                       # (1, Cout)
                var = q_ref[...] * inv_m - mu * mu            # biased var
                scale = g_ref[...] * jax.lax.rsqrt(var + _EPS)
                y = (zs[b] - mu) * scale + t_ref[...]
                y = jnp.where(y >= 0.0, y, _SLOPE * y)
                acc = y if acc is None else acc + y
            o_ref[...] = acc

    return kernel


def _round_up(x, d):
    return (x + d - 1) // d * d


def fused_conv_bn_lrelu(branches, tile_m=256):
    """branches: list of (patches (M,K) f32, w2d (K,Cout) f32, gamma, beta).

    Returns sum_b LeakyReLU(BatchNorm_train(patches_b @ w_b)) of shape
    (M, Cout) in f32.  No conv bias: it cancels under training-mode BN.
    """
    m_real = branches[0][0].shape[0]
    cout = branches[0][1].shape[1]
    for (p, w, g, t) in branches:
        assert p.shape[0] == m_real and w.shape[1] == cout

    # Zero-padded rows contribute exactly z = 0 (no bias), so the statistics
    # stay exact as long as we divide by the true row count m_real.
    m_pad = _round_up(m_real, tile_m)
    n_m = m_pad // tile_m
    inv_m = 1.0 / float(m_real)

    args, in_specs, scratch_shapes = [], [], []
    for (p, w, g, t) in branches:
        k = p.shape[1]
        p = p.astype(jnp.bfloat16)
        if m_pad != m_real:
            p = jnp.pad(p, ((0, m_pad - m_real), (0, 0)))
        args += [p,
                 w.astype(jnp.bfloat16),
                 g.reshape(1, cout).astype(jnp.float32),
                 t.reshape(1, cout).astype(jnp.float32)]
        in_specs += [
            # Patch tiles stream twice (once per phase); double-buffered.
            pl.BlockSpec((tile_m, k), lambda ph, mi: (mi, 0)),
            # Weights / affine params: fetched once, VMEM-resident.
            pl.BlockSpec((k, cout), lambda ph, mi: (0, 0)),
            pl.BlockSpec((1, cout), lambda ph, mi: (0, 0)),
            pl.BlockSpec((1, cout), lambda ph, mi: (0, 0)),
        ]
        scratch_shapes += [pltpu.VMEM((1, cout), jnp.float32),   # sum
                           pltpu.VMEM((1, cout), jnp.float32)]   # sum of squares

    out = pl.pallas_call(
        _make_kernel(len(branches), inv_m),
        out_shape=jax.ShapeDtypeStruct((m_pad, cout), jnp.float32),
        grid_spec=pltpu.PrefetchScalarGridSpec(
            num_scalar_prefetch=0,
            grid=(2, n_m),
            in_specs=in_specs,
            # ph*mi keeps the output block pinned at 0 (never flushed) during
            # the stats phase; blocks are written and flushed only in phase 1.
            out_specs=pl.BlockSpec((tile_m, cout), lambda ph, mi: (ph * mi, 0)),
            scratch_shapes=scratch_shapes),
        compiler_params=pltpu.CompilerParams(
            # Both axes carry state (phase ordering + BN stat accumulation),
            # so they must stay sequential on one TensorCore.
            dimension_semantics=("arbitrary", "arbitrary")),
    )(*args)
    return out[:m_real]


# ------------------------------ JAX glue ops ---------------------------------

def _bilinear_src(out_size, in_size):
    # PyTorch align_corners=False source coordinates.
    j = jnp.arange(out_size, dtype=jnp.float32)
    src = (j + 0.5) * (in_size / out_size) - 0.5
    src = jnp.maximum(src, 0.0)
    i0 = jnp.minimum(jnp.floor(src).astype(jnp.int32), in_size - 1)
    i1 = jnp.minimum(i0 + 1, in_size - 1)
    w1 = src - i0.astype(jnp.float32)
    return i0, i1, 1.0 - w1, w1


def bilinear_upsample(x, scale):
    """x: (N, C, H, W) -> (N, C, H*s, W*s); matches nn.Upsample(bilinear, align_corners=False)."""
    _, _, h, w = x.shape
    h0, h1, wh0, wh1 = _bilinear_src(h * scale, h)
    v0, v1, wv0, wv1 = _bilinear_src(w * scale, w)
    rows = (x[:, :, h0, :] * wh0[None, None, :, None]
            + x[:, :, h1, :] * wh1[None, None, :, None])
    return rows[:, :, :, v0] * wv0 + rows[:, :, :, v1] * wv1


def im2col(x, stride):
    """x: (N, C, H, W) -> patches (N*Ho*Wo, C*9) for a 3x3 conv, padding=1."""
    n, c, h, w = x.shape
    xp = jnp.pad(x, ((0, 0), (0, 0), (1, 1), (1, 1)))
    ho = (h + 2 - 3) // stride + 1
    wo = (w + 2 - 3) // stride + 1
    cols = []
    for kh in range(3):
        for kw in range(3):
            sl = xp[:, :,
                    kh:kh + stride * (ho - 1) + 1:stride,
                    kw:kw + stride * (wo - 1) + 1:stride]      # (N, C, Ho, Wo)
            cols.append(sl)
    pat = jnp.stack(cols, axis=2)                              # (N, C, 9, Ho, Wo)
    pat = pat.transpose(0, 3, 4, 1, 2).reshape(n * ho * wo, c * 9)
    return pat, ho, wo


def flat_w(w):
    # (Cout, Cin, 3, 3) -> (Cin*9, Cout), matching im2col column order.
    return w.reshape(w.shape[0], -1).T


def rows_to_nchw(y, n, ho, wo):
    return y.reshape(n, ho, wo, -1).transpose(0, 3, 1, 2)


# --------------------------- ResBlock_Up forward -----------------------------

def resblock_up_forward(x, params):
    (w1, b1, g1, t1), (w2, b2, g2, t2), (w3, b3, g3, t3) = params
    # Conv biases cancel exactly under training-mode BatchNorm -> never used.
    del b1, b2, b3
    n = x.shape[0]

    # conv1 branch: Upsample(2) -> Conv(Cin->Cin, k3, s2, p1) -> BN -> lrelu
    u1 = bilinear_upsample(x, 2)
    p1, ho1, wo1 = im2col(u1, stride=2)
    y1 = fused_conv_bn_lrelu([(p1, flat_w(w1), g1, t1)])
    y1 = rows_to_nchw(y1, n, ho1, wo1)

    # conv2 branch: Upsample(2) -> Conv(Cin->Cout, k3, s1, p1) -> BN -> lrelu
    u2 = bilinear_upsample(y1, 2)
    p2, ho2, wo2 = im2col(u2, stride=1)

    # shortcut branch: Upsample(4) -> Conv(Cin->Cout, k3, s2, p1) -> BN -> lrelu
    # TODO(synk): avoid materializing the 4x-upsampled intermediate by
    # composing the upsample taps with the stride-2 sampling on the 2x grid.
    u3 = bilinear_upsample(x, 4)
    p3, _, _ = im2col(u3, stride=2)

    # conv2 + shortcut fused: both BN/LeakyReLU branches and the residual add
    # happen inside one pallas_call (no HBM round-trip for the shortcut).
    y = fused_conv_bn_lrelu([(p2, flat_w(w2), g2, t2),
                             (p3, flat_w(w3), g3, t3)])
    return rows_to_nchw(y, n, ho2, wo2)


# ------------------------------ pure-JAX ref ----------------------------------

def ref_forward(x, params):
    (w1, b1, g1, t1), (w2, b2, g2, t2), (w3, b3, g3, t3) = params

    def conv(z, w, b, stride):
        y = jax.lax.conv_general_dilated(
            z, w, window_strides=(stride, stride), padding=((1, 1), (1, 1)),
            dimension_numbers=("NCHW", "OIHW", "NCHW"))
        return y + b[None, :, None, None]

    def bn_lrelu(z, g, t):
        mu = jnp.mean(z, axis=(0, 2, 3), keepdims=True)
        var = jnp.mean(jnp.square(z - mu), axis=(0, 2, 3), keepdims=True)
        y = (z - mu) * jax.lax.rsqrt(var + _EPS) * g[None, :, None, None] + t[None, :, None, None]
        return jnp.where(y >= 0, y, _SLOPE * y)

    o1 = bn_lrelu(conv(bilinear_upsample(x, 2), w1, b1, 2), g1, t1)
    o2 = bn_lrelu(conv(bilinear_upsample(o1, 2), w2, b2, 1), g2, t2)
    s = bn_lrelu(conv(bilinear_upsample(x, 4), w3, b3, 2), g3, t3)
    return o2 + s


# ---------------------------------- main --------------------------------------

if __name__ == "__main__":
    N, Cin, H, W = 2, 4, 16, 16
    Cout = 8

    key = jax.random.PRNGKey(0)
    ks = jax.random.split(key, 13)
    x = jax.random.normal(ks[0], (N, Cin, H, W), jnp.float32)

    def make_params(kw, kb, kg, kt, cin, cout):
        w = 0.1 * jax.random.normal(kw, (cout, cin, 3, 3), jnp.float32)
        b = 0.05 * jax.random.normal(kb, (cout,), jnp.float32)
        g = 1.0 + 0.1 * jax.random.normal(kg, (cout,), jnp.float32)
        t = 0.1 * jax.random.normal(kt, (cout,), jnp.float32)
        return (w, b, g, t)

    params = (
        make_params(ks[1], ks[2], ks[3], ks[4], Cin, Cin),      # conv1 + bn1
        make_params(ks[5], ks[6], ks[7], ks[8], Cin, Cout),     # conv2 + bn2
        make_params(ks[9], ks[10], ks[11], ks[12], Cin, Cout),  # shortcut conv + bn
    )

    out = jax.jit(resblock_up_forward)(x, params)
    out = jax.block_until_ready(out)

    assert out.shape == (N, Cout, 2 * H, 2 * W), out.shape
    assert bool(jnp.all(jnp.isfinite(out)))

    ref = ref_forward(x, params)
    max_err = float(jnp.max(jnp.abs(out - ref)))
    if max_err > 5e-2:  # bf16-operand MXU vs XLA f32 default-precision conv
        raise AssertionError(f"mismatch vs pure-JAX reference, max abs err = {max_err}")

    print("KERNEL_OK")
</pallas_src>

<mosaic_0001>
module attributes {stable_mosaic.version = 11 : i64} {
  func.func @kernel(%arg0: i32, %arg1: i32, %arg2: memref<256x36xbf16, #tpu.memory_space<vmem>>, %arg3: memref<36x4xbf16, #tpu.memory_space<vmem>>, %arg4: memref<1x4xf32, #tpu.memory_space<vmem>>, %arg5: memref<1x4xf32, #tpu.memory_space<vmem>>, %arg6: memref<256x4xf32, #tpu.memory_space<vmem>>, %arg7: memref<1x4xf32, #tpu.memory_space<vmem>>, %arg8: memref<1x4xf32, #tpu.memory_space<vmem>>) attributes {dimension_semantics = [#tpu.dimension_semantics<arbitrary>, #tpu.dimension_semantics<arbitrary>], iteration_bounds = array<i64: 2, 2>, scalar_prefetch = 0 : i64, scratch_operands = 2 : i64, tpu.core_type = #tpu.core_type<tc>, window_params = [{transform_indices = @transform_0, window_bounds = array<i64: 256, 36>}, {pipeline_mode = #tpu.pipeline_mode<synchronous>, transform_indices = @transform_1, window_bounds = array<i64: 36, 4>}, {pipeline_mode = #tpu.pipeline_mode<synchronous>, transform_indices = @transform_2, window_bounds = array<i64: 1, 4>}, {pipeline_mode = #tpu.pipeline_mode<synchronous>, transform_indices = @transform_3, window_bounds = array<i64: 1, 4>}, {transform_indices = @transform_4, window_bounds = array<i64: 256, 4>}]} {
    %c0 = arith.constant 0 : index
    %c0_0 = arith.constant 0 : index
    %0 = vector.load %arg2[%c0, %c0_0] : memref<256x36xbf16, #tpu.memory_space<vmem>>, vector<256x36xbf16>
    %c0_1 = arith.constant 0 : index
    %c0_2 = arith.constant 0 : index
    %1 = vector.load %arg3[%c0_1, %c0_2] : memref<36x4xbf16, #tpu.memory_space<vmem>>, vector<36x4xbf16>
    %cst = arith.constant dense<0.000000e+00> : vector<256x4xf32>
    %2 = tpu.matmul %0, %1, %cst {dimension_numbers = #tpu.dot_dimension_numbers<[1], [0], [0], [1], [0, 0, 1, 1], [], []>} : vector<256x36xbf16>, vector<36x4xbf16>, vector<256x4xf32> -> vector<256x4xf32>
    %c0_i32 = arith.constant 0 : i32
    %3 = arith.cmpi eq, %arg0, %c0_i32 : i32
    %c0_i32_3 = arith.constant 0 : i32
    %4 = arith.cmpi eq, %arg1, %c0_i32_3 : i32
    %5 = arith.andi %3, %4 : i1
    %6 = arith.extui %5 : i1 to i32
    %c0_i32_4 = arith.constant 0 : i32
    %7 = arith.cmpi ne, %6, %c0_i32_4 : i32
    scf.if %7 {
      %cst_8 = arith.constant 0.000000e+00 : f32
      %14 = vector.broadcast %cst_8 : f32 to vector<1x4xf32>
      %c0_9 = arith.constant 0 : index
      %c0_10 = arith.constant 0 : index
      %15 = vector.load %arg7[%c0_9, %c0_10] : memref<1x4xf32, #tpu.memory_space<vmem>>, vector<1x4xf32>
      tpu.vector_store %arg7[%c0_9, %c0_10], %14 {strides = array<i32>} : memref<1x4xf32, #tpu.memory_space<vmem>>, vector<1x4xf32>,
      %cst_11 = arith.constant 0.000000e+00 : f32
      %16 = vector.broadcast %cst_11 : f32 to vector<1x4xf32>
      %c0_12 = arith.constant 0 : index
      %c0_13 = arith.constant 0 : index
      %17 = vector.load %arg8[%c0_12, %c0_13] : memref<1x4xf32, #tpu.memory_space<vmem>>, vector<1x4xf32>
      tpu.vector_store %arg8[%c0_12, %c0_13], %16 {strides = array<i32>} : memref<1x4xf32, #tpu.memory_space<vmem>>, vector<1x4xf32>,
    } else {
    }
    %c0_i32_5 = arith.constant 0 : i32
    %8 = arith.cmpi eq, %arg0, %c0_i32_5 : i32
    %9 = arith.extui %8 : i1 to i32
    %c0_i32_6 = arith.constant 0 : i32
    %10 = arith.cmpi ne, %9, %c0_i32_6 : i32
    scf.if %10 {
      %c0_8 = arith.constant 0 : index
      %c0_9 = arith.constant 0 : index
      %14 = vector.load %arg7[%c0_8, %c0_9] : memref<1x4xf32, #tpu.memory_space<vmem>>, vector<1x4xf32>
      %cst_10 = arith.constant dense<0.000000e+00> : vector<4xf32>
      %15 = vector.multi_reduction <add>, %2, %cst_10 [0] : vector<256x4xf32> to vector<4xf32>
      %16 = vector.shape_cast %15 : vector<4xf32> to vector<1x4xf32>
      %17 = arith.addf %14, %16 : vector<1x4xf32>
      %c0_11 = arith.constant 0 : index
      %c0_12 = arith.constant 0 : index
      %18 = vector.load %arg7[%c0_11, %c0_12] : memref<1x4xf32, #tpu.memory_space<vmem>>, vector<1x4xf32>
      tpu.vector_store %arg7[%c0_11, %c0_12], %17 {strides = array<i32>} : memref<1x4xf32, #tpu.memory_space<vmem>>, vector<1x4xf32>,
      %c0_13 = arith.constant 0 : index
      %c0_14 = arith.constant 0 : index
      %19 = vector.load %arg8[%c0_13, %c0_14] : memref<1x4xf32, #tpu.memory_space<vmem>>, vector<1x4xf32>
      %20 = arith.mulf %2, %2 : vector<256x4xf32>
      %cst_15 = arith.constant dense<0.000000e+00> : vector<4xf32>
      %21 = vector.multi_reduction <add>, %20, %cst_15 [0] : vector<256x4xf32> to vector<4xf32>
      %22 = vector.shape_cast %21 : vector<4xf32> to vector<1x4xf32>
      %23 = arith.addf %19, %22 : vector<1x4xf32>
      %c0_16 = arith.constant 0 : index
      %c0_17 = arith.constant 0 : index
      %24 = vector.load %arg8[%c0_16, %c0_17] : memref<1x4xf32, #tpu.memory_space<vmem>>, vector<1x4xf32>
      tpu.vector_store %arg8[%c0_16, %c0_17], %23 {strides = array<i32>} : memref<1x4xf32, #tpu.memory_space<vmem>>, vector<1x4xf32>,
    } else {
    }
    %c1_i32 = arith.constant 1 : i32
    %11 = arith.cmpi eq, %arg0, %c1_i32 : i32
    %12 = arith.extui %11 : i1 to i32
    %c0_i32_7 = arith.constant 0 : i32
    %13 = arith.cmpi ne, %12, %c0_i32_7 : i32
    scf.if %13 {
      %c0_8 = arith.constant 0 : index
      %c0_9 = arith.constant 0 : index
      %14 = vector.load %arg7[%c0_8, %c0_9] : memref<1x4xf32, #tpu.memory_space<vmem>>, vector<1x4xf32>
      %cst_10 = arith.constant 0.001953125 : f32
      %15 = vector.broadcast %cst_10 : f32 to vector<1x4xf32>
      %16 = arith.mulf %14, %15 : vector<1x4xf32>
      %c0_11 = arith.constant 0 : index
      %c0_12 = arith.constant 0 : index
      %17 = vector.load %arg8[%c0_11, %c0_12] : memref<1x4xf32, #tpu.memory_space<vmem>>, vector<1x4xf32>
      %cst_13 = arith.constant 0.001953125 : f32
      %18 = vector.broadcast %cst_13 : f32 to vector<1x4xf32>
      %19 = arith.mulf %17, %18 : vector<1x4xf32>
      %20 = arith.mulf %16, %16 : vector<1x4xf32>
      %21 = arith.subf %19, %20 : vector<1x4xf32>
      %c0_14 = arith.constant 0 : index
      %c0_15 = arith.constant 0 : index
      %22 = vector.load %arg4[%c0_14, %c0_15] : memref<1x4xf32, #tpu.memory_space<vmem>>, vector<1x4xf32>
      %cst_16 = arith.constant 9.99999974E-6 : f32
      %23 = vector.broadcast %cst_16 : f32 to vector<1x4xf32>
      %24 = arith.addf %21, %23 : vector<1x4xf32>
      %25 = math.rsqrt %24 : vector<1x4xf32>
      %26 = arith.mulf %22, %25 : vector<1x4xf32>
      %27 = vector.broadcast %16 : vector<1x4xf32> to vector<256x4xf32>
      %28 = arith.subf %2, %27 : vector<256x4xf32>
      %29 = vector.broadcast %26 : vector<1x4xf32> to vector<256x4xf32>
      %30 = arith.mulf %28, %29 : vector<256x4xf32>
      %c0_17 = arith.constant 0 : index
      %c0_18 = arith.constant 0 : index
      %31 = vector.load %arg5[%c0_17, %c0_18] : memref<1x4xf32, #tpu.memory_space<vmem>>, vector<1x4xf32>
      %32 = vector.broadcast %31 : vector<1x4xf32> to vector<256x4xf32>
      %33 = arith.addf %30, %32 : vector<256x4xf32>
      %cst_19 = arith.constant 0.000000e+00 : f32
      %34 = vector.broadcast %cst_19 : f32 to vector<256x4xf32>
      %35 = arith.cmpf oge, %33, %34 : vector<256x4xf32>
      %cst_20 = arith.constant 2.000000e-01 : f32
      %36 = vector.broadcast %cst_20 : f32 to vector<256x4xf32>
      %37 = arith.mulf %36, %33 : vector<256x4xf32>
      %38 = arith.select %35, %33, %37 : vector<256x4xi1>, vector<256x4xf32>
      %c0_21 = arith.constant 0 : index
      %c0_22 = arith.constant 0 : index
      %39 = vector.load %arg6[%c0_21, %c0_22] : memref<256x4xf32, #tpu.memory_space<vmem>>, vector<256x4xf32>
      tpu.vector_store %arg6[%c0_21, %c0_22], %38 {strides = array<i32>} : memref<256x4xf32, #tpu.memory_space<vmem>>, vector<256x4xf32>,
    } else {
    }
    return
  }
  func.func @transform_0(%arg0: i32, %arg1: i32) -> (i32, i32) {
    %c0_i32 = arith.constant 0 : i32
    %c0_i32_0 = arith.constant 0 : i32
    return %arg1, %c0_i32 : i32, i32
  }
  func.func @transform_1(%arg0: i32, %arg1: i32) -> (i32, i32) {
    %c0_i32 = arith.constant 0 : i32
    %c0_i32_0 = arith.constant 0 : i32
    %c0_i32_1 = arith.constant 0 : i32
    return %c0_i32, %c0_i32_0 : i32, i32
  }
  func.func @transform_2(%arg0: i32, %arg1: i32) -> (i32, i32) {
    %c0_i32 = arith.constant 0 : i32
    %c0_i32_0 = arith.constant 0 : i32
    %c0_i32_1 = arith.constant 0 : i32
    return %c0_i32, %c0_i32_0 : i32, i32
  }
  func.func @transform_3(%arg0: i32, %arg1: i32) -> (i32, i32) {
    %c0_i32 = arith.constant 0 : i32
    %c0_i32_0 = arith.constant 0 : i32
    %c0_i32_1 = arith.constant 0 : i32
    return %c0_i32, %c0_i32_0 : i32, i32
  }
  func.func @transform_4(%arg0: i32, %arg1: i32) -> (i32, i32) {
    %0 = arith.muli %arg0, %arg1 : i32
    %c0_i32 = arith.constant 0 : i32
    %c0_i32_0 = arith.constant 0 : i32
    return %0, %c0_i32 : i32, i32
  }
}

module attributes {stable_mosaic.version = 11 : i64} {
  func.func @kernel(%arg0: i32, %arg1: i32, %arg2: memref<256x36xbf16, #tpu.memory_space<vmem>>, %arg3: memref<36x8xbf16, #tpu.memory_space<vmem>>, %arg4: memref<1x8xf32, #tpu.memory_space<vmem>>, %arg5: memref<1x8xf32, #tpu.memory_space<vmem>>, %arg6: memref<256x36xbf16, #tpu.memory_space<vmem>>, %arg7: memref<36x8xbf16, #tpu.memory_space<vmem>>, %arg8: memref<1x8xf32, #tpu.memory_space<vmem>>, %arg9: memref<1x8xf32, #tpu.memory_space<vmem>>, %arg10: memref<256x8xf32, #tpu.memory_space<vmem>>, %arg11: memref<1x8xf32, #tpu.memory_space<vmem>>, %arg12: memref<1x8xf32, #tpu.memory_space<vmem>>, %arg13: memref<1x8xf32, #tpu.memory_space<vmem>>, %arg14: memref<1x8xf32, #tpu.memory_space<vmem>>) attributes {dimension_semantics = [#tpu.dimension_semantics<arbitrary>, #tpu.dimension_semantics<arbitrary>], iteration_bounds = array<i64: 2, 8>, scalar_prefetch = 0 : i64, scratch_operands = 4 : i64, tpu.core_type = #tpu.core_type<tc>, window_params = [{transform_indices = @transform_0, window_bounds = array<i64: 256, 36>}, {pipeline_mode = #tpu.pipeline_mode<synchronous>, transform_indices = @transform_1, window_bounds = array<i64: 36, 8>}, {pipeline_mode = #tpu.pipeline_mode<synchronous>, transform_indices = @transform_2, window_bounds = array<i64: 1, 8>}, {pipeline_mode = #tpu.pipeline_mode<synchronous>, transform_indices = @transform_3, window_bounds = array<i64: 1, 8>}, {transform_indices = @transform_4, window_bounds = array<i64: 256, 36>}, {pipeline_mode = #tpu.pipeline_mode<synchronous>, transform_indices = @transform_5, window_bounds = array<i64: 36, 8>}, {pipeline_mode = #tpu.pipeline_mode<synchronous>, transform_indices = @transform_6, window_bounds = array<i64: 1, 8>}, {pipeline_mode = #tpu.pipeline_mode<synchronous>, transform_indices = @transform_7, window_bounds = array<i64: 1, 8>}, {transform_indices = @transform_8, window_bounds = array<i64: 256, 8>}]} {
    %c0 = arith.constant 0 : index
    %c0_0 = arith.constant 0 : index
    %0 = vector.load %arg2[%c0, %c0_0] : memref<256x36xbf16, #tpu.memory_space<vmem>>, vector<256x36xbf16>
    %c0_1 = arith.constant 0 : index
    %c0_2 = arith.constant 0 : index
    %1 = vector.load %arg3[%c0_1, %c0_2] : memref<36x8xbf16, #tpu.memory_space<vmem>>, vector<36x8xbf16>
    %cst = arith.constant dense<0.000000e+00> : vector<256x8xf32>
    %2 = tpu.matmul %0, %1, %cst {dimension_numbers = #tpu.dot_dimension_numbers<[1], [0], [0], [1], [0, 0, 1, 1], [], []>} : vector<256x36xbf16>, vector<36x8xbf16>, vector<256x8xf32> -> vector<256x8xf32>
    %c0_3 = arith.constant 0 : index
    %c0_4 = arith.constant 0 : index
    %3 = vector.load %arg6[%c0_3, %c0_4] : memref<256x36xbf16, #tpu.memory_space<vmem>>, vector<256x36xbf16>
    %c0_5 = arith.constant 0 : index
    %c0_6 = arith.constant 0 : index
    %4 = vector.load %arg7[%c0_5, %c0_6] : memref<36x8xbf16, #tpu.memory_space<vmem>>, vector<36x8xbf16>
    %cst_7 = arith.constant dense<0.000000e+00> : vector<256x8xf32>
    %5 = tpu.matmul %3, %4, %cst_7 {dimension_numbers = #tpu.dot_dimension_numbers<[1], [0], [0], [1], [0, 0, 1, 1], [], []>} : vector<256x36xbf16>, vector<36x8xbf16>, vector<256x8xf32> -> vector<256x8xf32>
    %c0_i32 = arith.constant 0 : i32
    %6 = arith.cmpi eq, %arg0, %c0_i32 : i32
    %c0_i32_8 = arith.constant 0 : i32
    %7 = arith.cmpi eq, %arg1, %c0_i32_8 : i32
    %8 = arith.andi %6, %7 : i1
    %9 = arith.extui %8 : i1 to i32
    %c0_i32_9 = arith.constant 0 : i32
    %10 = arith.cmpi ne, %9, %c0_i32_9 : i32
    scf.if %10 {
      %cst_13 = arith.constant 0.000000e+00 : f32
      %17 = vector.broadcast %cst_13 : f32 to vector<1x8xf32>
      %c0_14 = arith.constant 0 : index
      %c0_15 = arith.constant 0 : index
      %18 = vector.load %arg11[%c0_14, %c0_15] : memref<1x8xf32, #tpu.memory_space<vmem>>, vector<1x8xf32>
      tpu.vector_store %arg11[%c0_14, %c0_15], %17 {strides = array<i32>} : memref<1x8xf32, #tpu.memory_space<vmem>>, vector<1x8xf32>,
      %cst_16 = arith.constant 0.000000e+00 : f32
      %19 = vector.broadcast %cst_16 : f32 to vector<1x8xf32>
      %c0_17 = arith.constant 0 : index
      %c0_18 = arith.constant 0 : index
      %20 = vector.load %arg12[%c0_17, %c0_18] : memref<1x8xf32, #tpu.memory_space<vmem>>, vector<1x8xf32>
      tpu.vector_store %arg12[%c0_17, %c0_18], %19 {strides = array<i32>} : memref<1x8xf32, #tpu.memory_space<vmem>>, vector<1x8xf32>,
      %cst_19 = arith.constant 0.000000e+00 : f32
      %21 = vector.broadcast %cst_19 : f32 to vector<1x8xf32>
      %c0_20 = arith.constant 0 : index
      %c0_21 = arith.constant 0 : index
      %22 = vector.load %arg13[%c0_20, %c0_21] : memref<1x8xf32, #tpu.memory_space<vmem>>, vector<1x8xf32>
      tpu.vector_store %arg13[%c0_20, %c0_21], %21 {strides = array<i32>} : memref<1x8xf32, #tpu.memory_space<vmem>>, vector<1x8xf32>,
      %cst_22 = arith.constant 0.000000e+00 : f32
      %23 = vector.broadcast %cst_22 : f32 to vector<1x8xf32>
      %c0_23 = arith.constant 0 : index
      %c0_24 = arith.constant 0 : index
      %24 = vector.load %arg14[%c0_23, %c0_24] : memref<1x8xf32, #tpu.memory_space<vmem>>, vector<1x8xf32>
      tpu.vector_store %arg14[%c0_23, %c0_24], %23 {strides = array<i32>} : memref<1x8xf32, #tpu.memory_space<vmem>>, vector<1x8xf32>,
    } else {
    }
    %c0_i32_10 = arith.constant 0 : i32
    %11 = arith.cmpi eq, %arg0, %c0_i32_10 : i32
    %12 = arith.extui %11 : i1 to i32
    %c0_i32_11 = arith.constant 0 : i32
    %13 = arith.cmpi ne, %12, %c0_i32_11 : i32
    scf.if %13 {
      %c0_13 = arith.constant 0 : index
      %c0_14 = arith.constant 0 : index
      %17 = vector.load %arg11[%c0_13, %c0_14] : memref<1x8xf32, #tpu.memory_space<vmem>>, vector<1x8xf32>
      %cst_15 = arith.constant dense<0.000000e+00> : vector<8xf32>
      %18 = vector.multi_reduction <add>, %2, %cst_15 [0] : vector<256x8xf32> to vector<8xf32>
      %19 = vector.shape_cast %18 : vector<8xf32> to vector<1x8xf32>
      %20 = arith.addf %17, %19 : vector<1x8xf32>
      %c0_16 = arith.constant 0 : index
      %c0_17 = arith.constant 0 : index
      %21 = vector.load %arg11[%c0_16, %c0_17] : memref<1x8xf32, #tpu.memory_space<vmem>>, vector<1x8xf32>
      tpu.vector_store %arg11[%c0_16, %c0_17], %20 {strides = array<i32>} : memref<1x8xf32, #tpu.memory_space<vmem>>, vector<1x8xf32>,
      %c0_18 = arith.constant 0 : index
      %c0_19 = arith.constant 0 : index
      %22 = vector.load %arg12[%c0_18, %c0_19] : memref<1x8xf32, #tpu.memory_space<vmem>>, vector<1x8xf32>
      %23 = arith.mulf %2, %2 : vector<256x8xf32>
      %cst_20 = arith.constant dense<0.000000e+00> : vector<8xf32>
      %24 = vector.multi_reduction <add>, %23, %cst_20 [0] : vector<256x8xf32> to vector<8xf32>
      %25 = vector.shape_cast %24 : vector<8xf32> to vector<1x8xf32>
      %26 = arith.addf %22, %25 : vector<1x8xf32>
      %c0_21 = arith.constant 0 : index
      %c0_22 = arith.constant 0 : index
      %27 = vector.load %arg12[%c0_21, %c0_22] : memref<1x8xf32, #tpu.memory_space<vmem>>, vector<1x8xf32>
      tpu.vector_store %arg12[%c0_21, %c0_22], %26 {strides = array<i32>} : memref<1x8xf32, #tpu.memory_space<vmem>>, vector<1x8xf32>,
      %c0_23 = arith.constant 0 : index
      %c0_24 = arith.constant 0 : index
      %28 = vector.load %arg13[%c0_23, %c0_24] : memref<1x8xf32, #tpu.memory_space<vmem>>, vector<1x8xf32>
      %cst_25 = arith.constant dense<0.000000e+00> : vector<8xf32>
      %29 = vector.multi_reduction <add>, %5, %cst_25 [0] : vector<256x8xf32> to vector<8xf32>
      %30 = vector.shape_cast %29 : vector<8xf32> to vector<1x8xf32>
      %31 = arith.addf %28, %30 : vector<1x8xf32>
      %c0_26 = arith.constant 0 : index
      %c0_27 = arith.constant 0 : index
      %32 = vector.load %arg13[%c0_26, %c0_27] : memref<1x8xf32, #tpu.memory_space<vmem>>, vector<1x8xf32>
      tpu.vector_store %arg13[%c0_26, %c0_27], %31 {strides = array<i32>} : memref<1x8xf32, #tpu.memory_space<vmem>>, vector<1x8xf32>,
      %c0_28 = arith.constant 0 : index
      %c0_29 = arith.constant 0 : index
      %33 = vector.load %arg14[%c0_28, %c0_29] : memref<1x8xf32, #tpu.memory_space<vmem>>, vector<1x8xf32>
      %34 = arith.mulf %5, %5 : vector<256x8xf32>
      %cst_30 = arith.constant dense<0.000000e+00> : vector<8xf32>
      %35 = vector.multi_reduction <add>, %34, %cst_30 [0] : vector<256x8xf32> to vector<8xf32>
      %36 = vector.shape_cast %35 : vector<8xf32> to vector<1x8xf32>
      %37 = arith.addf %33, %36 : vector<1x8xf32>
      %c0_31 = arith.constant 0 : index
      %c0_32 = arith.constant 0 : index
      %38 = vector.load %arg14[%c0_31, %c0_32] : memref<1x8xf32, #tpu.memory_space<vmem>>, vector<1x8xf32>
      tpu.vector_store %arg14[%c0_31, %c0_32], %37 {strides = array<i32>} : memref<1x8xf32, #tpu.memory_space<vmem>>, vector<1x8xf32>,
    } else {
    }
    %c1_i32 = arith.constant 1 : i32
    %14 = arith.cmpi eq, %arg0, %c1_i32 : i32
    %15 = arith.extui %14 : i1 to i32
    %c0_i32_12 = arith.constant 0 : i32
    %16 = arith.cmpi ne, %15, %c0_i32_12 : i32
    scf.if %16 {
      %c0_13 = arith.constant 0 : index
      %c0_14 = arith.constant 0 : index
      %17 = vector.load %arg11[%c0_13, %c0_14] : memref<1x8xf32, #tpu.memory_space<vmem>>, vector<1x8xf32>
      %cst_15 = arith.constant 4.8828125E-4 : f32
      %18 = vector.broadcast %cst_15 : f32 to vector<1x8xf32>
      %19 = arith.mulf %17, %18 : vector<1x8xf32>
      %c0_16 = arith.constant 0 : index
      %c0_17 = arith.constant 0 : index
      %20 = vector.load %arg12[%c0_16, %c0_17] : memref<1x8xf32, #tpu.memory_space<vmem>>, vector<1x8xf32>
      %cst_18 = arith.constant 4.8828125E-4 : f32
      %21 = vector.broadcast %cst_18 : f32 to vector<1x8xf32>
      %22 = arith.mulf %20, %21 : vector<1x8xf32>
      %23 = arith.mulf %19, %19 : vector<1x8xf32>
      %24 = arith.subf %22, %23 : vector<1x8xf32>
      %c0_19 = arith.constant 0 : index
      %c0_20 = arith.constant 0 : index
      %25 = vector.load %arg4[%c0_19, %c0_20] : memref<1x8xf32, #tpu.memory_space<vmem>>, vector<1x8xf32>
      %cst_21 = arith.constant 9.99999974E-6 : f32
      %26 = vector.broadcast %cst_21 : f32 to vector<1x8xf32>
      %27 = arith.addf %24, %26 : vector<1x8xf32>
      %28 = math.rsqrt %27 : vector<1x8xf32>
      %29 = arith.mulf %25, %28 : vector<1x8xf32>
      %30 = vector.broadcast %19 : vector<1x8xf32> to vector<256x8xf32>
      %31 = arith.subf %2, %30 : vector<256x8xf32>
      %32 = vector.broadcast %29 : vector<1x8xf32> to vector<256x8xf32>
      %33 = arith.mulf %31, %32 : vector<256x8xf32>
      %c0_22 = arith.constant 0 : index
      %c0_23 = arith.constant 0 : index
      %34 = vector.load %arg5[%c0_22, %c0_23] : memref<1x8xf32, #tpu.memory_space<vmem>>, vector<1x8xf32>
      %35 = vector.broadcast %34 : vector<1x8xf32> to vector<256x8xf32>
      %36 = arith.addf %33, %35 : vector<256x8xf32>
      %cst_24 = arith.constant 0.000000e+00 : f32
      %37 = vector.broadcast %cst_24 : f32 to vector<256x8xf32>
      %38 = arith.cmpf oge, %36, %37 : vector<256x8xf32>
      %cst_25 = arith.constant 2.000000e-01 : f32
      %39 = vector.broadcast %cst_25 : f32 to vector<256x8xf32>
      %40 = arith.mulf %39, %36 : vector<256x8xf32>
      %41 = arith.select %38, %36, %40 : vector<256x8xi1>, vector<256x8xf32>
      %c0_26 = arith.constant 0 : index
      %c0_27 = arith.constant 0 : index
      %42 = vector.load %arg13[%c0_26, %c0_27] : memref<1x8xf32, #tpu.memory_space<vmem>>, vector<1x8xf32>
      %cst_28 = arith.constant 4.8828125E-4 : f32
      %43 = vector.broadcast %cst_28 : f32 to vector<1x8xf32>
      %44 = arith.mulf %42, %43 : vector<1x8xf32>
      %c0_29 = arith.constant 0 : index
      %c0_30 = arith.constant 0 : index
      %45 = vector.load %arg14[%c0_29, %c0_30] : memref<1x8xf32, #tpu.memory_space<vmem>>, vector<1x8xf32>
      %cst_31 = arith.constant 4.8828125E-4 : f32
      %46 = vector.broadcast %cst_31 : f32 to vector<1x8xf32>
      %47 = arith.mulf %45, %46 : vector<1x8xf32>
      %48 = arith.mulf %44, %44 : vector<1x8xf32>
      %49 = arith.subf %47, %48 : vector<1x8xf32>
      %c0_32 = arith.constant 0 : index
      %c0_33 = arith.constant 0 : index
      %50 = vector.load %arg8[%c0_32, %c0_33] : memref<1x8xf32, #tpu.memory_space<vmem>>, vector<1x8xf32>
      %cst_34 = arith.constant 9.99999974E-6 : f32
      %51 = vector.broadcast %cst_34 : f32 to vector<1x8xf32>
      %52 = arith.addf %49, %51 : vector<1x8xf32>
      %53 = math.rsqrt %52 : vector<1x8xf32>
      %54 = arith.mulf %50, %53 : vector<1x8xf32>
      %55 = vector.broadcast %44 : vector<1x8xf32> to vector<256x8xf32>
      %56 = arith.subf %5, %55 : vector<256x8xf32>
      %57 = vector.broadcast %54 : vector<1x8xf32> to vector<256x8xf32>
      %58 = arith.mulf %56, %57 : vector<256x8xf32>
      %c0_35 = arith.constant 0 : index
      %c0_36 = arith.constant 0 : index
      %59 = vector.load %arg9[%c0_35, %c0_36] : memref<1x8xf32, #tpu.memory_space<vmem>>, vector<1x8xf32>
      %60 = vector.broadcast %59 : vector<1x8xf32> to vector<256x8xf32>
      %61 = arith.addf %58, %60 : vector<256x8xf32>
      %cst_37 = arith.constant 0.000000e+00 : f32
      %62 = vector.broadcast %cst_37 : f32 to vector<256x8xf32>
      %63 = arith.cmpf oge, %61, %62 : vector<256x8xf32>
      %cst_38 = arith.constant 2.000000e-01 : f32
      %64 = vector.broadcast %cst_38 : f32 to vector<256x8xf32>
      %65 = arith.mulf %64, %61 : vector<256x8xf32>
      %66 = arith.select %63, %61, %65 : vector<256x8xi1>, vector<256x8xf32>
      %67 = arith.addf %41, %66 : vector<256x8xf32>
      %c0_39 = arith.constant 0 : index
      %c0_40 = arith.constant 0 : index
      %68 = vector.load %arg10[%c0_39, %c0_40] : memref<256x8xf32, #tpu.memory_space<vmem>>, vector<256x8xf32>
      tpu.vector_store %arg10[%c0_39, %c0_40], %67 {strides = array<i32>} : memref<256x8xf32, #tpu.memory_space<vmem>>, vector<256x8xf32>,
    } else {
    }
    return
  }
  func.func @transform_0(%arg0: i32, %arg1: i32) -> (i32, i32) {
    %c0_i32 = arith.constant 0 : i32
    %c0_i32_0 = arith.constant 0 : i32
    return %arg1, %c0_i32 : i32, i32
  }
  func.func @transform_1(%arg0: i32, %arg1: i32) -> (i32, i32) {
    %c0_i32 = arith.constant 0 : i32
    %c0_i32_0 = arith.constant 0 : i32
    %c0_i32_1 = arith.constant 0 : i32
    return %c0_i32, %c0_i32_0 : i32, i32
  }
  func.func @transform_2(%arg0: i32, %arg1: i32) -> (i32, i32) {
    %c0_i32 = arith.constant 0 : i32
    %c0_i32_0 = arith.constant 0 : i32
    %c0_i32_1 = arith.constant 0 : i32
    return %c0_i32, %c0_i32_0 : i32, i32
  }
  func.func @transform_3(%arg0: i32, %arg1: i32) -> (i32, i32) {
    %c0_i32 = arith.constant 0 : i32
    %c0_i32_0 = arith.constant 0 : i32
    %c0_i32_1 = arith.constant 0 : i32
    return %c0_i32, %c0_i32_0 : i32, i32
  }
  func.func @transform_4(%arg0: i32, %arg1: i32) -> (i32, i32) {
    %c0_i32 = arith.constant 0 : i32
    %c0_i32_0 = arith.constant 0 : i32
    return %arg1, %c0_i32 : i32, i32
  }
  func.func @transform_5(%arg0: i32, %arg1: i32) -> (i32, i32) {
    %c0_i32 = arith.constant 0 : i32
    %c0_i32_0 = arith.constant 0 : i32
    %c0_i32_1 = arith.constant 0 : i32
    return %c0_i32, %c0_i32_0 : i32, i32
  }
  func.func @transform_6(%arg0: i32, %arg1: i32) -> (i32, i32) {
    %c0_i32 = arith.constant 0 : i32
    %c0_i32_0 = arith.constant 0 : i32
    %c0_i32_1 = arith.constant 0 : i32
    return %c0_i32, %c0_i32_0 : i32, i32
  }
  func.func @transform_7(%arg0: i32, %arg1: i32) -> (i32, i32) {
    %c0_i32 = arith.constant 0 : i32
    %c0_i32_0 = arith.constant 0 : i32
    %c0_i32_1 = arith.constant 0 : i32
    return %c0_i32, %c0_i32_0 : i32, i32
  }
  func.func @transform_8(%arg0: i32, %arg1: i32) -> (i32, i32) {
    %0 = arith.muli %arg0, %arg1 : i32
    %c0_i32 = arith.constant 0 : i32
    %c0_i32_0 = arith.constant 0 : i32
    return %0, %c0_i32 : i32, i32
  }
}

</mosaic_0001>

<bundles_post_ra>
// kernel: resblock_up_forward.2
= control target key start
LH: loop header
LB: loop body
LE: loop exit
PB: predicated region body
PF: predicated region fallthrough
CT: control target
= control target key end

     0   :  { %s1326_s15 = smov 0   ;;  %s1328_s16 = smov 0   ;;  %s1941_s0 = inlined_call_operand.vmem [shape: bf16[512,36], index: 0, kind: input, shape index: {}]   ;;  %s1942_s1 = inlined_call_operand.vmem [shape: bf16[36,4], index: 1, kind: input, shape index: {}]   ;;  %s1943_s2 = inlined_call_operand.vmem [shape: f32[1,4], index: 2, kind: input, shape index: {}]   ;;  %s1944_s3 = inlined_call_operand.vmem [shape: f32[1,4], index: 3, kind: input, shape index: {}]   ;;  %s1945_s4 = inlined_call_operand.vmem [shape: f32[512,4], index: 4, kind: output, shape index: {}]  }
   0x1   :  { %s1330_s17 = smov 0   ;;  %s1332_s18 = smov 0  }
   0x2   :  { %s1334_s19 = smov 0  }
   0x3 LB: > { %s23_s20 = sadd.s32 1, %s1290_s17  ;;  %s26_s21 = sadd.s32 1, %s1294_s18  ;;  %s1298_s19 = sphi %s1334_s19, %s14_s19   ;;  %s1294_s18 = sphi %s1332_s18, %s1956_s18   ;;  %s1290_s17 = sphi %s1330_s17, %s1955_s17   ;;  %s1286_s16 = sphi %s1328_s16, %s1954_s16   ;;  %s1282_s15 = sphi %s1326_s15, %s1953_s15  }
   0x4   : > { %p24_p0 = scmp.ge.s32.totalorder %s23_s20, 2  ;;  %p1088_p1 = scmp.ge.s32.totalorder %s1298_s19, 1 }
   0x5   : > { %p177_p2 = scmp.lt.s32.totalorder %s1298_s19, 5 }
   0x6   : > { %s1958_s20 = smov (%p24_p0, %s23_s20), 0  ;;  %s1960_s21 = smov (!%p24_p0, %s26_s21), %s1294_s18 }
   0x7   : > { %p178_p3 = pnand %p1088_p1, %p177_p2  ;;  %p28_p4 = scmp.ge.s32.totalorder %s1960_s21, 2 }
   0x8   : > { %s210_s22 = smul.u32 (!%p178_p3), %s1282_s15, %s1286_s16  ;;  %v1239_v0 = vld [vmem:[%s1942_s1] sm:$0xff] (!%p178_p3)   ;;  %v1240_v1 = vld [vmem:[%s1942_s1 + $0x8] sm:$0xff] (!%p178_p3)   ;;  %s1089_s27 = sshll.u32 (!%p178_p3), %s1282_s15, 5  ;;  %v1241_v2 = vld [vmem:[%s1942_s1 + $0x10] ss:$0 sps:$4 sm:$0x33] (!%p178_p3)  }
   0x9   : > { %s1962_s21 = smov (%p28_p4, %s1960_s21), 0  ;;  %181 = sbr.rel (%p178_p3) target bundleno = 424 (0x1a8), region = 36 }
   0xa   : > { %s1091_s28 = sshll.u32 (!%p178_p3), %s210_s22, 5  ;;  %1152 = vmatprep.subr.bf16.mxu0 (!%p178_p3), %v1239_v0  ;;  %1190 = vmatprep.subr.bf16.mxu1 (!%p178_p3), %v1239_v0  ;;  %p205_p6 = scmp.lt.s32.totalorder (!%p178_p3), %s1089_s27, 63  ;;  %vm400_vm0 = vcmask (!%p178_p3), 1041408   ;;  %vm351_vm1 = vcmask (!%p178_p3), 293888  }
   0xb   : > { %p212_p5 = scmp.lt.s32.totalorder (!%p178_p3), %s1091_s28, 63  ;;  %1153 = vmatpush3.bf16.msra.mxu0 (!%p178_p3), %v1239_v0  ;;  %1193 = vmatpush3.bf16.msra.mxu1 (!%p178_p3), %v1239_v0  ;;  %v402_v3 = vsel (!%p178_p3), %vm400_vm0, %v1241_v2, 0  ;;  %p565_p7 = scmp.eq.s32.totalorder (!%p178_p3), %s1286_s16, 0 }
   0xc   : > { %1154 = vmatprep.subr.bf16.mxu0 (!%p178_p3), %v1240_v1  ;;  %1191 = vmatprep.subr.bf16.mxu1 (!%p178_p3), %v1240_v1  ;;  %p566_p8 = scmp.eq.s32.totalorder (!%p178_p3), %s1282_s15, 0 }
   0xe   : > { %p1416_p9 = pnand (!%p178_p3), %p566_p8, %p565_p7 }
   0xf   : > { %1155 = vmatpush3.bf16.msra.mxu0 (!%p178_p3), %v1240_v1  ;;  %1194 = vmatpush3.bf16.msra.mxu1 (!%p178_p3), %v1240_v1 }
  0x10   : > { %s1964_s28 = smov (!%p212_p5, %s1091_s28), 63  ;;  %s1966_s27 = smov (!%p205_p6, %s1089_s27), 63  ;;  %1196 = vmatprep.subr.msk.bf16.mxu0 %vm400_vm0, %v1241_v2  ;;  %1197 = vmatprep.subr.msk.bf16.mxu1 %vm400_vm0, %v1241_v2 }
  0x11   : > { %s1092_s5 = sshll.u32 %s1964_s28, 3  ;;  %s1090_s9 = sshll.u32 %s1966_s27, 2  ;;  %vm571_vm2 = vcmask (!%p1416_p9), 24576   ;;  %v1300_v52 = vmov (!%p1416_p9), 0.0  }
  0x12   : > { %s1375_s8 = scalar_lea.vmem %s1945_s4, %s1092_s5  ;;  %s1380_s12 = scalar_lea.vmem %s1941_s0, %s1090_s9  ;;  %572 = vst.msk [vmem:[#allocation2] sm:$0x1] (!%p1416_p9), %vm571_vm2, %v1300_v52  ;;  %573 = vst.msk [vmem:[#allocation3] sm:$0x1] (!%p1416_p9), %vm571_vm2, %v1300_v52 }
  0x13   : > { %v1242_v4 = vld [vmem:[%s1380_s12] sm:$0xff]   ;;  %1157 = vmatpush3.bf16.msra.mxu0 %v402_v3  ;;  %1195 = vmatpush3.bf16.msra.mxu1 %v402_v3  ;;  %v1244_v6 = vld [vmem:[%s1380_s12 + $0x8] sm:$0xff]   ;;  %v1246_v8 = vld [vmem:[%s1380_s12 + $0x10] sm:$0xff]  }
  0x14   : > { %v1243_v5 = vld [vmem:[%s1380_s12 + $0x40] sm:$0xff]   ;;  %1158 = vmatprep.mubr.msk.bf16.mxu0 %vm351_vm1, %v1242_v4  ;;  %v1245_v7 = vld [vmem:[%s1380_s12 + $0x48] sm:$0xff]   ;;  %v1247_v9 = vld [vmem:[%s1380_s12 + $0x50] sm:$0xff]  }
  0x15   : > { %1174 = vmatprep.mubr.msk.bf16.mxu1 %vm351_vm1, %v1243_v5  ;;  %v1248_v10 = vld [vmem:[%s1380_s12 + $0x18] sm:$0xff]   ;;  %v1250_v12 = vld [vmem:[%s1380_s12 + $0x20] sm:$0xff]   ;;  %v1252_v14 = vld [vmem:[%s1380_s12 + $0x28] sm:$0xff]  }
  0x16   : > { %1159 = vmatmul.mubr.msk.bf16.vlgmr.msra.gmra.mrb[0].mxu0 %vm351_vm1, %v1244_v6  ;;  %1175 = vmatmul.mubr.msk.bf16.vlgmr.msra.gmra.mrb[0].mxu1 %vm351_vm1, %v1245_v7  ;;  %v1249_v11 = vld [vmem:[%s1380_s12 + $0x58] sm:$0xff]   ;;  %v1251_v13 = vld [vmem:[%s1380_s12 + $0x60] sm:$0xff]   ;;  %v1253_v15 = vld [vmem:[%s1380_s12 + $0x68] sm:$0xff]  }
  0x17   : > { %1162 = vmatprep.mubr.msk.bf16.mxu0 %vm351_vm1, %v1246_v8  ;;  %1178 = vmatprep.mubr.msk.bf16.mxu1 %vm351_vm1, %v1247_v9  ;;  %v1254_v16 = vld [vmem:[%s1380_s12 + $0x30] sm:$0xff]   ;;  %v1256_v18 = vld [vmem:[%s1380_s12 + $0x38] sm:$0xff]  }
  0x18   : > { %v1255_v17 = vld [vmem:[%s1380_s12 + $0x70] sm:$0xff]   ;;  %v1257_v19 = vld [vmem:[%s1380_s12 + $0x78] sm:$0xff]  }
  0x1e   : > { %1163 = vmatmul.mubr.msk.bf16.gmra.mrb[4].mxu0 %vm351_vm1, %v1248_v10  ;;  %1179 = vmatmul.mubr.msk.bf16.gmra.mrb[4].mxu1 %vm351_vm1, %v1249_v11 }
  0x1f   : > { %1166 = vmatprep.mubr.msk.bf16.mxu0 %vm351_vm1, %v1250_v12  ;;  %1182 = vmatprep.mubr.msk.bf16.mxu1 %vm351_vm1, %v1251_v13 }
  0x26   : > { %1167 = vmatmul.mubr.msk.bf16.gmra.mrb[8].mxu0 %vm351_vm1, %v1252_v14  ;;  %1183 = vmatmul.mubr.msk.bf16.gmra.mrb[8].mxu1 %vm351_vm1, %v1253_v15 }
  0x27   : > { %1170 = vmatprep.mubr.msk.bf16.mxu0 %vm351_vm1, %v1254_v16  ;;  %1186 = vmatprep.mubr.msk.bf16.mxu1 %vm351_vm1, %v1255_v17 }
  0x2e   : > { %1171 = vmatmul.mubr.msk.bf16.gmra.mrb[12].mxu0 %vm351_vm1, %v1256_v18  ;;  %1187 = vmatmul.mubr.msk.bf16.gmra.mrb[12].mxu1 %vm351_vm1, %v1257_v19 }
  0xe9   : > { %v1420_v20 = vpop.f32.mrb[0].mxu0  ;;  %v1422_v21 = vpop.f32.mrb[0].mxu1 }
  0xea   : > { %v1424_v22 = vpop.f32.mrb[1].mxu0  ;;  %v1426_v23 = vpop.f32.mrb[1].mxu1 }
  0xeb   : > { %v1428_v24 = vpop.f32.mrb[2].mxu0  ;;  %v1430_v25 = vpop.f32.mrb[2].mxu1 }
  0xec   : > { %v1432_v26 = vpop.f32.mrb[3].mxu0  ;;  %v1434_v27 = vpop.f32.mrb[3].mxu1 }
  0xf1   : > { %v1436_v28 = vpop.f32.mrb[4].mxu0  ;;  %v1438_v29 = vpop.f32.mrb[4].mxu1 }
  0xf2   : > { %v1440_v30 = vpop.f32.mrb[5].mxu0  ;;  %v1442_v31 = vpop.f32.mrb[5].mxu1 }
  0xf3   : > { %v1444_v32 = vpop.f32.mrb[6].mxu0  ;;  %v1446_v33 = vpop.f32.mrb[6].mxu1 }
  0xf4   : > { %v1448_v34 = vpop.f32.mrb[7].mxu0  ;;  %v1450_v35 = vpop.f32.mrb[7].mxu1 }
  0xf9   : > { %v1452_v36 = vpop.f32.mrb[8].mxu0  ;;  %v1454_v37 = vpop.f32.mrb[8].mxu1 }
  0xfa   : > { %v1456_v38 = vpop.f32.mrb[9].mxu0  ;;  %v1458_v39 = vpop.f32.mrb[9].mxu1 }
  0xfb   : > { %v1460_v40 = vpop.f32.mrb[10].mxu0  ;;  %v1462_v41 = vpop.f32.mrb[10].mxu1 }
  0xfc   : > { %v1464_v42 = vpop.f32.mrb[11].mxu0  ;;  %v1466_v43 = vpop.f32.mrb[11].mxu1 }
  0xfe   : > { %570 = sbr.rel (%p1416_p9) target bundleno = 261 (0x105), region = 40 }
 0x101   : > { %v1468_v44 = vpop.f32.mrb[12].mxu0  ;;  %v1470_v45 = vpop.f32.mrb[12].mxu1 }
 0x102   : > { %v1472_v46 = vpop.f32.mrb[13].mxu0  ;;  %v1474_v47 = vpop.f32.mrb[13].mxu1 }
 0x103   : > { %v1476_v48 = vpop.f32.mrb[14].mxu0  ;;  %v1478_v49 = vpop.f32.mrb[14].mxu1 }
 0x104   : > { %v1480_v50 = vpop.f32.mrb[15].mxu0  ;;  %v1482_v51 = vpop.f32.mrb[15].mxu1 }
 0x105 PF: > { %p1128_p10 = scmp.ne.s32.totalorder %s1286_s16, 0 }
 0x106   : > { %vm578_vm3 = vcmask (!%p1128_p10), 31744   ;;  %v652_v5 = vmul.f32 (!%p1128_p10), %v1424_v22, %v1424_v22  ;;  %v653_v7 = vmul.f32 (!%p1128_p10), %v1432_v26, %v1432_v26  ;;  %v654_v8 = vmul.f32 (!%p1128_p10), %v1420_v20, %v1420_v20 }
 0x107   : > { %576 = sbr.rel (%p1128_p10) target bundleno = 349 (0x15d), region = 44  ;;  %v579_v53 = vsel (!%p1128_p10), %vm578_vm3, %v1424_v22, 0.0  ;;  %v580_v54 = vsel (!%p1128_p10), %vm578_vm3, %v1432_v26, 0.0  ;;  %v582_v55 = vsel (!%p1128_p10), %vm578_vm3, %v1420_v20, 0.0  ;;  %v584_v57 = vsel (!%p1128_p10), %vm578_vm3, %v1428_v24, 0.0 }
 0x108   : > { %v581_v56 = vadd.f32 (!%p1128_p10), %v580_v54, %v579_v53  ;;  %v586_v59 = vsel (!%p1128_p10), %vm578_vm3, %v1440_v30, 0.0  ;;  %v588_v61 = vsel (!%p1128_p10), %vm578_vm3, %v1448_v34, 0.0  ;;  %v590_v63 = vsel (!%p1128_p10), %vm578_vm3, %v1436_v28, 0.0 }
 0x109   : > { %v592_v1 = vsel (!%p1128_p10), %vm578_vm3, %v1444_v32, 0.0  ;;  %v594_v3 = vsel (!%p1128_p10), %vm578_vm3, %v1456_v38, 0.0  ;;  %v596_v6 = vsel (!%p1128_p10), %vm578_vm3, %v1464_v42, 0.0  ;;  %v598_v10 = vsel (!%p1128_p10), %vm578_vm3, %v1452_v36, 0.0 }
 0x10a   : > { %v583_v58 = vadd.f32 (!%p1128_p10), %v582_v55, %v581_v56  ;;  %v655_v11 = vmul.f32 (!%p1128_p10), %v1428_v24, %v1428_v24  ;;  %v684_v13 = vsel (!%p1128_p10), %vm578_vm3, %v652_v5, 0.0  ;;  %v600_v14 = vsel (!%p1128_p10), %vm578_vm3, %v1460_v40, 0.0 }
 0x10b   : > { %v656_v15 = vmul.f32 (!%p1128_p10), %v1440_v30, %v1440_v30  ;;  %v685_v16 = vsel (!%p1128_p10), %vm578_vm3, %v653_v7, 0.0  ;;  %v687_v17 = vsel (!%p1128_p10), %vm578_vm3, %v654_v8, 0.0  ;;  %v602_v52 = vsel (!%p1128_p10), %vm578_vm3, %v1472_v46, 0.0 }
 0x10c   : > { %v585_v60 = vadd.f32 (!%p1128_p10), %v584_v57, %v583_v58  ;;  %v686_v19 = vadd.f32 (!%p1128_p10), %v685_v16, %v684_v13  ;;  %v657_v53 = vmul.f32 (!%p1128_p10), %v1448_v34, %v1448_v34  ;;  %v689_v54 = vsel (!%p1128_p10), %vm578_vm3, %v655_v11, 0.0 }
 0x10d   : > { %v604_v57 = vsel (!%p1128_p10), %vm578_vm3, %v1480_v50, 0.0  ;;  %v658_v58 = vmul.f32 (!%p1128_p10), %v1436_v28, %v1436_v28  ;;  %v610_v8 = vsel (!%p1128_p10), %vm578_vm3, %v1426_v23, 0.0  ;;  %v612_v13 = vsel (!%p1128_p10), %vm578_vm3, %v1434_v27, 0.0 }
 0x10e   : > { %v587_v62 = vadd.f32 %v586_v59, %v585_v60  ;;  %v688_v56 = vadd.f32 %v687_v17, %v686_v19  ;;  %v691_v59 = vsel %vm578_vm3, %v656_v15, 0.0  ;;  %v663_v19 = vmul.f32 %v1460_v40, %v1460_v40 }
 0x10f   : > { %v695_v5 = vsel %vm578_vm3, %v658_v58, 0.0  ;;  %vm649_vm4 = vcmask 24576  }
 0x110   : > { %v589_v0 = vadd.f32 %v588_v61, %v587_v62  ;;  %v690_v61 = vadd.f32 %v689_v54, %v688_v56  ;;  %v606_v62 = vsel %vm578_vm3, %v1468_v44, 0.0  ;;  %v664_v56 = vmul.f32 %v1472_v46, %v1472_v46 }
 0x112   : > { %v591_v2 = vadd.f32 %v590_v63, %v589_v0  ;;  %v659_v63 = vmul.f32 %v1444_v32, %v1444_v32  ;;  %v693_v0 = vsel %vm578_vm3, %v657_v53, 0.0 }
 0x114   : > { %v593_v4 = vadd.f32 %v592_v1, %v591_v2  ;;  %v692_v2 = vadd.f32 %v691_v59, %v690_v61  ;;  %v665_v61 = vmul.f32 %v1480_v50, %v1480_v50 }
 0x116   : > { %v595_v9 = vadd.f32 %v594_v3, %v593_v4  ;;  %v608_v3 = vsel %vm578_vm3, %v1476_v48, 0.0  ;;  %v660_v4 = vmul.f32 %v1456_v38, %v1456_v38  ;;  %v694_v7 = vadd.f32 %v693_v0, %v692_v2 }
 0x117   : > { %v666_v2 = vmul.f32 %v1468_v44, %v1468_v44 }
 0x118   : > { %v597_v12 = vadd.f32 %v596_v6, %v595_v9  ;;  %v661_v9 = vmul.f32 %v1464_v42, %v1464_v42  ;;  %v699_v15 = vsel %vm578_vm3, %v660_v4, 0.0 }
 0x11a   : > { %v599_v18 = vadd.f32 %v598_v10, %v597_v12  ;;  %v697_v10 = vsel %vm578_vm3, %v659_v63, 0.0  ;;  %v696_v12 = vadd.f32 %v695_v5, %v694_v7  ;;  %v667_v7 = vmul.f32 %v1476_v48, %v1476_v48 }
 0x11c   : > { %v601_v55 = vadd.f32 %v600_v14, %v599_v18  ;;  %v662_v14 = vmul.f32 %v1452_v36, %v1452_v36  ;;  %v698_v17 = vadd.f32 %v697_v10, %v696_v12  ;;  %v614_v18 = vsel %vm578_vm3, %v1422_v21, 0.0 }
 0x11d   : > { %v668_v12 = vmul.f32 %v1426_v23, %v1426_v23 }
 0x11e   : > { %v603_v60 = vadd.f32 %v602_v52, %v601_v55  ;;  %v701_v52 = vsel %vm578_vm3, %v661_v9, 0.0  ;;  %v700_v54 = vadd.f32 %v699_v15, %v698_v17  ;;  %v616_v55 = vsel %vm578_vm3, %v1430_v25, 0.0 }
 0x11f   : > { %v669_v17 = vmul.f32 %v1434_v27, %v1434_v27 }
 0x120   : > { %v605_v1 = vadd.f32 %v604_v57, %v603_v60  ;;  %v703_v57 = vsel %vm578_vm3, %v662_v14, 0.0  ;;  %v702_v59 = vadd.f32 %v701_v52, %v700_v54  ;;  %v618_v60 = vsel %vm578_vm3, %v1442_v31, 0.0 }
 0x121   : > { %v670_v54 = vmul.f32 %v1422_v21, %v1422_v21 }
 0x122   : > { %v607_v6 = vadd.f32 %v606_v62, %v605_v1  ;;  %v705_v62 = vsel %vm578_vm3, %v663_v19, 0.0  ;;  %v704_v0 = vadd.f32 %v703_v57, %v702_v59  ;;  %v620_v1 = vsel %vm578_vm3, %v1450_v35, 0.0 }
 0x123   : > { %v671_v59 = vmul.f32 %v1430_v25, %v1430_v25 }
 0x124   : > { %v609_v11 = vadd.f32 %v608_v3, %v607_v6  ;;  %v707_v3 = vsel %vm578_vm3, %v664_v56, 0.0  ;;  %v706_v5 = vadd.f32 %v705_v62, %v704_v0  ;;  %v622_v6 = vsel %vm578_vm3, %v1438_v29, 0.0 }
 0x125   : > { %v672_v0 = vmul.f32 %v1442_v31, %v1442_v31 }
 0x126   : > { %v611_v16 = vadd.f32 %v610_v8, %v609_v11  ;;  %v709_v8 = vsel %vm578_vm3, %v665_v61, 0.0  ;;  %v708_v10 = vadd.f32 %v707_v3, %v706_v5  ;;  %v624_v11 = vsel %vm578_vm3, %v1446_v33, 0.0 }
 0x127   : > { %v673_v5 = vmul.f32 %v1450_v35, %v1450_v35 }
 0x128   : > { %v613_v53 = vadd.f32 %v612_v13, %v611_v16  ;;  %v711_v13 = vsel %vm578_vm3, %v666_v2, 0.0  ;;  %v710_v15 = vadd.f32 %v709_v8, %v708_v10  ;;  %v626_v16 = vsel %vm578_vm3, %v1458_v39, 0.0 }
 0x129   : > { %v674_v10 = vmul.f32 %v1438_v29, %v1438_v29 }
 0x12a   : > { %v615_v58 = vadd.f32 %v614_v18, %v613_v53  ;;  %v713_v18 = vsel %vm578_vm3, %v667_v7, 0.0  ;;  %v712_v52 = vadd.f32 %v711_v13, %v710_v15  ;;  %v628_v53 = vsel %vm578_vm3, %v1466_v43, 0.0 }
 0x12b   : > { %v675_v15 = vmul.f32 %v1446_v33, %v1446_v33 }
 0x12c   : > { %v617_v63 = vadd.f32 %v616_v55, %v615_v58  ;;  %v715_v55 = vsel %vm578_vm3, %v668_v12, 0.0  ;;  %v714_v57 = vadd.f32 %v713_v18, %v712_v52  ;;  %v630_v58 = vsel %vm578_vm3, %v1454_v37, 0.0 }
 0x12d   : > { %v676_v52 = vmul.f32 %v1458_v39, %v1458_v39 }
 0x12e   : > { %v619_v4 = vadd.f32 %v618_v60, %v617_v63  ;;  %v717_v60 = vsel %vm578_vm3, %v669_v17, 0.0  ;;  %v716_v62 = vadd.f32 %v715_v55, %v714_v57  ;;  %v632_v63 = vsel %vm578_vm3, %v1462_v41, 0.0 }
 0x12f   : > { %v729_v57 = vsel %vm578_vm3, %v675_v15, 0.0 }
 0x130   : > { %v621_v9 = vadd.f32 %v620_v1, %v619_v4  ;;  %v719_v1 = vsel %vm578_vm3, %v670_v54, 0.0  ;;  %v718_v3 = vadd.f32 %v717_v60, %v716_v62  ;;  %v634_v4 = vsel %vm578_vm3, %v1474_v47, 0.0 }
 0x131   : > { %v678_v60 = vmul.f32 %v1454_v37, %v1454_v37 }
 0x132   : > { %v623_v14 = vadd.f32 %v622_v6, %v621_v9  ;;  %v721_v6 = vsel %vm578_vm3, %v671_v59, 0.0  ;;  %v720_v8 = vadd.f32 %v719_v1, %v718_v3  ;;  %v636_v9 = vsel %vm578_vm3, %v1482_v51, 0.0 }
 0x134   : > { %v625_v19 = vadd.f32 %v624_v11, %v623_v14  ;;  %v723_v11 = vsel %vm578_vm3, %v672_v0, 0.0  ;;  %v722_v13 = vadd.f32 %v721_v6, %v720_v8  ;;  %v638_v14 = vsel %vm578_vm3, %v1470_v45, 0.0 }
 0x135   : > { %v679_v0 = vmul.f32 %v1462_v41, %v1462_v41  ;;  %v681_v8 = vmul.f32 %v1482_v51, %v1482_v51 }
 0x136   : > { %v627_v56 = vadd.f32 %v626_v16, %v625_v19  ;;  %v725_v16 = vsel %vm578_vm3, %v673_v5, 0.0  ;;  %v724_v18 = vadd.f32 %v723_v11, %v722_v13  ;;  %v640_v19 = vsel %vm578_vm3, %v1478_v49, 0.0 }
 0x137   : > { %v735_v5 = vsel %vm578_vm3, %v678_v60, 0.0 }
 0x138   : > { %v629_v61 = vadd.f32 %v628_v53, %v627_v56  ;;  %v727_v53 = vsel %vm578_vm3, %v674_v10, 0.0  ;;  %v726_v55 = vadd.f32 %v725_v16, %v724_v18  ;;  %v677_v56 = vmul.f32 %v1466_v43, %v1466_v43  ;;  %v577_v16 = vld [vmem:[#allocation2] sm:$0x1] }
 0x139   : > { %v741_v18 = vsel %vm578_vm3, %v681_v8, 0.0 }
 0x13a   : > { %v631_v2 = vadd.f32 %v630_v58, %v629_v61  ;;  %v728_v59 = vadd.f32 %v727_v53, %v726_v55  ;;  %v731_v61 = vsel %vm578_vm3, %v676_v52, 0.0  ;;  %v733_v1 = vsel %vm578_vm3, %v677_v56, 0.0 }
 0x13c   : > { %v633_v7 = vadd.f32 %v632_v63, %v631_v2  ;;  %v730_v63 = vadd.f32 %v729_v57, %v728_v59 }
 0x13e   : > { %v635_v12 = vadd.f32 %v634_v4, %v633_v7  ;;  %v732_v3 = vadd.f32 %v731_v61, %v730_v63  ;;  %v680_v4 = vmul.f32 %v1474_v47, %v1474_v47 }
 0x140   : > { %v637_v17 = vadd.f32 %v636_v9, %v635_v12  ;;  %v734_v7 = vadd.f32 %v733_v1, %v732_v3  ;;  %v737_v9 = vsel %vm578_vm3, %v679_v0, 0.0  ;;  %v682_v12 = vmul.f32 %v1470_v45, %v1470_v45  ;;  %v651_v0 = vld [vmem:[#allocation3] sm:$0x1] }
 0x141   : > { %v739_v13 = vsel %vm578_vm3, %v680_v4, 0.0 }
 0x142   : > { %v639_v54 = vadd.f32 %v638_v14, %v637_v17  ;;  %v736_v11 = vadd.f32 %v735_v5, %v734_v7  ;;  %v683_v17 = vmul.f32 %v1478_v49, %v1478_v49  ;;  %v743_v53 = vsel %vm578_vm3, %v682_v12, 0.0 }
 0x144   : > { %v641_v58 = vadd.f32 %v640_v19, %v639_v54  ;;  %v738_v15 = vadd.f32 %v737_v9, %v736_v11  ;;  %v745_v56 = vsel %vm578_vm3, %v683_v17, 0.0 }
 0x146   : > { %v642_v62 = vrot.slane %v641_v58, 4  ;;  %v740_v52 = vadd.f32 %v739_v13, %v738_v15 }
 0x148   : > { %v643_v2 = vadd.f32 %v642_v62, %v641_v58  ;;  %v742_v55 = vadd.f32 %v741_v18, %v740_v52 }
 0x14a   : > { %v644_v6 = vrot.slane %v643_v2, 2  ;;  %v744_v57 = vadd.f32 %v743_v53, %v742_v55 }
 0x14c   : > { %v645_v10 = vadd.f32 %v644_v6, %v643_v2  ;;  %v746_v58 = vadd.f32 %v745_v56, %v744_v57 }
 0x14e   : > { %v646_v14 = vrot.slane %v645_v10, 1  ;;  %v747_v59 = vrot.slane %v746_v58, 4 }
 0x150   : > { %v647_v19 = vadd.f32 %v646_v14, %v645_v10  ;;  %v748_v60 = vadd.f32 %v747_v59, %v746_v58 }
 0x152   : > { %v648_v54 = vadd.f32 %v647_v19, %v577_v16  ;;  %v749_v61 = vrot.slane %v748_v60, 2 }
 0x154   : > { %650 = vst.msk [vmem:[#allocation2] sm:$0x1] %vm649_vm4, %v648_v54  ;;  %v750_v62 = vadd.f32 %v749_v61, %v748_v60 }
 0x156   : > { %v751_v63 = vrot.slane %v750_v62, 1 }
 0x158   : > { %v752_v1 = vadd.f32 %v751_v63, %v750_v62 }
 0x15a   : > { %v753_v2 = vadd.f32 %v752_v1, %v651_v0 }
 0x15c   : > { %754 = vst.msk [vmem:[#allocation3] sm:$0x1] %vm649_vm4, %v753_v2 }
 0x15d PF: > { %p1129_p11 = scmp.ne.s32.totalorder %s1286_s16, 1 }
 0x15e   : > { %v759_v3 = vld [vmem:[#allocation2] sm:$0x1] (!%p1129_p11)  ;;  %v770_v5 = vlaneseq (!%p1129_p11)  ;;  %vm980_vm5 = vcmask (!%p1129_p11), 31744  }
 0x15f   : > { %758 = sbr.rel (%p1129_p11) target bundleno = 424 (0x1a8), region = 48  ;;  %v760_v6 = vmul.f32 (!%p1129_p11), 0.001953125, %v759_v3  ;;  %v765_v52 = vld [vmem:[%s1943_s2] sm:$0x1] (!%p1129_p11) }
 0x160   : > { %v771_v9 = vshrl.u32 (!%p1129_p11), %v770_v5, 7 }
 0x161   : > { %v763_v8 = vmul.f32 (!%p1129_p11), %v760_v6, %v760_v6 }
 0x162   : > { %v772_v12 = vsub.s32 (!%p1129_p11), 0, %v771_v9 }
 0x163   : > { %v761_v4 = vld [vmem:[#allocation3] sm:$0x1] (!%p1129_p11) }
 0x164   : > { %v762_v7 = vmul.f32 (!%p1129_p11), 0.001953125, %v761_v4  ;;  %v1650_v13 = vrot.slane (!%p1129_p11), %v760_v6, %v772_v12  ;;  %v1716_v6 = vld [vmem:[%s1944_s3] ss:$0 sm:$0xff] (!%p1129_p11) }
 0x166   : > { %v764_v10 = vsub.f32 %v762_v7, %v763_v8  ;;  %v775_v14 = vsub.f32 %v1424_v22, %v1650_v13  ;;  %v776_v15 = vsub.f32 %v1432_v26, %v1650_v13  ;;  %v777_v16 = vsub.f32 %v1420_v20, %v1650_v13 }
 0x167   : > { %v778_v17 = vsub.f32 %v1428_v24, %v1650_v13  ;;  %v779_v18 = vsub.f32 %v1440_v30, %v1650_v13  ;;  %v780_v19 = vsub.f32 %v1448_v34, %v1650_v13  ;;  %v781_v22 = vsub.f32 %v1436_v28, %v1650_v13 }
 0x168   : > { %v766_v11 = vadd.f32 1e-05, %v764_v10  ;;  %v782_v26 = vsub.f32 %v1444_v32, %v1650_v13  ;;  %v783_v20 = vsub.f32 %v1456_v38, %v1650_v13  ;;  %v784_v24 = vsub.f32 %v1464_v42, %v1650_v13 }
 0x169   : > { %v785_v30 = vsub.f32 %v1452_v36, %v1650_v13  ;;  %v786_v34 = vsub.f32 %v1460_v40, %v1650_v13  ;;  %v787_v53 = vsub.f32 %v1472_v46, %v1650_v13  ;;  %v788_v28 = vsub.f32 %v1480_v50, %v1650_v13 }
 0x16a   : > { %1258 = vrsqrt.f32 %v766_v11  ;;  %v789_v32 = vsub.f32 %v1468_v44, %v1650_v13  ;;  %v790_v55 = vsub.f32 %v1476_v48, %v1650_v13  ;;  %v791_v56 = vsub.f32 %v1426_v23, %v1650_v13 }
 0x16b   : > { %v792_v57 = vsub.f32 %v1434_v27, %v1650_v13  ;;  %v793_v59 = vsub.f32 %v1422_v21, %v1650_v13  ;;  %v794_v60 = vsub.f32 %v1430_v25, %v1650_v13  ;;  %v795_v61 = vsub.f32 %v1442_v31, %v1650_v13 }
 0x16c   : > { %v796_v62 = vsub.f32 %v1450_v35, %v1650_v13  ;;  %v797_v63 = vsub.f32 %v1438_v29, %v1650_v13  ;;  %v798_v0 = vsub.f32 %v1446_v33, %v1650_v13  ;;  %v799_v1 = vsub.f32 %v1458_v39, %v1650_v13 }
 0x16d   : > { %v800_v3 = vsub.f32 %v1466_v43, %v1650_v13 }
 0x174   : > { %v1259_v54 = vpop.eup %1258 }
 0x175   : > { %v768_v58 = vmul.f32 %v1259_v54, %v765_v52 }
 0x177   : > { %v1705_v2 = vrot.slane %v768_v58, %v772_v12 }
 0x179   : > { %v813_v11 = vmul.f32 %v1705_v2, %v775_v14  ;;  %v814_v12 = vmul.f32 %v1705_v2, %v776_v15  ;;  %v815_v52 = vmul.f32 %v1705_v2, %v777_v16  ;;  %v816_v54 = vmul.f32 %v1705_v2, %v778_v17 }
 0x17a   : > { %v817_v58 = vmul.f32 %v1705_v2, %v779_v18  ;;  %v818_v7 = vmul.f32 %v1705_v2, %v780_v19  ;;  %v819_v8 = vmul.f32 %v1705_v2, %v781_v22  ;;  %v820_v5 = vmul.f32 %v1705_v2, %v782_v26 }
 0x17b   : > { %v852_v9 = vadd.f32 %v1716_v6, %v813_v11  ;;  %v853_v10 = vadd.f32 %v1716_v6, %v814_v12  ;;  %v854_v14 = vadd.f32 %v1716_v6, %v815_v52  ;;  %v855_v15 = vadd.f32 %v1716_v6, %v816_v54 }
 0x17c   : > { %v856_v16 = vadd.f32 %v1716_v6, %v817_v58  ;;  %v857_v17 = vadd.f32 %v1716_v6, %v818_v7  ;;  %v858_v18 = vadd.f32 %v1716_v6, %v819_v8  ;;  %v859_v19 = vadd.f32 %v1716_v6, %v820_v5 }
 0x17d   : > { %vm884_vm6 = vcmp.ge.f32.partialorder %v852_v9, 0.0  ;;  %v916_v22 = vmul.f32 0.2, %v852_v9  ;;  %vm885_vm7 = vcmp.ge.f32.partialorder %v853_v10, 0.0  ;;  %v917_v26 = vmul.f32 0.2, %v853_v10 }
 0x17e   : > { %vm886_vm8 = vcmp.ge.f32.partialorder %v854_v14, 0.0  ;;  %v918_v11 = vmul.f32 0.2, %v854_v14  ;;  %vm887_vm9 = vcmp.ge.f32.partialorder %v855_v15, 0.0  ;;  %v919_v12 = vmul.f32 0.2, %v855_v15 }
 0x17f   : > { %v948_v52 = vsel %vm884_vm6, %v852_v9, %v916_v22  ;;  %v949_v54 = vsel %vm885_vm7, %v853_v10, %v917_v26  ;;  %vm888_vm10 = vcmp.ge.f32.partialorder %v856_v16, 0.0  ;;  %v920_v7 = vmul.f32 0.2, %v856_v16 }
 0x180   : > { %981 = vst.msk [vmem:[%s1375_s8] sm:$0xff] %vm980_vm5, %v948_v52  ;;  %982 = vst.msk [vmem:[%s1375_s8 + $0x8] sm:$0xff] %vm980_vm5, %v949_v54  ;;  %v950_v5 = vsel %vm886_vm8, %v854_v14, %v918_v11  ;;  %v951_v8 = vsel %vm887_vm9, %v855_v15, %v919_v12  ;;  %vm889_vm11 = vcmp.ge.f32.partialorder %v857_v17, 0.0  ;;  %v921_v58 = vmul.f32 0.2, %v857_v17 }
 0x181   : > { %983 = vst.msk [vmem:[%s1375_s8 + $0x10] sm:$0xff] %vm980_vm5, %v950_v5  ;;  %984 = vst.msk [vmem:[%s1375_s8 + $0x18] sm:$0xff] %vm980_vm5, %v951_v8  ;;  %v952_v4 = vsel %vm888_vm10, %v856_v16, %v920_v7  ;;  %vm890_vm12 = vcmp.ge.f32.partialorder %v858_v18, 0.0  ;;  %v922_v9 = vmul.f32 0.2, %v858_v18  ;;  %vm891_vm13 = vcmp.ge.f32.partialorder %v859_v19, 0.0 }
 0x182   : > { %985 = vst.msk [vmem:[%s1375_s8 + $0x20] sm:$0xff] %vm980_vm5, %v952_v4  ;;  %v953_v10 = vsel %vm889_vm11, %v857_v17, %v921_v58  ;;  %v923_v22 = vmul.f32 0.2, %v859_v19  ;;  %v821_v14 = vmul.f32 %v1705_v2, %v783_v20  ;;  %v822_v15 = vmul.f32 %v1705_v2, %v784_v24 }
 0x183   : > { %986 = vst.msk [vmem:[%s1375_s8 + $0x28] sm:$0xff] %vm980_vm5, %v953_v10  ;;  %v954_v16 = vsel %vm890_vm12, %v858_v18, %v922_v9  ;;  %v823_v4 = vmul.f32 %v1705_v2, %v785_v30  ;;  %v824_v38 = vmul.f32 %v1705_v2, %v786_v34  ;;  %v825_v42 = vmul.f32 %v1705_v2, %v787_v53 }
 0x184   : > { %987 = vst.msk [vmem:[%s1375_s8 + $0x30] sm:$0xff] %vm980_vm5, %v954_v16  ;;  %v955_v20 = vsel %vm891_vm13, %v859_v19, %v923_v22  ;;  %v860_v24 = vadd.f32 %v1716_v6, %v821_v14  ;;  %v861_v17 = vadd.f32 %v1716_v6, %v822_v15  ;;  %v826_v36 = vmul.f32 %v1705_v2, %v788_v28 }
 0x185   : > { %988 = vst.msk [vmem:[%s1375_s8 + $0x38] sm:$0xff] %vm980_vm5, %v955_v20  ;;  %v862_v40 = vadd.f32 %v1716_v6, %v823_v4  ;;  %v863_v46 = vadd.f32 %v1716_v6, %v824_v38  ;;  %v864_v30 = vadd.f32 %v1716_v6, %v825_v42  ;;  %v827_v34 = vmul.f32 %v1705_v2, %v789_v32 }
 0x186   : > { %vm892_vm14 = vcmp.ge.f32.partialorder %v860_v24, 0.0  ;;  %v924_v53 = vmul.f32 0.2, %v860_v24  ;;  %vm893_vm15 = vcmp.ge.f32.partialorder %v861_v17, 0.0  ;;  %v925_v50 = vmul.f32 0.2, %v861_v17 }
 0x187   : > { %vm894_vm0 = vcmp.ge.f32.partialorder %v862_v40, 0.0  ;;  %v926_v28 = vmul.f32 0.2, %v862_v40  ;;  %vm895_vm1 = vcmp.ge.f32.partialorder %v863_v46, 0.0  ;;  %v927_v18 = vmul.f32 0.2, %v863_v46 }
 0x188   : > { %v956_v19 = vsel %vm892_vm14, %v860_v24, %v924_v53  ;;  %v957_v26 = vsel %vm893_vm15, %v861_v17, %v925_v50  ;;  %vm896_vm2 = vcmp.ge.f32.partialorder %v864_v30, 0.0  ;;  %v928_v11 = vmul.f32 0.2, %v864_v30 }
 0x189   : > { %989 = vst.msk [vmem:[%s1375_s8 + $0x40] sm:$0xff] %vm980_vm5, %v956_v19  ;;  %990 = vst.msk [vmem:[%s1375_s8 + $0x48] sm:$0xff] %vm980_vm5, %v957_v26  ;;  %v958_v44 = vsel %vm894_vm0, %v862_v40, %v926_v28  ;;  %v959_v32 = vsel %vm895_vm1, %v863_v46, %v927_v18  ;;  %v865_v12 = vadd.f32 %v1716_v6, %v826_v36 }
 0x18a   : > { %v866_v52 = vadd.f32 %v1716_v6, %v827_v34  ;;  %991 = vst.msk [vmem:[%s1375_s8 + $0x50] sm:$0xff] %vm980_vm5, %v958_v44  ;;  %992 = vst.msk [vmem:[%s1375_s8 + $0x58] sm:$0xff] %vm980_vm5, %v959_v32  ;;  %v960_v54 = vsel %vm896_vm2, %v864_v30, %v928_v11  ;;  %v828_v7 = vmul.f32 %v1705_v2, %v790_v55 }
 0x18b   : > { %v829_v5 = vmul.f32 %v1705_v2, %v791_v56  ;;  %v830_v8 = vmul.f32 %v1705_v2, %v792_v57  ;;  %993 = vst.msk [vmem:[%s1375_s8 + $0x60] sm:$0xff] %vm980_vm5, %v960_v54  ;;  %vm897_vm3 = vcmp.ge.f32.partialorder %v865_v12, 0.0  ;;  %v929_v58 = vmul.f32 0.2, %v865_v12 }
 0x18c   : > { %vm898_vm4 = vcmp.ge.f32.partialorder %v866_v52, 0.0  ;;  %v930_v48 = vmul.f32 0.2, %v866_v52  ;;  %v867_v55 = vadd.f32 %v1716_v6, %v828_v7  ;;  %v831_v27 = vmul.f32 %v1705_v2, %v793_v59 }
 0x18d   : > { %v868_v9 = vadd.f32 %v1716_v6, %v829_v5  ;;  %v869_v23 = vadd.f32 %v1716_v6, %v830_v8  ;;  %v961_v56 = vsel %vm897_vm3, %v865_v12, %v929_v58  ;;  %v832_v57 = vmul.f32 %v1705_v2, %v794_v60 }
 0x18e   : > { %v962_v10 = vsel %vm898_vm4, %v866_v52, %v930_v48  ;;  %v833_v22 = vmul.f32 %v1705_v2, %v795_v61  ;;  %994 = vst.msk [vmem:[%s1375_s8 + $0x68] sm:$0xff] %vm980_vm5, %v961_v56  ;;  %vm899_vm6 = vcmp.ge.f32.partialorder %v867_v55, 0.0  ;;  %v931_v21 = vmul.f32 0.2, %v867_v55 }
 0x18f   : > { %995 = vst.msk [vmem:[%s1375_s8 + $0x70] sm:$0xff] %vm980_vm5, %v962_v10  ;;  %vm900_vm7 = vcmp.ge.f32.partialorder %v868_v9, 0.0  ;;  %v932_v59 = vmul.f32 0.2, %v868_v9  ;;  %vm901_vm8 = vcmp.ge.f32.partialorder %v869_v23, 0.0  ;;  %v870_v60 = vadd.f32 %v1716_v6, %v831_v27 }
 0x190   : > { %v933_v25 = vmul.f32 0.2, %v869_v23  ;;  %v871_v14 = vadd.f32 %v1716_v6, %v832_v57  ;;  %v963_v31 = vsel %vm899_vm6, %v867_v55, %v931_v21  ;;  %v872_v61 = vadd.f32 %v1716_v6, %v833_v22 }
 0x191   : > { %v964_v15 = vsel %vm900_vm7, %v868_v9, %v932_v59  ;;  %v834_v16 = vmul.f32 %v1705_v2, %v796_v62  ;;  %996 = vst.msk [vmem:[%s1375_s8 + $0x78] sm:$0xff] %vm980_vm5, %v963_v31  ;;  %vm902_vm9 = vcmp.ge.f32.partialorder %v870_v60, 0.0  ;;  %v934_v38 = vmul.f32 0.2, %v870_v60 }
 0x192   : > { %997 = vst.msk [vmem:[%s1375_s8 + $0x80] sm:$0xff] %vm980_vm5, %v964_v15  ;;  %v965_v4 = vsel %vm901_vm8, %v869_v23, %v933_v25  ;;  %vm903_vm10 = vcmp.ge.f32.partialorder %v871_v14, 0.0  ;;  %v935_v42 = vmul.f32 0.2, %v871_v14  ;;  %vm904_vm11 = vcmp.ge.f32.partialorder %v872_v61, 0.0 }
 0x193   : > { %998 = vst.msk [vmem:[%s1375_s8 + $0x88] sm:$0xff] %vm980_vm5, %v965_v4  ;;  %v936_v20 = vmul.f32 0.2, %v872_v61  ;;  %v873_v35 = vadd.f32 %v1716_v6, %v834_v16  ;;  %v966_v24 = vsel %vm902_vm9, %v870_v60, %v934_v38  ;;  %v835_v62 = vmul.f32 %v1705_v2, %v797_v63 }
 0x194   : > { %v836_v17 = vmul.f32 %v1705_v2, %v798_v0  ;;  %v837_v36 = vmul.f32 %v1705_v2, %v799_v1  ;;  %999 = vst.msk [vmem:[%s1375_s8 + $0x90] sm:$0xff] %vm980_vm5, %v966_v24  ;;  %v967_v40 = vsel %vm903_vm10, %v871_v14, %v935_v42  ;;  %v838_v39 = vmul.f32 %v1705_v2, %v800_v3 }
 0x195   : > { %v968_v46 = vsel %vm904_vm11, %v872_v61, %v936_v20  ;;  %vm905_vm12 = vcmp.ge.f32.partialorder %v873_v35, 0.0  ;;  %v937_v30 = vmul.f32 0.2, %v873_v35  ;;  %1000 = vst.msk [vmem:[%s1375_s8 + $0x98] sm:$0xff] %vm980_vm5, %v967_v40  ;;  %v874_v29 = vadd.f32 %v1716_v6, %v835_v62 }
 0x196   : > { %1001 = vst.msk [vmem:[%s1375_s8 + $0xa0] sm:$0xff] %vm980_vm5, %v968_v46  ;;  %v875_v33 = vadd.f32 %v1716_v6, %v836_v17  ;;  %v876_v63 = vadd.f32 %v1716_v6, %v837_v36  ;;  %v1947_v1 = vsub.f32 %v1454_v37, %v1650_v13  ;;  %v1948_v53 = vsub.f32 %v1462_v41, %v1650_v13 }
 0x197   : > { %v969_v0 = vsel %vm905_vm12, %v873_v35, %v937_v30  ;;  %v1949_v28 = vsub.f32 %v1474_v47, %v1650_v13  ;;  %vm906_vm13 = vcmp.ge.f32.partialorder %v874_v29, 0.0  ;;  %v938_v3 = vmul.f32 0.2, %v874_v29 }
 0x198   : > { %v839_v34 = vmul.f32 %v1705_v2, %v1947_v1  ;;  %v840_v50 = vmul.f32 %v1705_v2, %v1948_v53  ;;  %1002 = vst.msk [vmem:[%s1375_s8 + $0xa8] sm:$0xff] %vm980_vm5, %v969_v0  ;;  %vm907_vm14 = vcmp.ge.f32.partialorder %v875_v33, 0.0  ;;  %v939_v37 = vmul.f32 0.2, %v875_v33 }
 0x199   : > { %v841_v43 = vmul.f32 %v1705_v2, %v1949_v28  ;;  %vm908_vm15 = vcmp.ge.f32.partialorder %v876_v63, 0.0  ;;  %v940_v18 = vmul.f32 0.2, %v876_v63  ;;  %v877_v41 = vadd.f32 %v1716_v6, %v838_v39 }
 0x19a   : > { %v878_v19 = vadd.f32 %v1716_v6, %v839_v34  ;;  %v970_v26 = vsel %vm906_vm13, %v874_v29, %v938_v3  ;;  %v971_v11 = vsel %vm907_vm14, %v875_v33, %v939_v37  ;;  %v879_v47 = vadd.f32 %v1716_v6, %v840_v50 }
 0x19b   : > { %v880_v44 = vadd.f32 %v1716_v6, %v841_v43  ;;  %1003 = vst.msk [vmem:[%s1375_s8 + $0xb0] sm:$0xff] %vm980_vm5, %v970_v26  ;;  %1004 = vst.msk [vmem:[%s1375_s8 + $0xb8] sm:$0xff] %vm980_vm5, %v971_v11  ;;  %v972_v32 = vsel %vm908_vm15, %v876_v63, %v940_v18  ;;  %vm909_vm0 = vcmp.ge.f32.partialorder %v877_v41, 0.0  ;;  %v941_v12 = vmul.f32 0.2, %v877_v41 }
 0x19c   : > { %vm910_vm1 = vcmp.ge.f32.partialorder %v878_v19, 0.0  ;;  %1005 = vst.msk [vmem:[%s1375_s8 + $0xc0] sm:$0xff] %vm980_vm5, %v972_v32  ;;  %v942_v52 = vmul.f32 0.2, %v878_v19  ;;  %vm911_vm2 = vcmp.ge.f32.partialorder %v879_v47, 0.0  ;;  %v1950_v8 = vsub.f32 %v1482_v51, %v1650_v13 }
 0x19d   : > { %v943_v54 = vmul.f32 0.2, %v879_v47  ;;  %vm912_vm3 = vcmp.ge.f32.partialorder %v880_v44, 0.0  ;;  %v973_v7 = vsel %vm909_vm0, %v877_v41, %v941_v12  ;;  %v944_v5 = vmul.f32 0.2, %v880_v44 }
 0x19e   : > { %v842_v58 = vmul.f32 %v1705_v2, %v1950_v8  ;;  %v1951_v48 = vsub.f32 %v1470_v45, %v1650_v13  ;;  %1006 = vst.msk [vmem:[%s1375_s8 + $0xc8] sm:$0xff] %vm980_vm5, %v973_v7  ;;  %v974_v9 = vsel %vm910_vm1, %v878_v19, %v942_v52  ;;  %v1952_v27 = vsub.f32 %v1478_v49, %v1650_v13 }
 0x19f   : > { %v975_v23 = vsel %vm911_vm2, %v879_v47, %v943_v54  ;;  %1007 = vst.msk [vmem:[%s1375_s8 + $0xd0] sm:$0xff] %vm980_vm5, %v974_v9  ;;  %v976_v51 = vsel %vm912_vm3, %v880_v44, %v944_v5 }
 0x1a0   : > { %v843_v55 = vmul.f32 %v1705_v2, %v1951_v48  ;;  %v844_v56 = vmul.f32 %v1705_v2, %v1952_v27  ;;  %1008 = vst.msk [vmem:[%s1375_s8 + $0xd8] sm:$0xff] %vm980_vm5, %v975_v23  ;;  %v881_v45 = vadd.f32 %v1716_v6, %v842_v58  ;;  %1009 = vst.msk [vmem:[%s1375_s8 + $0xe0] sm:$0xff] %vm980_vm5, %v976_v51 }
 0x1a2   : > { %v882_v10 = vadd.f32 %v1716_v6, %v843_v55  ;;  %v883_v57 = vadd.f32 %v1716_v6, %v844_v56  ;;  %vm913_vm4 = vcmp.ge.f32.partialorder %v881_v45, 0.0  ;;  %v945_v49 = vmul.f32 0.2, %v881_v45 }
 0x1a4   : > { %vm914_vm6 = vcmp.ge.f32.partialorder %v882_v10, 0.0  ;;  %v946_v13 = vmul.f32 0.2, %v882_v10  ;;  %vm915_vm7 = vcmp.ge.f32.partialorder %v883_v57, 0.0  ;;  %v947_v2 = vmul.f32 0.2, %v883_v57 }
 0x1a5   : > { %v977_v22 = vsel %vm913_vm4, %v881_v45, %v945_v49 }
 0x1a6   : > { %v978_v21 = vsel %vm914_vm6, %v882_v10, %v946_v13  ;;  %1010 = vst.msk [vmem:[%s1375_s8 + $0xe8] sm:$0xff] %vm980_vm5, %v977_v22  ;;  %v979_v59 = vsel %vm915_vm7, %v883_v57, %v947_v2 }
 0x1a7   : > { %1011 = vst.msk [vmem:[%s1375_s8 + $0xf0] sm:$0xff] %vm980_vm5, %v978_v21  ;;  %1012 = vst.msk [vmem:[%s1375_s8 + $0xf8] sm:$0xff] %vm980_vm5, %v979_v59 }
 0x1a8 PF: > { %s14_s19 = sadd.s32 1, %s1298_s19   ;;  %s1953_s15 = smov %s1290_s17 }
 0x1a9   : > { %p11_p12 = scmp.ge.s32.totalorder %s14_s19, 6   ;;  %s1954_s16 = smov %s1294_s18 }
 0x1aa   : > { %s1955_s17 = smov %s1958_s20  ;;  %s1956_s18 = smov %s1962_s21 }
 0x1ab   :  { %13 = sbr.rel (!%p11_p12) target bundleno = 3 (0x3), region = 78 }

// kernel: resblock_up_forward.3
= control target key start
LH: loop header
LB: loop body
LE: loop exit
PB: predicated region body
PF: predicated region fallthrough
CT: control target
= control target key end

     0   :  { %s2373_s27 = smov 0   ;;  %s2375_s28 = smov 0   ;;  %s3566_s0 = inlined_call_operand.vmem [shape: bf16[2048,36], index: 0, kind: input, shape index: {}]   ;;  %s3567_s1 = inlined_call_operand.vmem [shape: bf16[36,8], index: 1, kind: input, shape index: {}]   ;;  %s3568_s2 = inlined_call_operand.vmem [shape: f32[1,8], index: 2, kind: input, shape index: {}]   ;;  %s3569_s3 = inlined_call_operand.vmem [shape: f32[1,8], index: 3, kind: input, shape index: {}]   ;;  %s3570_s4 = inlined_call_operand.vmem [shape: bf16[2048,36], index: 4, kind: input, shape index: {}]   ;;  %s3571_s5 = inlined_call_operand.vmem [shape: bf16[36,8], index: 5, kind: input, shape index: {}]   ;;  %s3572_s6 = inlined_call_operand.vmem [shape: f32[1,8], index: 6, kind: input, shape index: {}]   ;;  %s3573_s7 = inlined_call_operand.vmem [shape: f32[1,8], index: 7, kind: input, shape index: {}]   ;;  %s3574_s8 = inlined_call_operand.vmem [shape: f32[2048,8], index: 8, kind: output, shape index: {}]  }
   0x1   :  { %s2377_s29 = smov 0   ;;  %s2379_s30 = smov 0  }
   0x2   :  { %s2381_s9 = smov 0  }
   0x3 LB: > { %s27_s10 = sadd.s32 1, %s2317_s29  ;;  %s30_s11 = sadd.s32 1, %s2321_s30  ;;  %s2325_s9 = sphi %s2381_s9, %s18_s9   ;;  %s2321_s30 = sphi %s2379_s30, %s3826_s30   ;;  %s2317_s29 = sphi %s2377_s29, %s3825_s29   ;;  %s2313_s28 = sphi %s2375_s28, %s3824_s28   ;;  %s2309_s27 = sphi %s2373_s27, %s3823_s27  }
   0x4   : > { %p28_p0 = scmp.ge.s32.totalorder %s27_s10, 8  ;;  %p2005_p1 = scmp.ge.s32.totalorder %s2325_s9, 1 }
   0x5   : > { %p288_p2 = scmp.lt.s32.totalorder %s2325_s9, 17 }
   0x6   : > { %s3828_s10 = smov (%p28_p0, %s27_s10), 0  ;;  %s3830_s11 = smov (!%p28_p0, %s30_s11), %s2321_s30 }
   0x7   : > { %p289_p3 = pnand %p2005_p1, %p288_p2  ;;  %p32_p4 = scmp.ge.s32.totalorder %s3830_s11, 2 }
   0x9   : > { %s3832_s11 = smov (%p32_p4, %s3830_s11), 0  ;;  %292 = sbr.rel (%p289_p3) target bundleno = 576 (0x240), region = 52 }
  0x10   : > { %s340_s12 = smul.u32 %s2309_s27, %s2313_s28  ;;  %v2245_v0 = vld [vmem:[%s3567_s1] sm:$0xff]   ;;  %vm530_vm0 = vcmask 1041408   ;;  %s2006_s17 = sshll.u32 %s2309_s27, 5  ;;  %v2247_v2 = vld [vmem:[%s3567_s1 + $0x8] sm:$0xff]   ;;  %vm481_vm1 = vcmask 293888  }
  0x11   : > { %v2246_v1 = vld [vmem:[%s3571_s5] sm:$0xff]   ;;  %2126 = vmatprep.subr.bf16.mxu0 %v2245_v0  ;;  %v2248_v3 = vld [vmem:[%s3571_s5 + $0x8] sm:$0xff]   ;;  %v2249_v4 = vld [vmem:[%s3567_s1 + $0x10] ss:$0 sps:$4 sm:$0x33]   ;;  %p329_p6 = scmp.lt.s32.totalorder %s2006_s17, 255 }
  0x12   : > { %s2010_s18 = sshll.u32 %s340_s12, 5  ;;  %2164 = vmatprep.subr.bf16.mxu1 %v2246_v1  ;;  %2127 = vmatpush3.bf16.msra.mxu0 %v2245_v0  ;;  %v2250_v5 = vld [vmem:[%s3571_s5 + $0x10] ss:$0 sps:$4 sm:$0x33]   ;;  %v532_v6 = vsel %vm530_vm0, %v2249_v4, 0  ;;  %p1039_p7 = scmp.eq.s32.totalorder %s2313_s28, 0 }
  0x13   : > { %p342_p5 = scmp.lt.s32.totalorder %s2010_s18, 255  ;;  %2165 = vmatpush3.bf16.msra.mxu1 %v2246_v1  ;;  %2128 = vmatprep.subr.bf16.mxu0 %v2247_v2  ;;  %s3836_s17 = smov (!%p329_p6, %s2006_s17), 255  ;;  %v876_v7 = vsel %vm530_vm0, %v2250_v5, 0 }
  0x14   : > { %2166 = vmatprep.subr.bf16.mxu1 %v2248_v3  ;;  %s2007_s16 = sshll.u32 %s3836_s17, 2  ;;  %p1040_p8 = scmp.eq.s32.totalorder %s2309_s27, 0 }
  0x15   : > { %s3834_s18 = smov (!%p342_p5, %s2010_s18), 255  ;;  %s2445_s23 = scalar_lea.vmem %s3570_s4, %s2007_s16 }
  0x16   : > { %s2011_s12 = sshll.u32 %s3834_s18, 3  ;;  %2129 = vmatpush3.bf16.msra.mxu0 %v2247_v2  ;;  %s2440_s18 = scalar_lea.vmem %s3566_s0, %s2007_s16  ;;  %v2252_v9 = vld [vmem:[%s2445_s23] sm:$0xff]   ;;  %v2254_v11 = vld [vmem:[%s2445_s23 + $0x8] sm:$0xff]   ;;  %v2256_v13 = vld [vmem:[%s2445_s23 + $0x10] sm:$0xff]  }
  0x17   : > { %s2431_s15 = scalar_lea.vmem %s3574_s8, %s2011_s12  ;;  %2167 = vmatpush3.bf16.msra.mxu1 %v2248_v3  ;;  %2202 = vmatprep.subr.msk.bf16.mxu0 %vm530_vm0, %v2249_v4  ;;  %v2251_v8 = vld [vmem:[%s2440_s18] sm:$0xff]   ;;  %v2253_v10 = vld [vmem:[%s2440_s18 + $0x8] sm:$0xff]   ;;  %v2255_v12 = vld [vmem:[%s2440_s18 + $0x10] sm:$0xff]   ;;  %p2513_p9 = pnand %p1040_p8, %p1039_p7 }
  0x18   : > { %2203 = vmatprep.subr.msk.bf16.mxu1 %vm530_vm0, %v2250_v5  ;;  %2132 = vmatprep.mubr.msk.bf16.mxu0 %vm481_vm1, %v2251_v8  ;;  %v2257_v14 = vld [vmem:[%s2440_s18 + $0x18] sm:$0xff]   ;;  %v2259_v16 = vld [vmem:[%s2440_s18 + $0x20] sm:$0xff]   ;;  %v2261_v18 = vld [vmem:[%s2440_s18 + $0x28] sm:$0xff]   ;;  %vm1045_vm2 = vcmask (!%p2513_p9), 57344  }
  0x19   : > { %2170 = vmatprep.mubr.msk.bf16.mxu1 %vm481_vm1, %v2252_v9  ;;  %v2258_v15 = vld [vmem:[%s2445_s23 + $0x18] sm:$0xff]   ;;  %v2260_v17 = vld [vmem:[%s2445_s23 + $0x20] sm:$0xff]   ;;  %v2262_v19 = vld [vmem:[%s2445_s23 + $0x28] sm:$0xff]  }
  0x1a   : > { %2131 = vmatpush3.bf16.msra.mxu0 %v532_v6  ;;  %v2263_v20 = vld [vmem:[%s2440_s18 + $0x30] sm:$0xff]   ;;  %v2265_v22 = vld [vmem:[%s2440_s18 + $0x38] sm:$0xff]   ;;  %v2267_v24 = vld [vmem:[%s2440_s18 + $0x40] sm:$0xff]  }
  0x1b   : > { %2169 = vmatpush3.bf16.msra.mxu1 %v876_v7  ;;  %v2264_v21 = vld [vmem:[%s2445_s23 + $0x30] sm:$0xff]   ;;  %v2266_v23 = vld [vmem:[%s2445_s23 + $0x38] sm:$0xff]   ;;  %v2268_v25 = vld [vmem:[%s2445_s23 + $0x40] sm:$0xff]  }
  0x1c   : > { %v2269_v26 = vld [vmem:[%s2440_s18 + $0x48] sm:$0xff]   ;;  %v2271_v28 = vld [vmem:[%s2440_s18 + $0x50] sm:$0xff]   ;;  %v2273_v30 = vld [vmem:[%s2440_s18 + $0x58] sm:$0xff]  }
  0x1d   : > { %2133 = vmatmul.mubr.msk.bf16.vlgmr.msra.gmra.mrb[0].mxu0 %vm481_vm1, %v2253_v10  ;;  %v2270_v27 = vld [vmem:[%s2445_s23 + $0x48] sm:$0xff]   ;;  %v2272_v29 = vld [vmem:[%s2445_s23 + $0x50] sm:$0xff]   ;;  %v2274_v31 = vld [vmem:[%s2445_s23 + $0x58] sm:$0xff]  }
  0x1e   : > { %2171 = vmatmul.mubr.msk.bf16.vlgmr.msra.gmra.mrb[0].mxu1 %vm481_vm1, %v2254_v11  ;;  %2136 = vmatprep.mubr.msk.bf16.mxu0 %vm481_vm1, %v2255_v12  ;;  %v2275_v32 = vld [vmem:[%s2440_s18 + $0x60] sm:$0xff]   ;;  %v2277_v34 = vld [vmem:[%s2440_s18 + $0x68] sm:$0xff]   ;;  %v2279_v36 = vld [vmem:[%s2440_s18 + $0x70] sm:$0xff]  }
  0x1f   : > { %2174 = vmatprep.mubr.msk.bf16.mxu1 %vm481_vm1, %v2256_v13  ;;  %v2276_v33 = vld [vmem:[%s2445_s23 + $0x60] sm:$0xff]   ;;  %v2278_v35 = vld [vmem:[%s2445_s23 + $0x68] sm:$0xff]   ;;  %v2280_v37 = vld [vmem:[%s2445_s23 + $0x70] sm:$0xff]  }
  0x20   : > { %v2281_v38 = vld [vmem:[%s2440_s18 + $0x78] sm:$0xff]  }
  0x21   : > { %v2282_v39 = vld [vmem:[%s2445_s23 + $0x78] sm:$0xff]  }
  0x25   : > { %2137 = vmatmul.mubr.msk.bf16.gmra.mrb[4].mxu0 %vm481_vm1, %v2257_v14 }
  0x26   : > { %2175 = vmatmul.mubr.msk.bf16.gmra.mrb[4].mxu1 %vm481_vm1, %v2258_v15  ;;  %2140 = vmatprep.mubr.msk.bf16.mxu0 %vm481_vm1, %v2259_v16 }
  0x27   : > { %2178 = vmatprep.mubr.msk.bf16.mxu1 %vm481_vm1, %v2260_v17 }
  0x2d   : > { %2141 = vmatmul.mubr.msk.bf16.gmra.mrb[8].mxu0 %vm481_vm1, %v2261_v18 }
  0x2e   : > { %2179 = vmatmul.mubr.msk.bf16.gmra.mrb[8].mxu1 %vm481_vm1, %v2262_v19  ;;  %2144 = vmatprep.mubr.msk.bf16.mxu0 %vm481_vm1, %v2263_v20 }
  0x2f   : > { %2182 = vmatprep.mubr.msk.bf16.mxu1 %vm481_vm1, %v2264_v21 }
  0x35   : > { %2145 = vmatmul.mubr.msk.bf16.gmra.mrb[12].mxu0 %vm481_vm1, %v2265_v22 }
  0x36   : > { %2183 = vmatmul.mubr.msk.bf16.gmra.mrb[12].mxu1 %vm481_vm1, %v2266_v23  ;;  %2148 = vmatprep.mubr.msk.bf16.mxu0 %vm481_vm1, %v2267_v24 }
  0x37   : > { %2186 = vmatprep.mubr.msk.bf16.mxu1 %vm481_vm1, %v2268_v25 }
  0x3d   : > { %2149 = vmatmul.mubr.msk.bf16.gmra.mrb[16].mxu0 %vm481_vm1, %v2269_v26 }
  0x3e   : > { %2187 = vmatmul.mubr.msk.bf16.gmra.mrb[16].mxu1 %vm481_vm1, %v2270_v27  ;;  %2152 = vmatprep.mubr.msk.bf16.mxu0 %vm481_vm1, %v2271_v28 }
  0x3f   : > { %2190 = vmatprep.mubr.msk.bf16.mxu1 %vm481_vm1, %v2272_v29 }
  0x45   : > { %2153 = vmatmul.mubr.msk.bf16.gmra.mrb[20].mxu0 %vm481_vm1, %v2273_v30 }
  0x46   : > { %2191 = vmatmul.mubr.msk.bf16.gmra.mrb[20].mxu1 %vm481_vm1, %v2274_v31  ;;  %2156 = vmatprep.mubr.msk.bf16.mxu0 %vm481_vm1, %v2275_v32 }
  0x47   : > { %2194 = vmatprep.mubr.msk.bf16.mxu1 %vm481_vm1, %v2276_v33 }
  0x4d   : > { %2157 = vmatmul.mubr.msk.bf16.gmra.mrb[24].mxu0 %vm481_vm1, %v2277_v34 }
  0x4e   : > { %2195 = vmatmul.mubr.msk.bf16.gmra.mrb[24].mxu1 %vm481_vm1, %v2278_v35  ;;  %2160 = vmatprep.mubr.msk.bf16.mxu0 %vm481_vm1, %v2279_v36 }
  0x4f   : > { %2198 = vmatprep.mubr.msk.bf16.mxu1 %vm481_vm1, %v2280_v37 }
  0x55   : > { %2161 = vmatmul.mubr.msk.bf16.gmra.mrb[28].mxu0 %vm481_vm1, %v2281_v38 }
  0x56   : > { %2199 = vmatmul.mubr.msk.bf16.gmra.mrb[28].mxu1 %vm481_vm1, %v2282_v39 }
  0xf0   : > { %v2517_v40 = vpop.f32.mrb[0].mxu0 }
  0xf1   : > { %3651 = vst [vmem:[#allocation6_spill] sm:$0xff] %v2517_v40  ;;  %v2519_v41 = vpop.f32.mrb[0].mxu1  ;;  %v2521_v42 = vpop.f32.mrb[1].mxu0 }
  0xf2   : > { %3652 = vst [vmem:[#allocation7_spill] sm:$0xff] %v2521_v42  ;;  %v2523_v43 = vpop.f32.mrb[1].mxu1  ;;  %v2525_v44 = vpop.f32.mrb[2].mxu0 }
  0xf3   : > { %3653 = vst [vmem:[#allocation8_spill] sm:$0xff] %v2525_v44  ;;  %v2527_v45 = vpop.f32.mrb[2].mxu1  ;;  %v2529_v46 = vpop.f32.mrb[3].mxu0 }
  0xf4   : > { %3654 = vst [vmem:[#allocation9_spill] sm:$0xff] %v2529_v46  ;;  %v2531_v47 = vpop.f32.mrb[3].mxu1 }
  0xf8   : > { %v2533_v48 = vpop.f32.mrb[4].mxu0 }
  0xf9   : > { %3655 = vst [vmem:[#allocation10_spill] sm:$0xff] %v2533_v48  ;;  %v2535_v49 = vpop.f32.mrb[4].mxu1  ;;  %v2537_v50 = vpop.f32.mrb[5].mxu0 }
  0xfa   : > { %3656 = vst [vmem:[#allocation11_spill] sm:$0xff] %v2537_v50  ;;  %v2539_v51 = vpop.f32.mrb[5].mxu1  ;;  %v2541_v52 = vpop.f32.mrb[6].mxu0 }
  0xfb   : > { %3657 = vst [vmem:[#allocation12_spill] sm:$0xff] %v2541_v52  ;;  %v2543_v53 = vpop.f32.mrb[6].mxu1  ;;  %v2545_v54 = vpop.f32.mrb[7].mxu0 }
  0xfc   : > { %3658 = vst [vmem:[#allocation13_spill] sm:$0xff] %v2545_v54  ;;  %v2547_v55 = vpop.f32.mrb[7].mxu1 }
 0x100   : > { %v2549_v56 = vpop.f32.mrb[8].mxu0 }
 0x101   : > { %3659 = vst [vmem:[#allocation14_spill] sm:$0xff] %v2549_v56  ;;  %v2551_v57 = vpop.f32.mrb[8].mxu1  ;;  %v2553_v58 = vpop.f32.mrb[9].mxu0 }
 0x102   : > { %3660 = vst [vmem:[#allocation15_spill] sm:$0xff] %v2553_v58  ;;  %v2555_v59 = vpop.f32.mrb[9].mxu1  ;;  %v2557_v60 = vpop.f32.mrb[10].mxu0 }
 0x103   : > { %3661 = vst [vmem:[#allocation16_spill] sm:$0xff] %v2557_v60  ;;  %v2559_v61 = vpop.f32.mrb[10].mxu1  ;;  %v2561_v62 = vpop.f32.mrb[11].mxu0 }
 0x104   : > { %3662 = vst [vmem:[#allocation17_spill] sm:$0xff] %v2561_v62  ;;  %v2563_v63 = vpop.f32.mrb[11].mxu1 }
 0x108   : > { %v2565_v0 = vpop.f32.mrb[12].mxu0 }
 0x109   : > { %v2567_v1 = vpop.f32.mrb[12].mxu1  ;;  %v2569_v2 = vpop.f32.mrb[13].mxu0 }
 0x10a   : > { %3663 = vst [vmem:[#allocation18_spill] sm:$0xff] %v2569_v2  ;;  %v2571_v3 = vpop.f32.mrb[13].mxu1  ;;  %v2573_v4 = vpop.f32.mrb[14].mxu0 }
 0x10b   : > { %3664 = vst [vmem:[#allocation19_spill] sm:$0xff] %v2573_v4  ;;  %v2575_v5 = vpop.f32.mrb[14].mxu1  ;;  %v2577_v6 = vpop.f32.mrb[15].mxu0 }
 0x10c   : > { %3665 = vst [vmem:[#allocation20_spill] sm:$0xff] %v2577_v6  ;;  %v2579_v7 = vpop.f32.mrb[15].mxu1 }
 0x110   : > { %v2581_v8 = vpop.f32.mrb[16].mxu0 }
 0x111   : > { %v2583_v9 = vpop.f32.mrb[16].mxu1  ;;  %v2585_v10 = vpop.f32.mrb[17].mxu0 }
 0x112   : > { %3666 = vst [vmem:[#allocation21_spill] sm:$0xff] %v2583_v9  ;;  %v2587_v11 = vpop.f32.mrb[17].mxu1  ;;  %v2589_v12 = vpop.f32.mrb[18].mxu0 }
 0x113   : > { %3667 = vst [vmem:[#allocation22_spill] sm:$0xff] %v2587_v11  ;;  %3668 = vst [vmem:[#allocation23_spill] sm:$0xff] %v2589_v12  ;;  %v2591_v13 = vpop.f32.mrb[18].mxu1  ;;  %v2593_v14 = vpop.f32.mrb[19].mxu0 }
 0x114   : > { %3669 = vst [vmem:[#allocation24_spill] sm:$0xff] %v2591_v13  ;;  %v2595_v15 = vpop.f32.mrb[19].mxu1 }
 0x115   : > { %3670 = vst [vmem:[#allocation25_spill] sm:$0xff] %v2595_v15 }
 0x118   : > { %v2597_v16 = vpop.f32.mrb[20].mxu0 }
 0x119   : > { %3671 = vst [vmem:[#allocation26_spill] sm:$0xff] %v2597_v16  ;;  %v2599_v17 = vpop.f32.mrb[20].mxu1  ;;  %v2601_v18 = vpop.f32.mrb[21].mxu0 }
 0x11a   : > { %3672 = vst [vmem:[#allocation27_spill] sm:$0xff] %v2599_v17  ;;  %v2603_v19 = vpop.f32.mrb[21].mxu1  ;;  %v2605_v20 = vpop.f32.mrb[22].mxu0 }
 0x11b   : > { %3673 = vst [vmem:[#allocation28_spill] sm:$0xff] %v2603_v19  ;;  %3674 = vst [vmem:[#allocation29_spill] sm:$0xff] %v2605_v20  ;;  %v2607_v21 = vpop.f32.mrb[22].mxu1  ;;  %v2609_v22 = vpop.f32.mrb[23].mxu0 }
 0x11c   : > { %3675 = vst [vmem:[#allocation30_spill] sm:$0xff] %v2607_v21  ;;  %3676 = vst [vmem:[#allocation31_spill] sm:$0xff] %v2609_v22  ;;  %v2611_v23 = vpop.f32.mrb[23].mxu1 }
 0x11d   : > { %3677 = vst [vmem:[#allocation32_spill] sm:$0xff] %v2611_v23 }
 0x120   : > { %v2613_v24 = vpop.f32.mrb[24].mxu0 }
 0x121   : > { %3678 = vst [vmem:[#allocation33_spill] sm:$0xff] %v2613_v24  ;;  %v2615_v25 = vpop.f32.mrb[24].mxu1  ;;  %v2617_v26 = vpop.f32.mrb[25].mxu0 }
 0x122   : > { %3679 = vst [vmem:[#allocation34_spill] sm:$0xff] %v2615_v25  ;;  %3680 = vst [vmem:[#allocation35_spill] sm:$0xff] %v2617_v26  ;;  %v2619_v27 = vpop.f32.mrb[25].mxu1  ;;  %v2621_v28 = vpop.f32.mrb[26].mxu0 }
 0x123   : > { %3681 = vst [vmem:[#allocation36_spill] sm:$0xff] %v2619_v27  ;;  %3682 = vst [vmem:[#allocation37_spill] sm:$0xff] %v2621_v28  ;;  %v2623_v29 = vpop.f32.mrb[26].mxu1  ;;  %v2625_v30 = vpop.f32.mrb[27].mxu0 }
 0x124   : > { %3683 = vst [vmem:[#allocation38_spill] sm:$0xff] %v2623_v29  ;;  %3684 = vst [vmem:[#allocation39_spill] sm:$0xff] %v2625_v30  ;;  %v2627_v31 = vpop.f32.mrb[27].mxu1  ;;  %v2327_v29 = vmov (!%p2513_p9), 0.0  }
 0x125   : > { %3685 = vst [vmem:[#allocation40_spill] sm:$0xff] %v2627_v31  ;;  %1046 = vst.msk [vmem:[#allocation2] sm:$0x1] (!%p2513_p9), %vm1045_vm2, %v2327_v29 }
 0x126   : > { %1047 = vst.msk [vmem:[#allocation3] sm:$0x1] (!%p2513_p9), %vm1045_vm2, %v2327_v29  ;;  %1048 = vst.msk [vmem:[#allocation4] sm:$0x1] (!%p2513_p9), %vm1045_vm2, %v2327_v29 }
 0x127   : > { %1044 = sbr.rel (%p2513_p9) target bundleno = 302 (0x12e), region = 56  ;;  %1049 = vst.msk [vmem:[#allocation5] sm:$0x1] (!%p2513_p9), %vm1045_vm2, %v2327_v29 }
 0x128   : > { %v2629_v32 = vpop.f32.mrb[28].mxu0 }
 0x129   : > { %3686 = vst [vmem:[#allocation41_spill] sm:$0xff] %v2629_v32  ;;  %v2631_v33 = vpop.f32.mrb[28].mxu1  ;;  %v2633_v34 = vpop.f32.mrb[29].mxu0 }
 0x12a   : > { %3687 = vst [vmem:[#allocation42_spill] sm:$0xff] %v2631_v33  ;;  %3688 = vst [vmem:[#allocation43_spill] sm:$0xff] %v2633_v34  ;;  %v2635_v35 = vpop.f32.mrb[29].mxu1  ;;  %v2637_v36 = vpop.f32.mrb[30].mxu0 }
 0x12b   : > { %3689 = vst [vmem:[#allocation44_spill] sm:$0xff] %v2635_v35  ;;  %3690 = vst [vmem:[#allocation45_spill] sm:$0xff] %v2637_v36  ;;  %v2639_v37 = vpop.f32.mrb[30].mxu1  ;;  %v2641_v38 = vpop.f32.mrb[31].mxu0 }
 0x12c   : > { %3691 = vst [vmem:[#allocation46_spill] sm:$0xff] %v2639_v37  ;;  %3692 = vst [vmem:[#allocation47_spill] sm:$0xff] %v2641_v38  ;;  %v2643_v39 = vpop.f32.mrb[31].mxu1 }
 0x12d   : > { %3693 = vst [vmem:[#allocation48_spill] sm:$0xff] %v2643_v39 }
 0x12e PF: > { %p2082_p10 = scmp.ne.s32.totalorder %s2313_s28, 0 }
 0x130   : > { %1052 = sbr.rel (%p2082_p10) target bundleno = 441 (0x1b9), region = 60 }
 0x137   : > { %vm1054_vm3 = vcmask 64512   ;;  %vm1125_vm4 = vcmask 57344  }
 0x138   : > { %v1055_v37 = vsel %vm1054_vm3, %v2521_v42, 0.0  ;;  %v1056_v33 = vsel %vm1054_vm3, %v2529_v46, 0.0  ;;  %v1058_v39 = vsel %vm1054_vm3, %v2517_v40, 0.0  ;;  %v1060_v25 = vsel %vm1054_vm3, %v2525_v44, 0.0 }
 0x139   : > { %v1057_v35 = vadd.f32 %v1056_v33, %v1055_v37  ;;  %v1062_v29 = vsel %vm1054_vm3, %v2537_v50, 0.0  ;;  %v1064_v21 = vsel %vm1054_vm3, %v2545_v54, 0.0  ;;  %v1066_v23 = vsel %vm1054_vm3, %v2533_v48, 0.0 }
 0x13a   : > { %v1068_v13 = vsel %vm1054_vm3, %v2541_v52, 0.0  ;;  %v1070_v37 = vsel %vm1054_vm3, %v2553_v58, 0.0  ;;  %v1080_v9 = vsel %vm1054_vm3, %v2577_v6, 0.0 }
 0x13b   : > { %v1059_v31 = vadd.f32 %v1058_v39, %v1057_v35  ;;  %v1128_v39 = vmul.f32 %v2521_v42, %v2521_v42  ;;  %v1078_v42 = vsel %vm1054_vm3, %v2569_v2, 0.0 }
 0x13d   : > { %v1061_v27 = vadd.f32 %v1060_v25, %v1059_v31  ;;  %v1072_v25 = vsel %vm1054_vm3, %v2561_v62, 0.0  ;;  %v1160_v31 = vsel %vm1054_vm3, %v1128_v39, 0.0 }
 0x13f   : > { %v1063_v17 = vadd.f32 %v1062_v29, %v1061_v27  ;;  %v1129_v27 = vmul.f32 %v2529_v46, %v2529_v46  ;;  %v1076_v29 = vsel %vm1054_vm3, %v2557_v60, 0.0 }
 0x141   : > { %v1065_v19 = vadd.f32 %v1064_v21, %v1063_v17  ;;  %v1130_v17 = vmul.f32 %v2517_v40, %v2517_v40  ;;  %v1161_v46 = vsel %vm1054_vm3, %v1129_v27, 0.0  ;;  %v1134_v27 = vmul.f32 %v2533_v48, %v2533_v48 }
 0x142   : > { %v1136_v48 = vmul.f32 %v2553_v58, %v2553_v58 }
 0x143   : > { %v1067_v33 = vadd.f32 %v1066_v23, %v1065_v19  ;;  %v1074_v19 = vsel %vm1054_vm3, %v2549_v56, 0.0  ;;  %v1131_v23 = vmul.f32 %v2525_v44, %v2525_v44  ;;  %v1163_v40 = vsel %vm1054_vm3, %v1130_v17, 0.0 }
 0x145   : > { %v1069_v35 = vadd.f32 %v1068_v13, %v1067_v33  ;;  %v1132_v33 = vmul.f32 %v2537_v50, %v2537_v50  ;;  %v1165_v39 = vsel %vm1054_vm3, %v1131_v23, 0.0  ;;  %v1086_v23 = vsel %vm1054_vm3, %v2585_v10, 0.0 }
 0x146   : > { %v1233_v50 = vsel %vm1054_vm3, %v2531_v47, 0.0 }
 0x147   : > { %v1071_v21 = vadd.f32 %v1070_v37, %v1069_v35  ;;  %v1162_v35 = vadd.f32 %v1161_v46, %v1160_v31  ;;  %v1167_v17 = vsel %vm1054_vm3, %v1132_v33, 0.0  ;;  %v1082_v46 = vsel %vm1054_vm3, %v2565_v0, 0.0 }
 0x149   : > { %v1073_v13 = vadd.f32 %v1072_v25, %v1071_v21  ;;  %v1133_v25 = vmul.f32 %v2545_v54, %v2545_v54  ;;  %v1164_v44 = vadd.f32 %v1163_v40, %v1162_v35  ;;  %v1088_v40 = vsel %vm1054_vm3, %v2593_v14, 0.0 }
 0x14a   : > { %v1092_v35 = vsel %vm1054_vm3, %v2589_v12, 0.0  ;;  %v1232_v54 = vsel %vm1054_vm3, %v2523_v43, 0.0 }
 0x14b   : > { %v1075_v37 = vadd.f32 %v1074_v19, %v1073_v13  ;;  %v1084_v13 = vsel %vm1054_vm3, %v2573_v4, 0.0  ;;  %v1166_v31 = vadd.f32 %v1165_v39, %v1164_v44  ;;  %v1094_v44 = vsel %vm1054_vm3, %v2601_v18, 0.0 }
 0x14c   : > { %v1096_v39 = vsel %vm1054_vm3, %v2609_v22, 0.0  ;;  %v1234_v15 = vadd.f32 %v1233_v50, %v1232_v54  ;;  %v2749_v50 = vsel %vm1054_vm3, %v2613_v24, 0.0  ;;  %v1139_v54 = vmul.f32 %v2557_v60, %v2557_v60 }
 0x14d   : > { %v1077_v21 = vadd.f32 %v1076_v29, %v1075_v37  ;;  %v1135_v29 = vmul.f32 %v2541_v52, %v2541_v52  ;;  %v1169_v37 = vsel %vm1054_vm3, %v1133_v25, 0.0  ;;  %v1171_v52 = vsel %vm1054_vm3, %v1134_v27, 0.0 }
 0x14e   : > { %v1235_v27 = vsel %vm1054_vm3, %v2519_v41, 0.0 }
 0x14f   : > { %v1079_v19 = vadd.f32 %v1078_v42, %v1077_v21  ;;  %v1090_v42 = vsel %vm1054_vm3, %v2581_v8, 0.0  ;;  %v1168_v21 = vadd.f32 %v1167_v17, %v1166_v31  ;;  %v1173_v31 = vsel %vm1054_vm3, %v1135_v29, 0.0 }
 0x150   : > { %v1138_v29 = vmul.f32 %v2549_v56, %v2549_v56 }
 0x151   : > { %v1081_v33 = vadd.f32 %v1080_v9, %v1079_v19  ;;  %v2719_v9 = vsel %vm1054_vm3, %v2597_v16, 0.0  ;;  %v1137_v19 = vmul.f32 %v2561_v62, %v2561_v62  ;;  %v1170_v17 = vadd.f32 %v1169_v37, %v1168_v21 }
 0x152   : > { %v2736_v37 = vsel %vm1054_vm3, %v2617_v26, 0.0  ;;  %v1175_v21 = vsel %vm1054_vm3, %v1136_v48, 0.0  ;;  %v1237_v62 = vsel %vm1054_vm3, %v2527_v45, 0.0  ;;  %v1239_v48 = vsel %vm1054_vm3, %v2539_v51, 0.0 }
 0x153   : > { %v1083_v25 = vadd.f32 %v1082_v46, %v1081_v33  ;;  %v2732_v33 = vsel %vm1054_vm3, %v2605_v20, 0.0  ;;  %v1172_v58 = vadd.f32 %v1171_v52, %v1170_v17  ;;  %v1236_v52 = vadd.f32 %v1235_v27, %v1234_v15 }
 0x154   : > { %v1177_v17 = vsel %vm1054_vm3, %v1137_v19, 0.0  ;;  %v2762_v15 = vsel %vm1054_vm3, %v2633_v34, 0.0  ;;  %v1179_v27 = vsel %vm1054_vm3, %v1138_v29, 0.0  ;;  %v1241_v19 = vsel %vm1054_vm3, %v2547_v55, 0.0 }
 0x155   : > { %v1085_v46 = vadd.f32 %v1084_v13, %v1083_v25  ;;  %v2745_v13 = vsel %vm1054_vm3, %v2625_v30, 0.0  ;;  %v1174_v25 = vadd.f32 %v1173_v31, %v1172_v58  ;;  %v1238_v58 = vadd.f32 %v1237_v62, %v1236_v52 }
 0x156   : > { %v1140_v31 = vmul.f32 %v2569_v2, %v2569_v2  ;;  %v2775_v62 = vsel %vm1054_vm3, %v2629_v32, 0.0  ;;  %v1181_v52 = vsel %vm1054_vm3, %v1139_v54, 0.0  ;;  %v1243_v29 = vsel %vm1054_vm3, %v2535_v49, 0.0 }
 0x157   : > { %v1087_v11 = vadd.f32 %v1086_v23, %v1085_v46  ;;  %v2758_v23 = vsel %vm1054_vm3, %v2621_v28, 0.0  ;;  %v1176_v46 = vadd.f32 %v1175_v21, %v1174_v25  ;;  %v1240_v21 = vadd.f32 %v1239_v48, %v1238_v58  ;;  %3694 = vst [vmem:[#allocation49_spill] sm:$0xff] %v2775_v62 }
 0x158   : > { %v1141_v25 = vmul.f32 %v2577_v6, %v2577_v6  ;;  %v1142_v48 = vmul.f32 %v2565_v0, %v2565_v0  ;;  %v1183_v58 = vsel %vm1054_vm3, %v1140_v31, 0.0  ;;  %v1245_v54 = vsel %vm1054_vm3, %v2543_v53, 0.0 }
 0x159   : > { %v1089_v56 = vadd.f32 %v1088_v40, %v1087_v11  ;;  %v2771_v11 = vsel %vm1054_vm3, %v2641_v38, 0.0  ;;  %v1178_v40 = vadd.f32 %v1177_v17, %v1176_v46  ;;  %v1242_v17 = vadd.f32 %v1241_v19, %v1240_v21 }
 0x15a   : > { %v1143_v46 = vmul.f32 %v2573_v4, %v2573_v4  ;;  %v1146_v19 = vmul.f32 %v2581_v8, %v2581_v8  ;;  %v1247_v31 = vsel %vm1054_vm3, %v2555_v59, 0.0 }
 0x15b   : > { %v1091_v60 = vadd.f32 %v1090_v42, %v1089_v56  ;;  %v2784_v56 = vsel %vm1054_vm3, %v2637_v36, 0.0  ;;  %v1180_v42 = vadd.f32 %v1179_v27, %v1178_v40  ;;  %v1244_v62 = vadd.f32 %v1243_v29, %v1242_v17 }
 0x15c   : > { %v1145_v27 = vmul.f32 %v2593_v14, %v2593_v14  ;;  %v1185_v40 = vsel %vm1054_vm3, %v1141_v25, 0.0  ;;  %v1149_v29 = vmul.f32 %v2609_v22, %v2609_v22  ;;  %v1249_v25 = vsel %vm1054_vm3, %v2563_v63, 0.0 }
 0x15d   : > { %v1093_v2 = vadd.f32 %v1092_v35, %v1091_v60  ;;  %v1144_v60 = vmul.f32 %v2585_v10, %v2585_v10  ;;  %v1182_v35 = vadd.f32 %v1181_v52, %v1180_v42  ;;  %v1246_v4 = vadd.f32 %v1245_v54, %v1244_v62 }
 0x15e   : > { %v1148_v52 = vmul.f32 %v2601_v18, %v2601_v18  ;;  %v1187_v42 = vsel %vm1054_vm3, %v1142_v48, 0.0  ;;  %v2816_v62 = vmul.f32 %v2605_v20, %v2605_v20  ;;  %v1189_v48 = vsel %vm1054_vm3, %v1143_v46, 0.0 }
 0x15f   : > { %v1095_v6 = vadd.f32 %v1094_v44, %v1093_v2  ;;  %v1147_v2 = vmul.f32 %v2589_v12, %v2589_v12  ;;  %v1184_v44 = vadd.f32 %v1183_v58, %v1182_v35  ;;  %v1248_v12 = vadd.f32 %v1247_v31, %v1246_v4 }
 0x160   : > { %v2820_v58 = vmul.f32 %v2617_v26, %v2617_v26  ;;  %v1251_v54 = vsel %vm1054_vm3, %v2551_v57, 0.0  ;;  %v2828_v35 = vmul.f32 %v2625_v30, %v2625_v30  ;;  %v2832_v31 = vmul.f32 %v2613_v24, %v2613_v24 }
 0x161   : > { %v1097_v21 = vadd.f32 %v1096_v39, %v1095_v6  ;;  %v1150_v6 = vmul.f32 %v2597_v16, %v2597_v16  ;;  %v1186_v39 = vadd.f32 %v1185_v40, %v1184_v44  ;;  %v1250_v40 = vadd.f32 %v1249_v25, %v1248_v12 }
 0x162   : > { %v1191_v46 = vsel %vm1054_vm3, %v1144_v60, 0.0  ;;  %v1253_v44 = vsel %vm1054_vm3, %v2559_v61, 0.0  ;;  %v2848_v25 = vmul.f32 %v2641_v38, %v2641_v38  ;;  %v1193_v60 = vsel %vm1054_vm3, %v1145_v27, 0.0 }
 0x163   : > { %v1099_v17 = vadd.f32 %v2719_v9, %v1097_v21  ;;  %v1188_v4 = vadd.f32 %v1187_v42, %v1186_v39  ;;  %v2836_v21 = vmul.f32 %v2621_v28, %v2621_v28  ;;  %v1252_v42 = vadd.f32 %v1251_v54, %v1250_v40 }
 0x164   : > { %v2852_v39 = vmul.f32 %v2629_v32, %v2629_v32  ;;  %v1255_v28 = vsel %vm1054_vm3, %v2571_v3, 0.0  ;;  %v1257_v54 = vsel %vm1054_vm3, %v2579_v7, 0.0  ;;  %v1305_v40 = vmul.f32 %v2531_v47, %v2531_v47 }
 0x165   : > { %v1101_v9 = vadd.f32 %v2732_v33, %v1099_v17  ;;  %v2844_v17 = vmul.f32 %v2633_v34, %v2633_v34  ;;  %v1190_v12 = vadd.f32 %v1189_v48, %v1188_v4  ;;  %v1195_v34 = vsel %vm1054_vm3, %v1146_v19, 0.0 }
 0x166   : > { %v1254_v48 = vadd.f32 %v1253_v44, %v1252_v42  ;;  %v1304_v4 = vmul.f32 %v2523_v43, %v2523_v43  ;;  %v1306_v27 = vmul.f32 %v2519_v41, %v2519_v41  ;;  %v1197_v44 = vsel %vm1054_vm3, %v1147_v2, 0.0 }
 0x167   : > { %v1103_v33 = vadd.f32 %v2736_v37, %v1101_v9  ;;  %v1192_v9 = vadd.f32 %v1191_v46, %v1190_v12  ;;  %v1259_v12 = vsel %vm1054_vm3, %v2567_v1, 0.0  ;;  %v1307_v42 = vmul.f32 %v2527_v45, %v2527_v45 }
 0x168   : > { %v1256_v46 = vadd.f32 %v1255_v28, %v1254_v48  ;;  %v1308_v28 = vmul.f32 %v2539_v51, %v2539_v51  ;;  %v1336_v2 = vsel %vm1054_vm3, %v1304_v4, 0.0 }
 0x169   : > { %v1105_v37 = vadd.f32 %v2745_v13, %v1103_v33  ;;  %v2870_v13 = vmul.f32 %v2637_v36, %v2637_v36  ;;  %v1194_v19 = vadd.f32 %v1193_v60, %v1192_v9  ;;  %v1199_v33 = vsel %vm1054_vm3, %v1148_v52, 0.0 }
 0x16a   : > { %v1337_v52 = vsel %vm1054_vm3, %v1305_v40, 0.0  ;;  %v1339_v60 = vsel %vm1054_vm3, %v1306_v27, 0.0 }
 0x16b   : > { %v1107_v32 = vadd.f32 %v2749_v50, %v1105_v37  ;;  %v1196_v24 = vadd.f32 %v1195_v34, %v1194_v19  ;;  %v1258_v50 = vadd.f32 %v1257_v54, %v1256_v46  ;;  %v1261_v37 = vsel %vm1054_vm3, %v2575_v5, 0.0  ;;  %v3695_v34 = vld [vmem:[#allocation22_spill] sm:$0xff] }
 0x16c   : > { %v1338_v30 = vadd.f32 %v1337_v52, %v1336_v2  ;;  %v1309_v54 = vmul.f32 %v2547_v55, %v2547_v55  ;;  %v1341_v19 = vsel %vm1054_vm3, %v1307_v42, 0.0 }
 0x16d   : > { %v1109_v38 = vadd.f32 %v2758_v23, %v1107_v32  ;;  %v1198_v48 = vadd.f32 %v1197_v44, %v1196_v24  ;;  %v1260_v36 = vadd.f32 %v1259_v12, %v1258_v50  ;;  %v1201_v32 = vsel %vm1054_vm3, %v1149_v29, 0.0  ;;  %v3696_v24 = vld [vmem:[#allocation25_spill] sm:$0xff] }
 0x16e   : > { %v1263_v23 = vsel %vm1054_vm3, %v3695_v34, 0.0  ;;  %v1340_v27 = vadd.f32 %v1339_v60, %v1338_v30  ;;  %v1310_v29 = vmul.f32 %v2535_v49, %v2535_v49  ;;  %v1343_v44 = vsel %vm1054_vm3, %v1308_v28, 0.0  ;;  %v3697_v12 = vld [vmem:[#allocation49_spill] sm:$0xff] }
 0x16f   : > { %v1111_v9 = vadd.f32 %v2762_v15, %v1109_v38  ;;  %v1200_v40 = vadd.f32 %v1199_v33, %v1198_v48  ;;  %v1262_v46 = vadd.f32 %v1261_v37, %v1260_v36  ;;  %v1203_v38 = vsel %vm1054_vm3, %v1150_v6, 0.0  ;;  %v3698_v36 = vld [vmem:[#allocation21_spill] sm:$0xff] }
 0x170   : > { %v1265_v15 = vsel %vm1054_vm3, %v3696_v24, 0.0  ;;  %v1342_v42 = vadd.f32 %v1341_v19, %v1340_v27  ;;  %v1267_v30 = vsel %vm1054_vm3, %v3698_v36, 0.0  ;;  %v1311_v6 = vmul.f32 %v2543_v53, %v2543_v53  ;;  %v3700_v27 = vld [vmem:[#allocation28_spill] sm:$0xff] }
 0x171   : > { %v1113_v4 = vadd.f32 %v2771_v11, %v1111_v9  ;;  %v1202_v2 = vadd.f32 %v1201_v32, %v1200_v40  ;;  %v1264_v52 = vadd.f32 %v1263_v23, %v1262_v46  ;;  %v1205_v11 = vsel %vm1054_vm3, %v2816_v62, 0.0  ;;  %v3699_v32 = vld [vmem:[#allocation24_spill] sm:$0xff] }
 0x172   : > { %v1345_v33 = vsel %vm1054_vm3, %v1309_v54, 0.0  ;;  %v1344_v9 = vadd.f32 %v1343_v44, %v1342_v42  ;;  %v1207_v48 = vsel %vm1054_vm3, %v2820_v58, 0.0  ;;  %v1269_v23 = vsel %vm1054_vm3, %v3699_v32, 0.0 }
 0x173   : > { %v1115_v50 = vadd.f32 %v3697_v12, %v1113_v4  ;;  %v1204_v60 = vadd.f32 %v1203_v38, %v1202_v2  ;;  %v1266_v28 = vadd.f32 %v1265_v15, %v1264_v52  ;;  %v1312_v62 = vmul.f32 %v2555_v59, %v2555_v59  ;;  %v3701_v52 = vld [vmem:[#allocation32_spill] sm:$0xff] }
 0x174   : > { %v1347_v19 = vsel %vm1054_vm3, %v1310_v29, 0.0  ;;  %v1346_v54 = vadd.f32 %v1345_v33, %v1344_v9  ;;  %v1271_v38 = vsel %vm1054_vm3, %v3700_v27, 0.0  ;;  %v1313_v58 = vmul.f32 %v2563_v63, %v2563_v63 }
 0x175   : > { %v1117_v37 = vadd.f32 %v2784_v56, %v1115_v50  ;;  %v1206_v40 = vadd.f32 %v1205_v11, %v1204_v60  ;;  %v1268_v46 = vadd.f32 %v1267_v30, %v1266_v28  ;;  %v1209_v56 = vsel %vm1054_vm3, %v2828_v35, 0.0  ;;  %v3702_v28 = vld [vmem:[#allocation27_spill] sm:$0xff] }
 0x176   : > { %v1349_v15 = vsel %vm1054_vm3, %v1311_v6, 0.0  ;;  %v1348_v2 = vadd.f32 %v1347_v19, %v1346_v54  ;;  %v1211_v29 = vsel %vm1054_vm3, %v2832_v31, 0.0  ;;  %v1273_v42 = vsel %vm1054_vm3, %v3701_v52, 0.0 }
 0x177   : > { %v1118_v4 = vrot.slane %v1117_v37, 4  ;;  %v1208_v12 = vadd.f32 %v1207_v48, %v1206_v40  ;;  %v1270_v50 = vadd.f32 %v1269_v23, %v1268_v46  ;;  %v1314_v35 = vmul.f32 %v2551_v57, %v2551_v57  ;;  %v3703_v46 = vld [vmem:[#allocation30_spill] sm:$0xff] }
 0x178   : > { %v1351_v11 = vsel %vm1054_vm3, %v1312_v62, 0.0  ;;  %v1350_v6 = vadd.f32 %v1349_v15, %v1348_v2  ;;  %v1275_v9 = vsel %vm1054_vm3, %v3702_v28, 0.0  ;;  %v1315_v31 = vmul.f32 %v2559_v61, %v2559_v61  ;;  %v3704_v2 = vld [vmem:[#allocation36_spill] sm:$0xff] }
 0x179   : > { %v1119_v44 = vadd.f32 %v1118_v4, %v1117_v37  ;;  %v1210_v33 = vadd.f32 %v1209_v56, %v1208_v12  ;;  %v1272_v60 = vadd.f32 %v1271_v38, %v1270_v50  ;;  %v1213_v37 = vsel %vm1054_vm3, %v2836_v21, 0.0 }
 0x17a   : > { %v1353_v48 = vsel %vm1054_vm3, %v1313_v58, 0.0  ;;  %v1352_v40 = vadd.f32 %v1351_v11, %v1350_v6  ;;  %v1215_v62 = vsel %vm1054_vm3, %v2844_v17, 0.0  ;;  %v1277_v54 = vsel %vm1054_vm3, %v3703_v46, 0.0  ;;  %v1053_v58 = vld [vmem:[#allocation2] sm:$0x1]  ;;  %v3705_v6 = vld [vmem:[#allocation40_spill] sm:$0xff] }
 0x17b   : > { %v1120_v30 = vrot.slane %v1119_v44, 2  ;;  %v1212_v19 = vadd.f32 %v1211_v29, %v1210_v33  ;;  %v1274_v4 = vadd.f32 %v1273_v42, %v1272_v60  ;;  %v1316_v21 = vmul.f32 %v2571_v3, %v2571_v3 }
 0x17c   : > { %v1355_v56 = vsel %vm1054_vm3, %v1314_v35, 0.0  ;;  %v1354_v50 = vadd.f32 %v1353_v48, %v1352_v40  ;;  %v1279_v29 = vsel %vm1054_vm3, %v3704_v2, 0.0  ;;  %v1317_v17 = vmul.f32 %v2579_v7, %v2579_v7 }
 0x17d   : > { %v1121_v23 = vadd.f32 %v1120_v30, %v1119_v44  ;;  %v1214_v15 = vadd.f32 %v1213_v37, %v1212_v19  ;;  %v1276_v12 = vadd.f32 %v1275_v9, %v1274_v4  ;;  %v1217_v44 = vsel %vm1054_vm3, %v2848_v25, 0.0 }
 0x17e   : > { %v1357_v42 = vsel %vm1054_vm3, %v1315_v31, 0.0  ;;  %v1356_v35 = vadd.f32 %v1355_v56, %v1354_v50  ;;  %v1219_v60 = vsel %vm1054_vm3, %v2852_v39, 0.0  ;;  %v1281_v37 = vsel %vm1054_vm3, %v3705_v6, 0.0 }
 0x17f   : > { %v1122_v38 = vrot.slane %v1121_v23, 1  ;;  %v1216_v30 = vadd.f32 %v1215_v62, %v1214_v15  ;;  %v1278_v33 = vadd.f32 %v1277_v54, %v1276_v12  ;;  %v1318_v25 = vmul.f32 %v2567_v1, %v2567_v1  ;;  %v3707_v15 = vld [vmem:[#allocation38_spill] sm:$0xff] }
 0x180   : > { %v1359_v9 = vsel %vm1054_vm3, %v1316_v21, 0.0  ;;  %v1358_v40 = vadd.f32 %v1357_v42, %v1356_v35  ;;  %v1221_v31 = vsel %vm1054_vm3, %v2870_v13, 0.0  ;;  %v1319_v39 = vmul.f32 %v2575_v5, %v2575_v5  ;;  %v3708_v42 = vld [vmem:[#allocation44_spill] sm:$0xff] }
 0x181   : > { %v1123_v11 = vadd.f32 %v1122_v38, %v1121_v23  ;;  %v1218_v19 = vadd.f32 %v1217_v44, %v1216_v30  ;;  %v1280_v4 = vadd.f32 %v1279_v29, %v1278_v33  ;;  %v3706_v23 = vld [vmem:[#allocation34_spill] sm:$0xff]  ;;  %v1361_v54 = vsel %vm1054_vm3, %v1317_v17, 0.0 }
 0x182   : > { %v1283_v62 = vsel %vm1054_vm3, %v3706_v23, 0.0  ;;  %v1360_v21 = vadd.f32 %v1359_v9, %v1358_v40  ;;  %v1285_v12 = vsel %vm1054_vm3, %v3707_v15, 0.0  ;;  %v1320_v50 = vmul.f32 %v3695_v34, %v3695_v34  ;;  %v3710_v40 = vld [vmem:[#allocation42_spill] sm:$0xff] }
 0x183   : > { %v1124_v48 = vadd.f32 %v1123_v11, %v1053_v58  ;;  %v1220_v56 = vadd.f32 %v1219_v60, %v1218_v19  ;;  %v1282_v38 = vadd.f32 %v1281_v37, %v1280_v4  ;;  %v1363_v13 = vsel %vm1054_vm3, %v1318_v25, 0.0  ;;  %v3709_v37 = vld [vmem:[#allocation48_spill] sm:$0xff] }
 0x184   : > { %v1362_v29 = vadd.f32 %v1361_v54, %v1360_v21  ;;  %v1287_v11 = vsel %vm1054_vm3, %v3708_v42, 0.0  ;;  %v1321_v17 = vmul.f32 %v3696_v24, %v3696_v24  ;;  %v1365_v30 = vsel %vm1054_vm3, %v1319_v39, 0.0 }
 0x185   : > { %1126 = vst.msk [vmem:[#allocation2] sm:$0x1] %vm1125_vm4, %v1124_v48  ;;  %v1222_v58 = vadd.f32 %v1221_v31, %v1220_v56  ;;  %v1284_v44 = vadd.f32 %v1283_v62, %v1282_v38  ;;  %v1289_v9 = vsel %vm1054_vm3, %v3709_v37, 0.0  ;;  %v1322_v34 = vmul.f32 %v3698_v36, %v3698_v36  ;;  %v3711_v38 = vld [vmem:[#allocation46_spill] sm:$0xff] }
 0x186   : > { %v1364_v60 = vadd.f32 %v1363_v13, %v1362_v29  ;;  %v1367_v25 = vsel %vm1054_vm3, %v1320_v50, 0.0  ;;  %v1291_v31 = vsel %vm1054_vm3, %v3710_v40, 0.0  ;;  %v1323_v24 = vmul.f32 %v3699_v32, %v3699_v32 }
 0x187   : > { %v1223_v33 = vrot.slane %v1222_v58, 4  ;;  %v1286_v35 = vadd.f32 %v1285_v12, %v1284_v44  ;;  %v1369_v62 = vsel %vm1054_vm3, %v1321_v17, 0.0  ;;  %v1293_v21 = vsel %vm1054_vm3, %v3711_v38, 0.0 }
 0x188   : > { %v1366_v4 = vadd.f32 %v1365_v30, %v1364_v60  ;;  %v1324_v36 = vmul.f32 %v3700_v27, %v3700_v27  ;;  %v1371_v12 = vsel %vm1054_vm3, %v1322_v34, 0.0  ;;  %v1325_v44 = vmul.f32 %v3701_v52, %v3701_v52  ;;  %v1127_v30 = vld [vmem:[#allocation3] sm:$0x1] }
 0x189   : > { %v1224_v48 = vadd.f32 %v1223_v33, %v1222_v58  ;;  %v1288_v19 = vadd.f32 %v1287_v11, %v1286_v35  ;;  %v1373_v32 = vsel %vm1054_vm3, %v1323_v24, 0.0  ;;  %v1326_v33 = vmul.f32 %v3702_v28, %v3702_v28 }
 0x18a   : > { %v1368_v56 = vadd.f32 %v1367_v25, %v1366_v4  ;;  %v1375_v35 = vsel %vm1054_vm3, %v1324_v36, 0.0  ;;  %v1327_v34 = vmul.f32 %v3703_v46, %v3703_v46  ;;  %v1377_v25 = vsel %vm1054_vm3, %v1325_v44, 0.0 }
 0x18b   : > { %v1225_v39 = vrot.slane %v1224_v48, 2  ;;  %v1290_v54 = vadd.f32 %v1289_v9, %v1288_v19  ;;  %v1328_v4 = vmul.f32 %v3704_v2, %v3704_v2 }
 0x18c   : > { %v1370_v58 = vadd.f32 %v1369_v62, %v1368_v56  ;;  %v1329_v62 = vmul.f32 %v3705_v6, %v3705_v6  ;;  %v1330_v56 = vmul.f32 %v3706_v23, %v3706_v23  ;;  %v1332_v6 = vmul.f32 %v3708_v42, %v3708_v42 }
 0x18d   : > { %v1226_v50 = vadd.f32 %v1225_v39, %v1224_v48  ;;  %v1292_v13 = vadd.f32 %v1291_v31, %v1290_v54  ;;  %v1379_v31 = vsel %vm1054_vm3, %v1326_v33, 0.0  ;;  %v1381_v39 = vsel %vm1054_vm3, %v1327_v34, 0.0 }
 0x18e   : > { %v1372_v17 = vadd.f32 %v1371_v12, %v1370_v58  ;;  %v1231_v12 = vld [vmem:[#allocation4] sm:$0x1]  ;;  %v1333_v23 = vmul.f32 %v3709_v37, %v3709_v37  ;;  %v1391_v33 = vsel %vm1054_vm3, %v1332_v6, 0.0  ;;  %v1335_v42 = vmul.f32 %v3711_v38, %v3711_v38 }
 0x18f   : > { %v1227_v29 = vrot.slane %v1226_v50, 1  ;;  %v1294_v11 = vadd.f32 %v1293_v21, %v1292_v13  ;;  %v1383_v21 = vsel %vm1054_vm3, %v1328_v4, 0.0  ;;  %v1385_v13 = vsel %vm1054_vm3, %v1329_v62, 0.0 }
 0x190   : > { %v1374_v9 = vadd.f32 %v1373_v32, %v1372_v17  ;;  %v1387_v32 = vsel %vm1054_vm3, %v1330_v56, 0.0  ;;  %v1397_v34 = vsel %vm1054_vm3, %v1335_v42, 0.0 }
 0x191   : > { %v1228_v27 = vadd.f32 %v1227_v29, %v1226_v50  ;;  %v1295_v60 = vrot.slane %v1294_v11, 4  ;;  %v1331_v50 = vmul.f32 %v3707_v15, %v3707_v15  ;;  %v1334_v15 = vmul.f32 %v3710_v40, %v3710_v40 }
 0x192   : > { %v1376_v19 = vadd.f32 %v1375_v35, %v1374_v9 }
 0x193   : > { %v1229_v52 = vadd.f32 %v1228_v27, %v1127_v30  ;;  %v1296_v48 = vadd.f32 %v1295_v60, %v1294_v11  ;;  %v1389_v17 = vsel %vm1054_vm3, %v1331_v50, 0.0  ;;  %v1393_v27 = vsel %vm1054_vm3, %v1333_v23, 0.0 }
 0x194   : > { %v1378_v24 = vadd.f32 %v1377_v25, %v1376_v19  ;;  %v1395_v9 = vsel %vm1054_vm3, %v1334_v15, 0.0 }
 0x195   : > { %1230 = vst.msk [vmem:[#allocation3] sm:$0x1] %vm1125_vm4, %v1229_v52  ;;  %v1297_v28 = vrot.slane %v1296_v48, 2 }
 0x196   : > { %v1380_v54 = vadd.f32 %v1379_v31, %v1378_v24 }
 0x197   : > { %v1298_v46 = vadd.f32 %v1297_v28, %v1296_v48  ;;  %v1303_v28 = vld [vmem:[#allocation5] sm:$0x1] }
 0x198   : > { %v1382_v2 = vadd.f32 %v1381_v39, %v1380_v54 }
 0x199   : > { %v1299_v36 = vrot.slane %v1298_v46, 1 }
 0x19a   : > { %v1384_v44 = vadd.f32 %v1383_v21, %v1382_v2 }
 0x19b   : > { %v1300_v58 = vadd.f32 %v1299_v36, %v1298_v46 }
 0x19c   : > { %v1386_v11 = vadd.f32 %v1385_v13, %v1384_v44 }
 0x19d   : > { %v1301_v29 = vadd.f32 %v1300_v58, %v1231_v12 }
 0x19e   : > { %v1388_v30 = vadd.f32 %v1387_v32, %v1386_v11 }
 0x19f   : > { %1302 = vst.msk [vmem:[#allocation4] sm:$0x1] %vm1125_vm4, %v1301_v29 }
 0x1a0   : > { %v1390_v35 = vadd.f32 %v1389_v17, %v1388_v30 }
 0x1a2   : > { %v1392_v60 = vadd.f32 %v1391_v33, %v1390_v35 }
 0x1a4   : > { %v1394_v37 = vadd.f32 %v1393_v27, %v1392_v60 }
 0x1a6   : > { %v1396_v25 = vadd.f32 %v1395_v9, %v1394_v37 }
 0x1a8   : > { %v1398_v52 = vadd.f32 %v1397_v34, %v1396_v25 }
 0x1aa   : > { %v1399_v48 = vrot.slane %v1398_v52, 4 }
 0x1ac   : > { %v1400_v19 = vadd.f32 %v1399_v48, %v1398_v52 }
 0x1ae   : > { %v1401_v4 = vrot.slane %v1400_v19, 2 }
 0x1b0   : > { %v1402_v40 = vadd.f32 %v1401_v4, %v1400_v19 }
 0x1b2   : > { %v1403_v31 = vrot.slane %v1402_v40, 1 }
 0x1b4   : > { %v1404_v24 = vadd.f32 %v1403_v31, %v1402_v40 }
 0x1b6   : > { %v1405_v62 = vadd.f32 %v1404_v24, %v1303_v28 }
 0x1b8   : > { %1406 = vst.msk [vmem:[#allocation5] sm:$0x1] %vm1125_vm4, %v1405_v62 }
 0x1b9 PF: > { %p2083_p11 = scmp.ne.s32.totalorder %s2313_s28, 1 }
 0x1ba   : > { %v1411_v38 = vld [vmem:[#allocation2] sm:$0x1] (!%p2083_p11)  ;;  %v1413_v39 = vld [vmem:[#allocation3] sm:$0x1] (!%p2083_p11)  ;;  %v1422_v46 = vlaneseq (!%p2083_p11)  ;;  %v1632_v21 = vld [vmem:[#allocation4] sm:$0x1] (!%p2083_p11) }
 0x1bb   : > { %1410 = sbr.rel (%p2083_p11) target bundleno = 576 (0x240), region = 64  ;;  %v1412_v54 = vmul.f32 (!%p2083_p11), 0.00048828125, %v1411_v38  ;;  %v1414_v56 = vmul.f32 (!%p2083_p11), 0.00048828125, %v1413_v39  ;;  %v1633_v2 = vmul.f32 (!%p2083_p11), 0.00048828125, %v1632_v21  ;;  %v3712_v17 = vld [vmem:[#allocation7_spill] sm:$0xff] (!%p2083_p11)  ;;  %v3713_v35 = vld [vmem:[#allocation9_spill] sm:$0xff] (!%p2083_p11) }
 0x1bc   : > { %v1423_v36 = vshrl.u32 (!%p2083_p11), %v1422_v46, 7  ;;  %v3714_v60 = vld [vmem:[#allocation6_spill] sm:$0xff] (!%p2083_p11)  ;;  %v3715_v34 = vld [vmem:[#allocation8_spill] sm:$0xff] (!%p2083_p11)  ;;  %v3716_v48 = vld [vmem:[#allocation11_spill] sm:$0xff] (!%p2083_p11)  ;;  %vm1885_vm5 = vcmask (!%p2083_p11), 64512  }
 0x1bd   : > { %v1415_v50 = vmul.f32 (!%p2083_p11), %v1412_v54, %v1412_v54  ;;  %v1636_v44 = vmul.f32 (!%p2083_p11), %v1633_v2, %v1633_v2  ;;  %v3717_v40 = vld [vmem:[#allocation13_spill] sm:$0xff] (!%p2083_p11)  ;;  %v3718_v24 = vld [vmem:[#allocation10_spill] sm:$0xff] (!%p2083_p11)  ;;  %v3719_v39 = vld [vmem:[#allocation12_spill] sm:$0xff] (!%p2083_p11) }
 0x1be   : > { %v3030_v58 = vsub.s32 (!%p2083_p11), 0, %v1423_v36  ;;  %v3724_v36 = vld [vmem:[#allocation18_spill] sm:$0xff] (!%p2083_p11)  ;;  %v3729_v21 = vld [vmem:[#allocation21_spill] sm:$0xff] (!%p2083_p11)  ;;  %v3730_v31 = vld [vmem:[#allocation23_spill] sm:$0xff] (!%p2083_p11) }
 0x1bf   : > { %v1634_v12 = vld [vmem:[#allocation5] sm:$0x1] (!%p2083_p11)  ;;  %v1416_v6 = vsub.f32 (!%p2083_p11), %v1414_v56, %v1415_v50  ;;  %v3720_v56 = vld [vmem:[#allocation15_spill] sm:$0xff] (!%p2083_p11)  ;;  %v3725_v50 = vld [vmem:[#allocation20_spill] sm:$0xff] (!%p2083_p11) }
 0x1c0   : > { %v1635_v13 = vmul.f32 (!%p2083_p11), 0.00048828125, %v1634_v12  ;;  %v3033_v32 = vrot.slane (!%p2083_p11), %v1412_v54, %v3030_v58  ;;  %v3036_v11 = vrot.slane (!%p2083_p11), %v1633_v2, %v3030_v58  ;;  %v3721_v2 = vld [vmem:[#allocation17_spill] sm:$0xff] (!%p2083_p11)  ;;  %v3731_v38 = vld [vmem:[#allocation24_spill] sm:$0xff] (!%p2083_p11) }
 0x1c1   : > { %v1418_v23 = vadd.f32 (!%p2083_p11), 1e-05, %v1416_v6  ;;  %v1417_v54 = vld [vmem:[%s3568_s2] sm:$0x1] (!%p2083_p11)  ;;  %v3732_v52 = vld [vmem:[#allocation28_spill] sm:$0xff] (!%p2083_p11) }
 0x1c2   : > { %v1637_v29 = vsub.f32 %v1635_v13, %v1636_v44  ;;  %v3722_v13 = vld [vmem:[#allocation14_spill] sm:$0xff]  ;;  %v1638_v12 = vld [vmem:[%s3572_s6] sm:$0x1]  ;;  %v3746_v46 = vsub.f32 %v3714_v60, %v3033_v32  ;;  %v3748_v20 = vsub.f32 %v2523_v43, %v3036_v11  ;;  %v3750_v60 = vsub.f32 %v2519_v41, %v3036_v11 }
 0x1c3   : > { %2283 = vrsqrt.f32 %v1418_v23  ;;  %v3727_v44 = vld [vmem:[#allocation22_spill] sm:$0xff]  ;;  %v3728_v23 = vld [vmem:[#allocation25_spill] sm:$0xff] }
 0x1c4   : > { %v1639_v15 = vadd.f32 1e-05, %v1637_v29  ;;  %v3723_v29 = vld [vmem:[#allocation16_spill] sm:$0xff]  ;;  %v3158_v37 = vld [vmem:[%s3569_s3] ss:$0 sm:$0xff] }
 0x1c6   : > { %2285 = vrsqrt.f32 %v1639_v15  ;;  %v3726_v15 = vld [vmem:[#allocation19_spill] sm:$0xff] }
 0x1cd   : > { %v2284_v62 = vpop.eup %2283 }
 0x1ce   : > { %v1420_v25 = vmul.f32 %v2284_v62, %v1417_v54 }
 0x1d0   : > { %v2286_v4 = vpop.eup %2285  ;;  %v3147_v62 = vrot.slane %v1420_v25, %v3030_v58 }
 0x1d1   : > { %v1641_v30 = vmul.f32 %v2286_v4, %v1638_v12  ;;  %v3744_v12 = vsub.f32 %v3712_v17, %v3033_v32  ;;  %v3747_v17 = vsub.f32 %v3715_v34, %v3033_v32  ;;  %v3751_v34 = vsub.f32 %v2527_v45, %v3036_v11 }
 0x1d2   : > { %v1467_v6 = vmul.f32 %v3147_v62, %v3746_v46 }
 0x1d3   : > { %v3161_v27 = vrot.slane %v1641_v30, %v3030_v58  ;;  %v1465_v4 = vmul.f32 %v3147_v62, %v3744_v12  ;;  %v3176_v58 = vld [vmem:[%s3573_s7] ss:$0 sm:$0xff]  ;;  %v3745_v30 = vsub.f32 %v3713_v35, %v3033_v32  ;;  %v1468_v12 = vmul.f32 %v3147_v62, %v3747_v17 }
 0x1d4   : > { %v3749_v35 = vsub.f32 %v2531_v47, %v3036_v11 }
 0x1d5   : > { %v1466_v16 = vmul.f32 %v3147_v62, %v3745_v30  ;;  %v1686_v9 = vmul.f32 %v3161_v27, %v3748_v20  ;;  %v1688_v46 = vmul.f32 %v3161_v27, %v3750_v60  ;;  %v1689_v17 = vmul.f32 %v3161_v27, %v3751_v34 }
 0x1d6   : > { %v1687_v30 = vmul.f32 %v3161_v27, %v3749_v35  ;;  %v1504_v25 = vadd.f32 %v3158_v37, %v1465_v4  ;;  %v1506_v20 = vadd.f32 %v3158_v37, %v1467_v6  ;;  %v1507_v47 = vadd.f32 %v3158_v37, %v1468_v12 }
 0x1d7   : > { %v1505_v43 = vadd.f32 %v3158_v37, %v1466_v16  ;;  %v1725_v35 = vadd.f32 %v3176_v58, %v1686_v9  ;;  %v1727_v41 = vadd.f32 %v3176_v58, %v1688_v46  ;;  %v1728_v60 = vadd.f32 %v3176_v58, %v1689_v17 }
 0x1d8   : > { %v1726_v54 = vadd.f32 %v3176_v58, %v1687_v30  ;;  %vm1536_vm6 = vcmp.ge.f32.partialorder %v1504_v25, 0.0  ;;  %v1568_v45 = vmul.f32 0.2, %v1504_v25  ;;  %vm1538_vm10 = vcmp.ge.f32.partialorder %v1506_v20, 0.0 }
 0x1d9   : > { %vm1537_vm7 = vcmp.ge.f32.partialorder %v1505_v43, 0.0  ;;  %v1569_v34 = vmul.f32 0.2, %v1505_v43  ;;  %vm1757_vm8 = vcmp.ge.f32.partialorder %v1725_v35, 0.0  ;;  %v1789_v4 = vmul.f32 0.2, %v1725_v35 }
 0x1da   : > { %vm1758_vm9 = vcmp.ge.f32.partialorder %v1726_v54, 0.0  ;;  %v1790_v16 = vmul.f32 0.2, %v1726_v54  ;;  %v1600_v28 = vsel %vm1536_vm6, %v1504_v25, %v1568_v45  ;;  %v1570_v9 = vmul.f32 0.2, %v1506_v20 }
 0x1db   : > { %v1601_v6 = vsel %vm1537_vm7, %v1505_v43, %v1569_v34  ;;  %v1821_v12 = vsel %vm1757_vm8, %v1725_v35, %v1789_v4  ;;  %vm1759_vm11 = vcmp.ge.f32.partialorder %v1727_v41, 0.0  ;;  %v1791_v46 = vmul.f32 0.2, %v1727_v41 }
 0x1dc   : > { %v1822_v30 = vsel %vm1758_vm9, %v1726_v54, %v1790_v16  ;;  %v1853_v33 = vadd.f32 %v1821_v12, %v1600_v28  ;;  %v1602_v26 = vsel %vm1538_vm10, %v1506_v20, %v1570_v9  ;;  %vm1539_vm12 = vcmp.ge.f32.partialorder %v1507_v47, 0.0 }
 0x1dd   : > { %v1854_v17 = vadd.f32 %v1822_v30, %v1601_v6  ;;  %v1823_v42 = vsel %vm1759_vm11, %v1727_v41, %v1791_v46  ;;  %v1571_v19 = vmul.f32 0.2, %v1507_v47  ;;  %vm1760_vm13 = vcmp.ge.f32.partialorder %v1728_v60, 0.0 }
 0x1de   : > { %v1792_v22 = vmul.f32 0.2, %v1728_v60  ;;  %1886 = vst.msk [vmem:[%s2431_s15] sm:$0xff] %vm1885_vm5, %v1853_v33  ;;  %v1855_v25 = vadd.f32 %v1823_v42, %v1602_v26  ;;  %v3752_v43 = vsub.f32 %v3716_v48, %v3033_v32  ;;  %v3753_v28 = vsub.f32 %v2539_v51, %v3036_v11 }
 0x1df   : > { %1887 = vst.msk [vmem:[%s2431_s15 + $0x8] sm:$0xff] %vm1885_vm5, %v1854_v17  ;;  %v3754_v35 = vsub.f32 %v3717_v40, %v3033_v32  ;;  %v1603_v33 = vsel %vm1539_vm12, %v1507_v47, %v1571_v19  ;;  %v3755_v26 = vsub.f32 %v2547_v55, %v3036_v11  ;;  %v3756_v48 = vsub.f32 %v3718_v24, %v3033_v32 }
 0x1e0   : > { %v1469_v54 = vmul.f32 %v3147_v62, %v3752_v43  ;;  %v1690_v20 = vmul.f32 %v3161_v27, %v3753_v28  ;;  %v1824_v45 = vsel %vm1760_vm13, %v1728_v60, %v1792_v22  ;;  %1888 = vst.msk [vmem:[%s2431_s15 + $0x10] sm:$0xff] %vm1885_vm5, %v1855_v25  ;;  %v3757_v47 = vsub.f32 %v2535_v49, %v3036_v11 }
 0x1e1   : > { %v1470_v41 = vmul.f32 %v3147_v62, %v3754_v35  ;;  %v1691_v42 = vmul.f32 %v3161_v27, %v3755_v26  ;;  %v1471_v51 = vmul.f32 %v3147_v62, %v3756_v48  ;;  %v1856_v34 = vadd.f32 %v1824_v45, %v1603_v33 }
 0x1e2   : > { %v1508_v4 = vadd.f32 %v3158_v37, %v1469_v54  ;;  %v1729_v40 = vadd.f32 %v3176_v58, %v1690_v20  ;;  %v1692_v24 = vmul.f32 %v3161_v27, %v3757_v47  ;;  %v3758_v60 = vsub.f32 %v3719_v39, %v3033_v32 }
 0x1e3   : > { %v1509_v19 = vadd.f32 %v3158_v37, %v1470_v41  ;;  %v1730_v22 = vadd.f32 %v3176_v58, %v1691_v42  ;;  %v1510_v55 = vadd.f32 %v3158_v37, %v1471_v51  ;;  %1889 = vst.msk [vmem:[%s2431_s15 + $0x18] sm:$0xff] %vm1885_vm5, %v1856_v34  ;;  %v3759_v41 = vsub.f32 %v2543_v53, %v3036_v11 }
 0x1e4   : > { %v1472_v16 = vmul.f32 %v3147_v62, %v3758_v60  ;;  %vm1540_vm14 = vcmp.ge.f32.partialorder %v1508_v4, 0.0  ;;  %v1572_v6 = vmul.f32 0.2, %v1508_v4  ;;  %vm1761_vm15 = vcmp.ge.f32.partialorder %v1729_v40, 0.0 }
 0x1e5   : > { %v1793_v9 = vmul.f32 0.2, %v1729_v40  ;;  %vm1541_vm0 = vcmp.ge.f32.partialorder %v1509_v19, 0.0  ;;  %v1573_v12 = vmul.f32 0.2, %v1509_v19  ;;  %vm1762_vm1 = vcmp.ge.f32.partialorder %v1730_v22, 0.0 }
 0x1e6   : > { %v1794_v30 = vmul.f32 0.2, %v1730_v22  ;;  %v1604_v46 = vsel %vm1540_vm14, %v1508_v4, %v1572_v6  ;;  %vm1542_vm2 = vcmp.ge.f32.partialorder %v1510_v55, 0.0  ;;  %v1574_v17 = vmul.f32 0.2, %v1510_v55 }
 0x1e7   : > { %v1825_v49 = vsel %vm1761_vm15, %v1729_v40, %v1793_v9  ;;  %v1605_v39 = vsel %vm1541_vm0, %v1509_v19, %v1573_v12  ;;  %v1731_v54 = vadd.f32 %v3176_v58, %v1692_v24  ;;  %v1511_v35 = vadd.f32 %v3158_v37, %v1472_v16 }
 0x1e8   : > { %v1857_v25 = vadd.f32 %v1825_v49, %v1604_v46  ;;  %v1826_v43 = vsel %vm1762_vm1, %v1730_v22, %v1794_v30  ;;  %v1606_v20 = vsel %vm1542_vm2, %v1510_v55, %v1574_v17  ;;  %v1693_v33 = vmul.f32 %v3161_v27, %v3759_v41 }
 0x1e9   : > { %v1858_v28 = vadd.f32 %v1826_v43, %v1605_v39  ;;  %vm1763_vm3 = vcmp.ge.f32.partialorder %v1731_v54, 0.0  ;;  %v1795_v45 = vmul.f32 0.2, %v1731_v54  ;;  %v3760_v26 = vsub.f32 %v3720_v56, %v3033_v32 }
 0x1ea   : > { %1890 = vst.msk [vmem:[%s2431_s15 + $0x20] sm:$0xff] %vm1885_vm5, %v1857_v25  ;;  %v3761_v48 = vsub.f32 %v2555_v59, %v3036_v11  ;;  %vm1543_vm4 = vcmp.ge.f32.partialorder %v1511_v35, 0.0  ;;  %v1575_v53 = vmul.f32 0.2, %v1511_v35  ;;  %v1732_v34 = vadd.f32 %v3176_v58, %v1693_v33 }
 0x1eb   : > { %v1473_v42 = vmul.f32 %v3147_v62, %v3760_v26  ;;  %1891 = vst.msk [vmem:[%s2431_s15 + $0x28] sm:$0xff] %vm1885_vm5, %v1858_v28  ;;  %v3762_v4 = vsub.f32 %v3721_v2, %v3033_v32  ;;  %v1827_v56 = vsel %vm1763_vm3, %v1731_v54, %v1795_v45  ;;  %v3763_v59 = vsub.f32 %v2563_v63, %v3036_v11 }
 0x1ec   : > { %v1694_v51 = vmul.f32 %v3161_v27, %v3761_v48  ;;  %v1859_v47 = vadd.f32 %v1827_v56, %v1606_v20  ;;  %v1607_v24 = vsel %vm1543_vm4, %v1511_v35, %v1575_v53  ;;  %vm1764_vm6 = vcmp.ge.f32.partialorder %v1732_v34, 0.0 }
 0x1ed   : > { %v1474_v40 = vmul.f32 %v3147_v62, %v3762_v4  ;;  %v1512_v19 = vadd.f32 %v3158_v37, %v1473_v42  ;;  %v1695_v55 = vmul.f32 %v3161_v27, %v3763_v59  ;;  %v1796_v60 = vmul.f32 0.2, %v1732_v34 }
 0x1ee   : > { %v1733_v22 = vadd.f32 %v3176_v58, %v1694_v51  ;;  %1892 = vst.msk [vmem:[%s2431_s15 + $0x30] sm:$0xff] %vm1885_vm5, %v1859_v47  ;;  %v3764_v63 = vsub.f32 %v3722_v13, %v3033_v32  ;;  %v3765_v25 = vsub.f32 %v2551_v57, %v3036_v11  ;;  %v3766_v35 = vsub.f32 %v3723_v29, %v3033_v32 }
 0x1ef   : > { %vm1544_vm7 = vcmp.ge.f32.partialorder %v1512_v19, 0.0  ;;  %v1576_v16 = vmul.f32 0.2, %v1512_v19  ;;  %v1828_v6 = vsel %vm1764_vm6, %v1732_v34, %v1796_v60  ;;  %v1513_v9 = vadd.f32 %v3158_v37, %v1474_v40 }
 0x1f0   : > { %vm1765_vm8 = vcmp.ge.f32.partialorder %v1733_v22, 0.0  ;;  %v1797_v2 = vmul.f32 0.2, %v1733_v22  ;;  %v1734_v12 = vadd.f32 %v3176_v58, %v1695_v55  ;;  %v1475_v30 = vmul.f32 %v3147_v62, %v3764_v63 }
 0x1f1   : > { %v1860_v46 = vadd.f32 %v1828_v6, %v1607_v24  ;;  %v1608_v49 = vsel %vm1544_vm7, %v1512_v19, %v1576_v16  ;;  %v1696_v39 = vmul.f32 %v3161_v27, %v3765_v25  ;;  %vm1545_vm9 = vcmp.ge.f32.partialorder %v1513_v9, 0.0 }
 0x1f2   : > { %v1829_v17 = vsel %vm1765_vm8, %v1733_v22, %v1797_v2  ;;  %v1577_v54 = vmul.f32 0.2, %v1513_v9  ;;  %vm1766_vm10 = vcmp.ge.f32.partialorder %v1734_v12, 0.0  ;;  %v1798_v28 = vmul.f32 0.2, %v1734_v12 }
 0x1f3   : > { %v1861_v43 = vadd.f32 %v1829_v17, %v1608_v49  ;;  %1893 = vst.msk [vmem:[%s2431_s15 + $0x38] sm:$0xff] %vm1885_vm5, %v1860_v46  ;;  %v1514_v20 = vadd.f32 %v3158_v37, %v1475_v30  ;;  %v1735_v13 = vadd.f32 %v3176_v58, %v1696_v39  ;;  %v1476_v41 = vmul.f32 %v3147_v62, %v3766_v35 }
 0x1f4   : > { %v1609_v57 = vsel %vm1545_vm9, %v1513_v9, %v1577_v54  ;;  %v3767_v33 = vsub.f32 %v2559_v61, %v3036_v11  ;;  %v3768_v26 = vsub.f32 %v3724_v36, %v3033_v32  ;;  %v3769_v48 = vsub.f32 %v2571_v3, %v3036_v11 }
 0x1f5   : > { %1894 = vst.msk [vmem:[%s2431_s15 + $0x40] sm:$0xff] %vm1885_vm5, %v1861_v43  ;;  %v1830_v51 = vsel %vm1766_vm10, %v1734_v12, %v1798_v28  ;;  %vm1546_vm11 = vcmp.ge.f32.partialorder %v1514_v20, 0.0  ;;  %v1578_v53 = vmul.f32 0.2, %v1514_v20  ;;  %vm1767_vm12 = vcmp.ge.f32.partialorder %v1735_v13, 0.0 }
 0x1f6   : > { %v1697_v45 = vmul.f32 %v3161_v27, %v3767_v33  ;;  %v1477_v42 = vmul.f32 %v3147_v62, %v3768_v26  ;;  %v1698_v29 = vmul.f32 %v3161_v27, %v3769_v48  ;;  %v1862_v34 = vadd.f32 %v1830_v51, %v1609_v57 }
 0x1f7   : > { %v1799_v4 = vmul.f32 0.2, %v1735_v13  ;;  %v1515_v61 = vadd.f32 %v3158_v37, %v1476_v41  ;;  %v1610_v56 = vsel %vm1546_vm11, %v1514_v20, %v1578_v53  ;;  %v3770_v3 = vsub.f32 %v3725_v50, %v3033_v32 }
 0x1f8   : > { %v1736_v40 = vadd.f32 %v3176_v58, %v1697_v45  ;;  %v1516_v36 = vadd.f32 %v3158_v37, %v1477_v42  ;;  %v1737_v19 = vadd.f32 %v3176_v58, %v1698_v29  ;;  %1895 = vst.msk [vmem:[%s2431_s15 + $0x48] sm:$0xff] %vm1885_vm5, %v1862_v34  ;;  %v3771_v12 = vsub.f32 %v2579_v7, %v3036_v11 }
 0x1f9   : > { %v1478_v22 = vmul.f32 %v3147_v62, %v3770_v3  ;;  %v1831_v59 = vsel %vm1767_vm12, %v1735_v13, %v1799_v4  ;;  %vm1547_vm13 = vcmp.ge.f32.partialorder %v1515_v61, 0.0  ;;  %v1579_v55 = vmul.f32 0.2, %v1515_v61 }
 0x1fa   : > { %vm1768_vm14 = vcmp.ge.f32.partialorder %v1736_v40, 0.0  ;;  %v1863_v47 = vadd.f32 %v1831_v59, %v1610_v56  ;;  %v1800_v24 = vmul.f32 0.2, %v1736_v40  ;;  %vm1548_vm15 = vcmp.ge.f32.partialorder %v1516_v36, 0.0 }
 0x1fb   : > { %v1580_v60 = vmul.f32 0.2, %v1516_v36  ;;  %v1611_v16 = vsel %vm1547_vm13, %v1515_v61, %v1579_v55  ;;  %vm1769_vm0 = vcmp.ge.f32.partialorder %v1737_v19, 0.0  ;;  %v1801_v2 = vmul.f32 0.2, %v1737_v19 }
 0x1fc   : > { %v1517_v6 = vadd.f32 %v3158_v37, %v1478_v22  ;;  %1896 = vst.msk [vmem:[%s2431_s15 + $0x50] sm:$0xff] %vm1885_vm5, %v1863_v47  ;;  %v1832_v50 = vsel %vm1768_vm14, %v1736_v40, %v1800_v24  ;;  %v1699_v63 = vmul.f32 %v3161_v27, %v3771_v12  ;;  %v3772_v30 = vsub.f32 %v2565_v0, %v3033_v32 }
 0x1fd   : > { %v1612_v9 = vsel %vm1548_vm15, %v1516_v36, %v1580_v60  ;;  %v1864_v49 = vadd.f32 %v1832_v50, %v1611_v16  ;;  %v1833_v17 = vsel %vm1769_vm0, %v1737_v19, %v1801_v2  ;;  %v3773_v7 = vsub.f32 %v2567_v1, %v3036_v11 }
 0x1fe   : > { %v1479_v46 = vmul.f32 %v3147_v62, %v3772_v30  ;;  %vm1549_vm1 = vcmp.ge.f32.partialorder %v1517_v6, 0.0  ;;  %v1581_v25 = vmul.f32 0.2, %v1517_v6  ;;  %v1865_v39 = vadd.f32 %v1833_v17, %v1612_v9 }
 0x1ff   : > { %v1738_v43 = vadd.f32 %v3176_v58, %v1699_v63  ;;  %v1700_v28 = vmul.f32 %v3161_v27, %v3773_v7  ;;  %1897 = vst.msk [vmem:[%s2431_s15 + $0x58] sm:$0xff] %vm1885_vm5, %v1864_v49  ;;  %v3774_v0 = vsub.f32 %v3726_v15, %v3033_v32  ;;  %v3775_v35 = vsub.f32 %v2575_v5, %v3036_v11 }
 0x200   : > { %v1518_v54 = vadd.f32 %v3158_v37, %v1479_v46  ;;  %v1613_v20 = vsel %vm1549_vm1, %v1517_v6, %v1581_v25  ;;  %v3776_v57 = vsub.f32 %v2585_v10, %v3033_v32  ;;  %1898 = vst.msk [vmem:[%s2431_s15 + $0x60] sm:$0xff] %vm1885_vm5, %v1865_v39  ;;  %v3777_v10 = vsub.f32 %v3727_v44, %v3036_v11 }
 0x201   : > { %v1480_v13 = vmul.f32 %v3147_v62, %v3774_v0  ;;  %v1701_v41 = vmul.f32 %v3161_v27, %v3775_v35  ;;  %vm1770_vm2 = vcmp.ge.f32.partialorder %v1738_v43, 0.0  ;;  %v1802_v33 = vmul.f32 0.2, %v1738_v43 }
 0x202   : > { %v1481_v1 = vmul.f32 %v3147_v62, %v3776_v57  ;;  %vm1550_vm3 = vcmp.ge.f32.partialorder %v1518_v54, 0.0  ;;  %v1582_v45 = vmul.f32 0.2, %v1518_v54  ;;  %v1739_v15 = vadd.f32 %v3176_v58, %v1700_v28 }
 0x203   : > { %v1519_v26 = vadd.f32 %v3158_v37, %v1480_v13  ;;  %v1740_v5 = vadd.f32 %v3176_v58, %v1701_v41  ;;  %v1834_v48 = vsel %vm1770_vm2, %v1738_v43, %v1802_v33  ;;  %v1702_v51 = vmul.f32 %v3161_v27, %v3777_v10  ;;  %v3786_v13 = vld [vmem:[#allocation31_spill] sm:$0xff] }
 0x204   : > { %v1520_v42 = vadd.f32 %v3158_v37, %v1481_v1  ;;  %v1614_v29 = vsel %vm1550_vm3, %v1518_v54, %v1582_v45  ;;  %v3778_v53 = vsub.f32 %v2593_v14, %v3033_v32  ;;  %v1866_v4 = vadd.f32 %v1834_v48, %v1613_v20 }
 0x205   : > { %vm1771_vm4 = vcmp.ge.f32.partialorder %v1739_v15, 0.0  ;;  %v1803_v61 = vmul.f32 0.2, %v1739_v15  ;;  %vm1551_vm6 = vcmp.ge.f32.partialorder %v1519_v26, 0.0  ;;  %v1583_v40 = vmul.f32 0.2, %v1519_v26 }
 0x206   : > { %v1482_v34 = vmul.f32 %v3147_v62, %v3778_v53  ;;  %vm1772_vm7 = vcmp.ge.f32.partialorder %v1740_v5, 0.0  ;;  %v1804_v56 = vmul.f32 0.2, %v1740_v5  ;;  %vm1552_vm8 = vcmp.ge.f32.partialorder %v1520_v42, 0.0  ;;  %1899 = vst.msk [vmem:[%s2431_s15 + $0x68] sm:$0xff] %vm1885_vm5, %v1866_v4 }
 0x207   : > { %v1835_v36 = vsel %vm1771_vm4, %v1739_v15, %v1803_v61  ;;  %v1584_v44 = vmul.f32 0.2, %v1520_v42  ;;  %v1741_v19 = vadd.f32 %v3176_v58, %v1702_v51  ;;  %v1615_v22 = vsel %vm1551_vm6, %v1519_v26, %v1583_v40 }
 0x208   : > { %v1521_v14 = vadd.f32 %v3158_v37, %v1482_v34  ;;  %v1867_v3 = vadd.f32 %v1835_v36, %v1614_v29  ;;  %v1836_v59 = vsel %vm1772_vm7, %v1740_v5, %v1804_v56  ;;  %v3779_v55 = vsub.f32 %v3728_v23, %v3036_v11  ;;  %v3788_v29 = vld [vmem:[#allocation32_spill] sm:$0xff] }
 0x209   : > { %v1868_v24 = vadd.f32 %v1836_v59, %v1615_v22  ;;  %v1616_v60 = vsel %vm1552_vm8, %v1520_v42, %v1584_v44  ;;  %vm1773_vm9 = vcmp.ge.f32.partialorder %v1741_v19, 0.0  ;;  %v1805_v16 = vmul.f32 0.2, %v1741_v19  ;;  %v3792_v59 = vld [vmem:[#allocation27_spill] sm:$0xff] }
 0x20a   : > { %v1703_v47 = vmul.f32 %v3161_v27, %v3779_v55  ;;  %1900 = vst.msk [vmem:[%s2431_s15 + $0x70] sm:$0xff] %vm1885_vm5, %v1867_v3  ;;  %vm1553_vm10 = vcmp.ge.f32.partialorder %v1521_v14, 0.0  ;;  %v1585_v2 = vmul.f32 0.2, %v1521_v14  ;;  %v3780_v50 = vsub.f32 %v2581_v8, %v3033_v32 }
 0x20b   : > { %1901 = vst.msk [vmem:[%s2431_s15 + $0x78] sm:$0xff] %vm1885_vm5, %v1868_v24  ;;  %v1837_v23 = vsel %vm1773_vm9, %v1741_v19, %v1805_v16  ;;  %v3781_v12 = vsub.f32 %v3729_v21, %v3036_v11  ;;  %v3782_v30 = vsub.f32 %v3730_v31, %v3033_v32  ;;  %v3783_v49 = vsub.f32 %v3731_v38, %v3036_v11  ;;  %v3790_v19 = vld [vmem:[#allocation26_spill] sm:$0xff]  ;;  %v3794_v24 = vld [vmem:[#allocation29_spill] sm:$0xff] }
 0x20c   : > { %v1742_v6 = vadd.f32 %v3176_v58, %v1703_v47  ;;  %v1483_v9 = vmul.f32 %v3147_v62, %v3780_v50  ;;  %v1869_v17 = vadd.f32 %v1837_v23, %v1616_v60  ;;  %v1617_v25 = vsel %vm1553_vm10, %v1521_v14, %v1585_v2  ;;  %v3796_v2 = vld [vmem:[#allocation30_spill] sm:$0xff] }
 0x20d   : > { %v1704_v63 = vmul.f32 %v3161_v27, %v3781_v12  ;;  %v1484_v46 = vmul.f32 %v3147_v62, %v3782_v30  ;;  %v1705_v8 = vmul.f32 %v3161_v27, %v3783_v49  ;;  %v3784_v38 = vsub.f32 %v2601_v18, %v3033_v32 }
 0x20e   : > { %vm1774_vm11 = vcmp.ge.f32.partialorder %v1742_v6, 0.0  ;;  %v1806_v39 = vmul.f32 0.2, %v1742_v6  ;;  %v1522_v43 = vadd.f32 %v3158_v37, %v1483_v9  ;;  %1902 = vst.msk [vmem:[%s2431_s15 + $0x80] sm:$0xff] %vm1885_vm5, %v1869_v17  ;;  %v3785_v20 = vsub.f32 %v3732_v52, %v3036_v11  ;;  %v3798_v17 = vld [vmem:[#allocation35_spill] sm:$0xff] }
 0x20f   : > { %v1743_v21 = vadd.f32 %v3176_v58, %v1704_v63  ;;  %v1523_v54 = vadd.f32 %v3158_v37, %v1484_v46  ;;  %v1744_v31 = vadd.f32 %v3176_v58, %v1705_v8  ;;  %v1485_v28 = vmul.f32 %v3147_v62, %v3784_v38 }
 0x210   : > { %v1838_v7 = vsel %vm1774_vm11, %v1742_v6, %v1806_v39  ;;  %v1706_v0 = vmul.f32 %v3161_v27, %v3785_v20  ;;  %v3787_v35 = vsub.f32 %v3786_v13, %v3033_v32  ;;  %vm1554_vm12 = vcmp.ge.f32.partialorder %v1522_v43, 0.0 }
 0x211   : > { %v1870_v57 = vadd.f32 %v1838_v7, %v1617_v25  ;;  %v1586_v1 = vmul.f32 0.2, %v1522_v43  ;;  %vm1775_vm13 = vcmp.ge.f32.partialorder %v1743_v21, 0.0  ;;  %v1807_v33 = vmul.f32 0.2, %v1743_v21 }
 0x212   : > { %v1486_v41 = vmul.f32 %v3147_v62, %v3787_v35  ;;  %vm1555_vm14 = vcmp.ge.f32.partialorder %v1523_v54, 0.0  ;;  %v1587_v45 = vmul.f32 0.2, %v1523_v54  ;;  %vm1776_vm15 = vcmp.ge.f32.partialorder %v1744_v31, 0.0 }
 0x213   : > { %1903 = vst.msk [vmem:[%s2431_s15 + $0x88] sm:$0xff] %vm1885_vm5, %v1870_v57  ;;  %v1618_v18 = vsel %vm1554_vm12, %v1522_v43, %v1586_v1  ;;  %v1808_v52 = vmul.f32 0.2, %v1744_v31  ;;  %v1524_v15 = vadd.f32 %v3158_v37, %v1485_v28  ;;  %v1745_v26 = vadd.f32 %v3176_v58, %v1706_v0  ;;  %v3800_v43 = vld [vmem:[#allocation36_spill] sm:$0xff] }
 0x214   : > { %v1839_v5 = vsel %vm1775_vm13, %v1743_v21, %v1807_v33  ;;  %v1619_v42 = vsel %vm1555_vm14, %v1523_v54, %v1587_v45  ;;  %v1525_v48 = vadd.f32 %v3158_v37, %v1486_v41  ;;  %v3789_v10 = vsub.f32 %v3788_v29, %v3036_v11 }
 0x215   : > { %v1871_v53 = vadd.f32 %v1839_v5, %v1618_v18  ;;  %v1840_v34 = vsel %vm1776_vm15, %v1744_v31, %v1808_v52  ;;  %vm1556_vm0 = vcmp.ge.f32.partialorder %v1524_v15, 0.0  ;;  %v1588_v4 = vmul.f32 0.2, %v1524_v15  ;;  %v3802_v31 = vld [vmem:[#allocation39_spill] sm:$0xff]  ;;  %v3804_v52 = vld [vmem:[#allocation40_spill] sm:$0xff] }
 0x216   : > { %v1707_v51 = vmul.f32 %v3161_v27, %v3789_v10  ;;  %v1872_v61 = vadd.f32 %v1840_v34, %v1619_v42  ;;  %vm1777_vm1 = vcmp.ge.f32.partialorder %v1745_v26, 0.0  ;;  %v1809_v40 = vmul.f32 0.2, %v1745_v26 }
 0x217   : > { %vm1557_vm2 = vcmp.ge.f32.partialorder %v1525_v48, 0.0  ;;  %1904 = vst.msk [vmem:[%s2431_s15 + $0x90] sm:$0xff] %vm1885_vm5, %v1871_v53  ;;  %v1620_v56 = vsel %vm1556_vm0, %v1524_v15, %v1588_v4  ;;  %v1589_v36 = vmul.f32 0.2, %v1525_v48  ;;  %v3791_v14 = vsub.f32 %v3790_v19, %v3033_v32  ;;  %v3806_v4 = vld [vmem:[#allocation33_spill] sm:$0xff] }
 0x218   : > { %v1746_v44 = vadd.f32 %v3176_v58, %v1707_v51  ;;  %1905 = vst.msk [vmem:[%s2431_s15 + $0x98] sm:$0xff] %vm1885_vm5, %v1872_v61  ;;  %v1841_v22 = vsel %vm1777_vm1, %v1745_v26, %v1809_v40  ;;  %v3793_v55 = vsub.f32 %v3792_v59, %v3036_v11  ;;  %v3795_v60 = vsub.f32 %v3794_v24, %v3033_v32  ;;  %v3812_v59 = vld [vmem:[#allocation38_spill] sm:$0xff] }
 0x219   : > { %v1487_v3 = vmul.f32 %v3147_v62, %v3791_v14  ;;  %v3797_v6 = vsub.f32 %v3796_v2, %v3036_v11  ;;  %v1873_v9 = vadd.f32 %v1841_v22, %v1620_v56  ;;  %v1621_v23 = vsel %vm1557_vm2, %v1525_v48, %v1589_v36  ;;  %v3808_v36 = vld [vmem:[#allocation34_spill] sm:$0xff]  ;;  %v3810_v14 = vld [vmem:[#allocation37_spill] sm:$0xff] }
 0x21a   : > { %v1708_v47 = vmul.f32 %v3161_v27, %v3793_v55  ;;  %v1488_v16 = vmul.f32 %v3147_v62, %v3795_v60  ;;  %vm1778_vm3 = vcmp.ge.f32.partialorder %v1746_v44, 0.0  ;;  %v1810_v12 = vmul.f32 0.2, %v1746_v44 }
 0x21b   : > { %v1709_v50 = vmul.f32 %v3161_v27, %v3797_v6  ;;  %v1526_v63 = vadd.f32 %v3158_v37, %v1487_v3  ;;  %1906 = vst.msk [vmem:[%s2431_s15 + $0xa0] sm:$0xff] %vm1885_vm5, %v1873_v9  ;;  %v3799_v25 = vsub.f32 %v3798_v17, %v3033_v32  ;;  %v3801_v21 = vsub.f32 %v3800_v43, %v3036_v11 }
 0x21c   : > { %v1747_v30 = vadd.f32 %v3176_v58, %v1708_v47  ;;  %v1527_v46 = vadd.f32 %v3158_v37, %v1488_v16  ;;  %v1842_v8 = vsel %vm1778_vm3, %v1746_v44, %v1810_v12  ;;  %v3803_v7 = vsub.f32 %v3802_v31, %v3033_v32  ;;  %v3814_v12 = vld [vmem:[#allocation43_spill] sm:$0xff] }
 0x21d   : > { %v1748_v49 = vadd.f32 %v3176_v58, %v1709_v50  ;;  %v1489_v39 = vmul.f32 %v3147_v62, %v3799_v25  ;;  %v1710_v54 = vmul.f32 %v3161_v27, %v3801_v21  ;;  %v1874_v28 = vadd.f32 %v1842_v8, %v1621_v23  ;;  %v3817_v8 = vld [vmem:[#allocation47_spill] sm:$0xff] }
 0x21e   : > { %v1490_v38 = vmul.f32 %v3147_v62, %v3803_v7  ;;  %vm1558_vm4 = vcmp.ge.f32.partialorder %v1526_v63, 0.0  ;;  %v1590_v20 = vmul.f32 0.2, %v1526_v63  ;;  %vm1779_vm6 = vcmp.ge.f32.partialorder %v1747_v30, 0.0 }
 0x21f   : > { %v1811_v0 = vmul.f32 0.2, %v1747_v30  ;;  %vm1559_vm7 = vcmp.ge.f32.partialorder %v1527_v46, 0.0  ;;  %v1591_v13 = vmul.f32 0.2, %v1527_v46  ;;  %vm1780_vm8 = vcmp.ge.f32.partialorder %v1748_v49, 0.0 }
 0x220   : > { %1907 = vst.msk [vmem:[%s2431_s15 + $0xa8] sm:$0xff] %vm1885_vm5, %v1874_v28  ;;  %v1622_v35 = vsel %vm1558_vm4, %v1526_v63, %v1590_v20  ;;  %v1812_v41 = vmul.f32 0.2, %v1748_v49  ;;  %v1528_v57 = vadd.f32 %v3158_v37, %v1489_v39  ;;  %v1749_v1 = vadd.f32 %v3176_v58, %v1710_v54 }
 0x221   : > { %v1843_v33 = vsel %vm1779_vm6, %v1747_v30, %v1811_v0  ;;  %v1623_v45 = vsel %vm1559_vm7, %v1527_v46, %v1591_v13  ;;  %v1529_v18 = vadd.f32 %v3158_v37, %v1490_v38  ;;  %v3805_v15 = vsub.f32 %v3804_v52, %v3036_v11  ;;  %v3816_v46 = vld [vmem:[#allocation44_spill] sm:$0xff] }
 0x222   : > { %v1875_v5 = vadd.f32 %v1843_v33, %v1622_v35  ;;  %v1844_v42 = vsel %vm1780_vm8, %v1748_v49, %v1812_v41  ;;  %vm1560_vm9 = vcmp.ge.f32.partialorder %v1528_v57, 0.0  ;;  %v1592_v48 = vmul.f32 0.2, %v1528_v57  ;;  %v3818_v13 = vld [vmem:[#allocation48_spill] sm:$0xff] }
 0x223   : > { %v1711_v26 = vmul.f32 %v3161_v27, %v3805_v15  ;;  %v1876_v29 = vadd.f32 %v1844_v42, %v1623_v45  ;;  %vm1781_vm10 = vcmp.ge.f32.partialorder %v1749_v1, 0.0  ;;  %v1813_v10 = vmul.f32 0.2, %v1749_v1  ;;  %v3820_v42 = vld [vmem:[#allocation42_spill] sm:$0xff] }
 0x224   : > { %vm1561_vm11 = vcmp.ge.f32.partialorder %v1529_v18, 0.0  ;;  %1908 = vst.msk [vmem:[%s2431_s15 + $0xb0] sm:$0xff] %vm1885_vm5, %v1875_v5  ;;  %v1624_v51 = vsel %vm1560_vm9, %v1528_v57, %v1592_v48  ;;  %v1593_v53 = vmul.f32 0.2, %v1529_v18  ;;  %v3807_v61 = vsub.f32 %v3806_v4, %v3033_v32 }
 0x225   : > { %v1750_v34 = vadd.f32 %v3176_v58, %v1711_v26  ;;  %1909 = vst.msk [vmem:[%s2431_s15 + $0xb8] sm:$0xff] %vm1885_vm5, %v1876_v29  ;;  %v1845_v56 = vsel %vm1781_vm10, %v1749_v1, %v1813_v10  ;;  %v3809_v44 = vsub.f32 %v3808_v36, %v3036_v11  ;;  %v3811_v3 = vsub.f32 %v3810_v14, %v3033_v32  ;;  %v3819_v26 = vld [vmem:[#allocation41_spill] sm:$0xff] }
 0x226   : > { %v1491_v40 = vmul.f32 %v3147_v62, %v3807_v61  ;;  %v3813_v55 = vsub.f32 %v3812_v59, %v3036_v11  ;;  %v1877_v24 = vadd.f32 %v1845_v56, %v1624_v51  ;;  %v1625_v60 = vsel %vm1561_vm11, %v1529_v18, %v1593_v53  ;;  %v3821_v29 = vld [vmem:[#allocation45_spill] sm:$0xff] }
 0x227   : > { %v1712_v19 = vmul.f32 %v3161_v27, %v3809_v44  ;;  %v1492_v22 = vmul.f32 %v3147_v62, %v3811_v3  ;;  %vm1782_vm12 = vcmp.ge.f32.partialorder %v1750_v34, 0.0  ;;  %v1814_v16 = vmul.f32 0.2, %v1750_v34  ;;  %v3822_v44 = vld [vmem:[#allocation46_spill] sm:$0xff] }
 0x228   : > { %v1713_v47 = vmul.f32 %v3161_v27, %v3813_v55  ;;  %v1530_v2 = vadd.f32 %v3158_v37, %v1491_v40  ;;  %1910 = vst.msk [vmem:[%s2431_s15 + $0xc0] sm:$0xff] %vm1885_vm5, %v1877_v24  ;;  %v3815_v63 = vsub.f32 %v3814_v12, %v3033_v32  ;;  %v1676_v49 = vsub.f32 %v3816_v46, %v3036_v11 }
 0x229   : > { %v1751_v6 = vadd.f32 %v3176_v58, %v1712_v19  ;;  %v1531_v50 = vadd.f32 %v3158_v37, %v1492_v22  ;;  %v1846_v23 = vsel %vm1782_vm12, %v1750_v34, %v1814_v16  ;;  %v1456_v17 = vsub.f32 %v3817_v8, %v3033_v32 }
 0x22a   : > { %v1752_v9 = vadd.f32 %v3176_v58, %v1713_v47  ;;  %v1493_v30 = vmul.f32 %v3147_v62, %v3815_v63  ;;  %v1878_v25 = vadd.f32 %v1846_v23, %v1625_v60  ;;  %vm1562_vm13 = vcmp.ge.f32.partialorder %v1530_v2, 0.0 }
 0x22b   : > { %v1594_v39 = vmul.f32 0.2, %v1530_v2  ;;  %vm1783_vm14 = vcmp.ge.f32.partialorder %v1751_v6, 0.0  ;;  %v1815_v43 = vmul.f32 0.2, %v1751_v6  ;;  %vm1563_vm15 = vcmp.ge.f32.partialorder %v1531_v50, 0.0 }
 0x22c   : > { %v1595_v21 = vmul.f32 0.2, %v1531_v50  ;;  %vm1784_vm0 = vcmp.ge.f32.partialorder %v1752_v9, 0.0  ;;  %1911 = vst.msk [vmem:[%s2431_s15 + $0xc8] sm:$0xff] %vm1885_vm5, %v1878_v25  ;;  %v1816_v31 = vmul.f32 0.2, %v1752_v9  ;;  %v1532_v7 = vadd.f32 %v3158_v37, %v1493_v30 }
 0x22d   : > { %v1626_v54 = vsel %vm1562_vm13, %v1530_v2, %v1594_v39  ;;  %v1714_v38 = vmul.f32 %v3161_v27, %v1676_v49  ;;  %v1847_v28 = vsel %vm1783_vm14, %v1751_v6, %v1815_v43  ;;  %v1494_v0 = vmul.f32 %v3147_v62, %v1456_v17 }
 0x22e   : > { %v1627_v20 = vsel %vm1563_vm15, %v1531_v50, %v1595_v21  ;;  %v1677_v35 = vsub.f32 %v3818_v13, %v3036_v11  ;;  %v1879_v41 = vadd.f32 %v1847_v28, %v1626_v54  ;;  %v1848_v57 = vsel %vm1784_vm0, %v1752_v9, %v1816_v31 }
 0x22f   : > { %vm1564_vm1 = vcmp.ge.f32.partialorder %v1532_v7, 0.0  ;;  %v1596_v1 = vmul.f32 0.2, %v1532_v7  ;;  %v1880_v33 = vadd.f32 %v1848_v57, %v1627_v20  ;;  %v1753_v45 = vadd.f32 %v3176_v58, %v1714_v38 }
 0x230   : > { %v1533_v18 = vadd.f32 %v3158_v37, %v1494_v0  ;;  %v1715_v52 = vmul.f32 %v3161_v27, %v1677_v35  ;;  %1912 = vst.msk [vmem:[%s2431_s15 + $0xd0] sm:$0xff] %vm1885_vm5, %v1879_v41  ;;  %v1457_v5 = vsub.f32 %v3819_v26, %v3033_v32  ;;  %v1678_v48 = vsub.f32 %v3820_v42, %v3036_v11 }
 0x231   : > { %v1628_v15 = vsel %vm1564_vm1, %v1532_v7, %v1596_v1  ;;  %v1458_v10 = vsub.f32 %v3821_v29, %v3033_v32  ;;  %1913 = vst.msk [vmem:[%s2431_s15 + $0xd8] sm:$0xff] %vm1885_vm5, %v1880_v33  ;;  %vm1785_vm2 = vcmp.ge.f32.partialorder %v1753_v45, 0.0  ;;  %v1817_v51 = vmul.f32 0.2, %v1753_v45 }
 0x232   : > { %vm1565_vm3 = vcmp.ge.f32.partialorder %v1533_v18, 0.0  ;;  %v1597_v53 = vmul.f32 0.2, %v1533_v18  ;;  %v1754_v34 = vadd.f32 %v3176_v58, %v1715_v52  ;;  %v1495_v4 = vmul.f32 %v3147_v62, %v1457_v5 }
 0x233   : > { %v1716_v61 = vmul.f32 %v3161_v27, %v1678_v48  ;;  %v1496_v40 = vmul.f32 %v3147_v62, %v1458_v10  ;;  %v1849_v56 = vsel %vm1785_vm2, %v1753_v45, %v1817_v51  ;;  %v1679_v32 = vsub.f32 %v3822_v44, %v3036_v11 }
 0x234   : > { %v1629_v36 = vsel %vm1565_vm3, %v1533_v18, %v1597_v53  ;;  %v1881_v19 = vadd.f32 %v1849_v56, %v1628_v15  ;;  %vm1786_vm4 = vcmp.ge.f32.partialorder %v1754_v34, 0.0  ;;  %v1818_v14 = vmul.f32 0.2, %v1754_v34 }
 0x235   : > { %v1534_v3 = vadd.f32 %v3158_v37, %v1495_v4  ;;  %v1755_v22 = vadd.f32 %v3176_v58, %v1716_v61  ;;  %v1535_v59 = vadd.f32 %v3158_v37, %v1496_v40  ;;  %v1717_v55 = vmul.f32 %v3161_v27, %v1679_v32 }
 0x236   : > { %1914 = vst.msk [vmem:[%s2431_s15 + $0xe0] sm:$0xff] %vm1885_vm5, %v1881_v19  ;;  %v1850_v62 = vsel %vm1786_vm4, %v1754_v34, %v1818_v14 }
 0x237   : > { %vm1566_vm6 = vcmp.ge.f32.partialorder %v1534_v3, 0.0  ;;  %v1598_v47 = vmul.f32 0.2, %v1534_v3  ;;  %v1882_v24 = vadd.f32 %v1850_v62, %v1629_v36  ;;  %vm1787_vm7 = vcmp.ge.f32.partialorder %v1755_v22, 0.0 }
 0x238   : > { %v1819_v11 = vmul.f32 0.2, %v1755_v22  ;;  %vm1567_vm8 = vcmp.ge.f32.partialorder %v1535_v59, 0.0  ;;  %v1599_v16 = vmul.f32 0.2, %v1535_v59  ;;  %v1756_v2 = vadd.f32 %v3176_v58, %v1717_v55 }
 0x239   : > { %v1630_v60 = vsel %vm1566_vm6, %v1534_v3, %v1598_v47  ;;  %1915 = vst.msk [vmem:[%s2431_s15 + $0xe8] sm:$0xff] %vm1885_vm5, %v1882_v24 }
 0x23a   : > { %v1851_v37 = vsel %vm1787_vm7, %v1755_v22, %v1819_v11  ;;  %v1631_v27 = vsel %vm1567_vm8, %v1535_v59, %v1599_v16  ;;  %vm1788_vm9 = vcmp.ge.f32.partialorder %v1756_v2, 0.0  ;;  %v1820_v50 = vmul.f32 0.2, %v1756_v2 }
 0x23b   : > { %v1883_v6 = vadd.f32 %v1851_v37, %v1630_v60 }
 0x23c   : > { %v1852_v9 = vsel %vm1788_vm9, %v1756_v2, %v1820_v50 }
 0x23d   : > { %1916 = vst.msk [vmem:[%s2431_s15 + $0xf0] sm:$0xff] %vm1885_vm5, %v1883_v6  ;;  %v1884_v23 = vadd.f32 %v1852_v9, %v1631_v27 }
 0x23f   : > { %1917 = vst.msk [vmem:[%s2431_s15 + $0xf8] sm:$0xff] %vm1885_vm5, %v1884_v23 }
 0x240 PF: > { %s18_s9 = sadd.s32 1, %s2325_s9   ;;  %s3823_s27 = smov %s2317_s29 }
 0x241   : > { %p15_p12 = scmp.ge.s32.totalorder %s18_s9, 18   ;;  %s3824_s28 = smov %s2321_s30 }
 0x242   : > { %s3825_s29 = smov %s3828_s10  ;;  %s3826_s30 = smov %s3832_s11 }
 0x243   :  { %17 = sbr.rel (!%p15_p12) target bundleno = 3 (0x3), region = 97 }

</bundles_post_ra>
